<compile_context>
chip_gen: v7x
topology: tpu7x:2x2x1
jax: 0.10.0
libtpu: 0.0.40
codegen_flags: <defaults>
</compile_context>

<pallas_src>
from functools import partial

import jax
import jax.numpy as jnp
import numpy as np
from jax.experimental import pallas as pl
from jax.experimental.pallas import tpu as pltpu

LANE = 128


def _round_up(n, m):
    return ((n + m - 1) // m) * m


def _pad_axis(a, axis, size):
    if a.shape[axis] == size:
        return a
    widths = [(0, 0)] * a.ndim
    widths[axis] = (0, size - a.shape[axis])
    return jnp.pad(a, widths)


def aspp_kernel(x_hbm, w1_ref, w3_ref, wproj_ref, pool_bias_ref,
                scale_b_ref, shift_b_ref, scale_p_ref, shift_p_ref,
                o_ref, xband_ref, acc_ref, ybr_ref, dma_sem,
                *, W, band_h, Cin_p, Cout, rates, pad):
    """One (batch, row-band) step: all ASPP branches fused with the 1x1
    projection, computed on a halo'd row window fetched from HBM."""
    b = pl.program_id(0)
    j = pl.program_id(1)
    band_hw = band_h * W

    # ---- fetch the halo'd row band (band_h + 2*pad rows) for this step -----
    row0 = j * band_h                       # start row in the padded image
    cp = pltpu.make_async_copy(
        x_hbm.at[b, pl.ds(row0, band_h + 2 * pad)], xband_ref, dma_sem)
    cp.start()
    cp.wait()
    # TODO(synk): double-buffer this DMA across bands on v5e/v6e.

    def bn_relu(y, br):                     # per-branch BN + ReLU, f32
        return jnp.maximum(
            y * scale_b_ref[br:br + 1, :] + shift_b_ref[br:br + 1, :], 0.0)

    def project(y, br):                     # y @ Wproj_block_br, f32 accum
        return jnp.dot(y.astype(wproj_ref.dtype), wproj_ref[br],
                       preferred_element_type=jnp.float32)

    # ---- branch 0: 1x1 conv -> BN -> ReLU -> projected immediately ---------
    xc = xband_ref[pad:pad + band_h, pad:pad + W, :].reshape(band_hw, Cin_p)
    y0 = jnp.dot(xc, w1_ref[...], preferred_element_type=jnp.float32)
    acc_ref[...] = project(bn_relu(y0, 0), 0)   # fresh overwrite every step

    # ---- dilated 3x3 branches: nine per-tap K=Cin_p matmuls, f32 scratch ---
    for ri, r in enumerate(rates):
        for ky in range(3):
            oy = pad + (ky - 1) * r
            for kx in range(3):
                ox = pad + (kx - 1) * r
                tap = xband_ref[oy:oy + band_h, ox:ox + W, :].reshape(
                    band_hw, Cin_p)
                contrib = jnp.dot(tap, w3_ref[ri * 9 + ky * 3 + kx],
                                  preferred_element_type=jnp.float32)
                if ky == 0 and kx == 0:
                    ybr_ref[...] = contrib
                else:
                    ybr_ref[...] += contrib
        acc_ref[...] += project(bn_relu(ybr_ref[...], 1 + ri), 1 + ri)

    # ---- pooling branch: precomputed rank-1 bias row, broadcast add --------
    # ---- projection BN + ReLU (Dropout = inference identity) ---------------
    out = jnp.maximum(
        (acc_ref[...] + pool_bias_ref[0]) * scale_p_ref[...] + shift_p_ref[...],
        0.0)

    # lane-dense, NCHW-friendly writeback: (band_hw, Cout_p) -> (Cout, band_hw)
    o_ref[0] = out.T[:Cout, :].astype(o_ref.dtype)


def _pick_band_h(H, W, pad, Wp, Cin_p, Cout_p, bpe, budget_bytes=8 << 20):
    """Largest divisor of H whose per-band working set fits `budget_bytes` and
    whose flattened band (band_h*W) keeps the output store lane-dense."""
    best = None
    for d in range(1, H + 1):
        if H % d:
            continue
        if (d * W) % LANE != 0 and d != H:
            continue
        fp = ((d + 2 * pad) * Wp * Cin_p * bpe         # x band scratch
              + 2 * d * W * Cout_p * 4                 # acc + ybr f32 scratch
              + 2 * Cout_p * d * W * 4                 # double-buffered output
              + 3 * d * W * max(Cin_p, Cout_p) * 4)    # live intermediates
        if fp <= budget_bytes or best is None:
            best = d
    return best if best is not None else H


def aspp_forward(x_nchw, params, rates, Cout, compute_dtype=jnp.bfloat16,
                 band_h=None):
    """Wrapper: NCHW -> padded NHWC (+channel pad to lanes), banded Pallas
    kernel; output comes back as (N, Cout, H*W) -> pure reshape to NCHW."""
    N, Cin, H, W = x_nchw.shape
    rates = tuple(rates)
    assert len(rates) >= 1
    R = len(rates)
    nb = R + 2
    pad = max(rates)
    Wp = W + 2 * pad
    Cin_p = _round_up(Cin, LANE)
    Cout_p = _round_up(Cout, LANE)
    bpe = jnp.dtype(compute_dtype).itemsize
    hi = jax.lax.Precision.HIGHEST

    if band_h is None:
        band_h = _pick_band_h(H, W, pad, Wp, Cin_p, Cout_p, bpe)
    assert H % band_h == 0, "band_h must divide H"
    assert (band_h * W) % LANE == 0 or band_h == H, \
        "pick band_h so band_h*W is a multiple of 128 (lane-dense stores)"
    n_bands = H // band_h
    band_hw = band_h * W

    # NCHW -> NHWC + spatial halo + channel pad + cast: one fused XLA pass.
    # TODO(synk): in an NHWC end-to-end model this transpose disappears.
    x = jnp.transpose(x_nchw, (0, 2, 3, 1))
    xpad = jnp.pad(x, ((0, 0), (pad, pad), (pad, pad), (0, Cin_p - Cin)))
    xpad = xpad.astype(compute_dtype)

    # Weights: pad channel dims to lane multiples, cast to the compute dtype.
    w1 = _pad_axis(_pad_axis(params["w1"], 0, Cin_p), 1, Cout_p).astype(compute_dtype)
    w3 = _pad_axis(_pad_axis(params["w3"], 3, Cin_p), 4, Cout_p)
    w3 = w3.reshape(R * 9, Cin_p, Cout_p).astype(compute_dtype)   # per-tap slabs
    wproj_all = params["wproj"].reshape(nb, Cout, Cout)
    wproj = _pad_axis(_pad_axis(wproj_all[:R + 1], 1, Cout_p), 2, Cout_p)
    wproj = wproj.astype(compute_dtype)

    scale_b = _pad_axis(params["scale_b"][:R + 1], 1, Cout_p).astype(jnp.float32)
    shift_b = _pad_axis(params["shift_b"][:R + 1], 1, Cout_p).astype(jnp.float32)
    scale_p = _pad_axis(params["scale_p"].reshape(1, Cout), 1, Cout_p).astype(jnp.float32)
    shift_p = _pad_axis(params["shift_p"].reshape(1, Cout), 1, Cout_p).astype(jnp.float32)

    # Global-average-pool branch: needs the full image (conflicts with band
    # tiling), but its projection contribution is rank-1 per image -> fold it
    # into a per-image (1, Cout_p) bias row with tiny matvecs here.
    pooled = jnp.mean(x_nchw.astype(compute_dtype).astype(jnp.float32), axis=(2, 3))
    yp = jnp.dot(pooled.astype(compute_dtype),
                 params["wpool"].astype(compute_dtype),
                 preferred_element_type=jnp.float32, precision=hi)
    yp = jnp.maximum(yp * params["scale_b"][-1][None, :]
                     + params["shift_b"][-1][None, :], 0.0)
    pool_bias = jnp.dot(yp.astype(compute_dtype),
                        wproj_all[-1].astype(compute_dtype),
                        preferred_element_type=jnp.float32, precision=hi)
    pool_bias = _pad_axis(pool_bias, 1, Cout_p).reshape(N, 1, Cout_p)
    pool_bias = pool_bias.astype(jnp.float32)

    # Scoped-VMEM budget: band scratch + resident (double-buffered) weights +
    # f32 accumulators + live intermediates, 2x headroom, capped at 75% of the
    # chip's physical VMEM (leave compiler scratch headroom on v7x's 64 MiB,
    # allow more on 128 MiB parts).
    try:
        vmem_cap = pltpu.get_tpu_info().vmem_capacity_bytes
    except Exception:
        vmem_cap = 64 << 20
    footprint = ((band_h + 2 * pad) * Wp * Cin_p * bpe
                 + 2 * (w1.size + w3.size + wproj.size) * bpe
                 + 2 * (scale_b.size + shift_b.size + scale_p.size
                        + shift_p.size + pool_bias.size) * 4
                 + 2 * band_hw * Cout_p * 4
                 + 2 * Cout * band_hw * 4
                 + 3 * band_hw * max(Cin_p, Cout_p) * 4)
    vmem_limit = int(min(max(2 * footprint, 16 << 20), int(0.75 * vmem_cap)))

    kernel = partial(aspp_kernel, W=W, band_h=band_h, Cin_p=Cin_p, Cout=Cout,
                     rates=rates, pad=pad)

    out_flat = pl.pallas_call(
        kernel,
        grid=(N, n_bands),
        in_specs=[
            pl.BlockSpec(memory_space=pl.ANY),                 # x stays in HBM
            pl.BlockSpec(w1.shape, lambda b, j: (0, 0)),
            pl.BlockSpec(w3.shape, lambda b, j: (0, 0, 0)),
            pl.BlockSpec(wproj.shape, lambda b, j: (0, 0, 0)),
            pl.BlockSpec((1, 1, Cout_p), lambda b, j: (b, 0, 0)),
            pl.BlockSpec(scale_b.shape, lambda b, j: (0, 0)),
            pl.BlockSpec(shift_b.shape, lambda b, j: (0, 0)),
            pl.BlockSpec(scale_p.shape, lambda b, j: (0, 0)),
            pl.BlockSpec(shift_p.shape, lambda b, j: (0, 0)),
        ],
        out_specs=pl.BlockSpec((1, Cout, band_hw), lambda b, j: (b, 0, j)),
        out_shape=jax.ShapeDtypeStruct((N, Cout, H * W), jnp.float32),
        scratch_shapes=[
            pltpu.VMEM((band_h + 2 * pad, Wp, Cin_p), compute_dtype),  # x band
            pltpu.VMEM((band_hw, Cout_p), jnp.float32),                # acc
            pltpu.VMEM((band_hw, Cout_p), jnp.float32),                # ybr
            pltpu.SemaphoreType.DMA(()),
        ],
        compiler_params=pltpu.CompilerParams(
            dimension_semantics=("parallel", "parallel"),
            vmem_limit_bytes=vmem_limit),
    )(xpad, w1, w3, wproj, pool_bias, scale_b, shift_b, scale_p, shift_p)

    return out_flat.reshape(N, Cout, H, W)        # already NCHW: pure reshape


# ---------------- pure-JAX reference (for verification only) -----------------
def aspp_reference(x_nchw, params, rates, Cout):
    x = x_nchw.astype(jnp.float32)
    N, Cin, H, W = x.shape
    hi = jax.lax.Precision.HIGHEST
    dn = ("NCHW", "OIHW", "NCHW")

    def bn_relu(y, s, b):
        return jnp.maximum(y * s[None, :, None, None] + b[None, :, None, None], 0.0)

    res = []
    w1 = jnp.transpose(params["w1"])[..., None, None]             # OIHW
    y = jax.lax.conv_general_dilated(x, w1, (1, 1), "VALID",
                                     dimension_numbers=dn, precision=hi)
    res.append(bn_relu(y, params["scale_b"][0], params["shift_b"][0]))

    for ri, r in enumerate(rates):
        wk = jnp.transpose(params["w3"][ri], (3, 2, 0, 1))        # OIHW
        y = jax.lax.conv_general_dilated(x, wk, (1, 1), [(r, r), (r, r)],
                                         rhs_dilation=(r, r),
                                         dimension_numbers=dn, precision=hi)
        res.append(bn_relu(y, params["scale_b"][1 + ri], params["shift_b"][1 + ri]))

    pooled = jnp.mean(x, axis=(2, 3), keepdims=True)              # (N, Cin, 1, 1)
    wp = jnp.transpose(params["wpool"])[..., None, None]
    y = jax.lax.conv_general_dilated(pooled, wp, (1, 1), "VALID",
                                     dimension_numbers=dn, precision=hi)
    y = bn_relu(y, params["scale_b"][-1], params["shift_b"][-1])
    res.append(jnp.broadcast_to(y, (N, Cout, H, W)))              # bilinear from 1x1

    cat = jnp.concatenate(res, axis=1)
    wpr = jnp.transpose(params["wproj"])[..., None, None]
    y = jax.lax.conv_general_dilated(cat, wpr, (1, 1), "VALID",
                                     dimension_numbers=dn, precision=hi)
    return bn_relu(y, params["scale_p"], params["shift_p"])


if __name__ == "__main__":
    key = jax.random.PRNGKey(0)
    N, Cin, H, W = 2, 4, 16, 16
    Cout = 32
    rates = (2, 4)
    nb = len(rates) + 2
    eps = 1e-5

    ks = jax.random.split(key, 14)
    x = jax.random.normal(ks[0], (N, Cin, H, W), jnp.float32)

    # deterministic synthetic parameters (shapes follow ASPP.__init__)
    w1 = 0.2 * jax.random.normal(ks[1], (Cin, Cout), jnp.float32)
    w3 = 0.1 * jax.random.normal(ks[2], (len(rates), 3, 3, Cin, Cout), jnp.float32)
    wpool = 0.2 * jax.random.normal(ks[3], (Cin, Cout), jnp.float32)
    wproj = 0.05 * jax.random.normal(ks[4], (nb * Cout, Cout), jnp.float32)

    gamma_b = jax.random.uniform(ks[5], (nb, Cout), minval=0.5, maxval=1.5)
    beta_b = 0.1 * jax.random.normal(ks[6], (nb, Cout))
    mean_b = 0.1 * jax.random.normal(ks[7], (nb, Cout))
    var_b = jax.random.uniform(ks[8], (nb, Cout), minval=0.5, maxval=1.5)
    scale_b = gamma_b / jnp.sqrt(var_b + eps)
    shift_b = beta_b - mean_b * scale_b

    gamma_p = jax.random.uniform(ks[9], (Cout,), minval=0.5, maxval=1.5)
    beta_p = 0.1 * jax.random.normal(ks[10], (Cout,))
    mean_p = 0.1 * jax.random.normal(ks[11], (Cout,))
    var_p = jax.random.uniform(ks[12], (Cout,), minval=0.5, maxval=1.5)
    scale_p = gamma_p / jnp.sqrt(var_p + eps)
    shift_p = beta_p - mean_p * scale_p

    params = dict(w1=w1, w3=w3, wpool=wpool, wproj=wproj,
                  scale_b=scale_b, shift_b=shift_b,
                  scale_p=scale_p, shift_p=shift_p)

    # --- strict correctness check: f32 kernel (2 row-bands) vs f32 reference -
    out_f32 = jax.block_until_ready(
        aspp_forward(x, params, rates, Cout, compute_dtype=jnp.float32, band_h=8))
    ref_f32 = jax.block_until_ready(aspp_reference(x, params, rates, Cout))
    np.testing.assert_allclose(np.asarray(out_f32), np.asarray(ref_f32),
                               rtol=2e-3, atol=2e-3)

    # --- perf path: bf16 on the MXU, f32 accumulation, auto band selection ---
    # Compare against the reference evaluated on bf16-rounded inputs so the
    # check isolates kernel error from the (expected) input quantisation.
    rb = lambda t: t.astype(jnp.bfloat16).astype(jnp.float32)
    params_rb = dict(params, w1=rb(w1), w3=rb(w3), wpool=rb(wpool), wproj=rb(wproj))
    out_bf16 = jax.block_until_ready(
        aspp_forward(x, params, rates, Cout, compute_dtype=jnp.bfloat16))
    ref_bf16 = jax.block_until_ready(aspp_reference(rb(x), params_rb, rates, Cout))
    np.testing.assert_allclose(np.asarray(out_bf16), np.asarray(ref_bf16),
                               rtol=5e-2, atol=5e-2)

    assert out_f32.shape == (N, Cout, H, W)
    assert out_bf16.shape == (N, Cout, H, W)
    print("KERNEL_OK")
</pallas_src>

<mosaic_0001>
module attributes {stable_mosaic.version = 11 : i64} {
  func.func @aspp_kernel(%arg0: i32, %arg1: i32, %arg2: memref<2x24x24x128xf32, #tpu.memory_space<any>>, %arg3: memref<128x128xf32, #tpu.memory_space<vmem>>, %arg4: memref<18x128x128xf32, #tpu.memory_space<vmem>>, %arg5: memref<3x128x128xf32, #tpu.memory_space<vmem>>, %arg6: memref<1x1x128xf32, #tpu.memory_space<vmem>>, %arg7: memref<3x128xf32, #tpu.memory_space<vmem>>, %arg8: memref<3x128xf32, #tpu.memory_space<vmem>>, %arg9: memref<1x128xf32, #tpu.memory_space<vmem>>, %arg10: memref<1x128xf32, #tpu.memory_space<vmem>>, %arg11: memref<1x32x128xf32, #tpu.memory_space<vmem>>, %arg12: memref<16x24x128xf32, #tpu.memory_space<vmem>>, %arg13: memref<128x128xf32, #tpu.memory_space<vmem>>, %arg14: memref<128x128xf32, #tpu.memory_space<vmem>>, %arg15: memref<!tpu.dma_semaphore, #tpu.memory_space<semaphore_mem>>) attributes {dimension_semantics = [#tpu.dimension_semantics<parallel>, #tpu.dimension_semantics<parallel>], iteration_bounds = array<i64: 2, 2>, scalar_prefetch = 0 : i64, scratch_operands = 4 : i64, tpu.core_type = #tpu.core_type<tc>, window_params = [{}, {pipeline_mode = #tpu.pipeline_mode<synchronous>, transform_indices = @transform_1, window_bounds = array<i64: 128, 128>}, {pipeline_mode = #tpu.pipeline_mode<synchronous>, transform_indices = @transform_2, window_bounds = array<i64: 18, 128, 128>}, {pipeline_mode = #tpu.pipeline_mode<synchronous>, transform_indices = @transform_3, window_bounds = array<i64: 3, 128, 128>}, {transform_indices = @transform_4, window_bounds = array<i64: 1, 1, 128>}, {pipeline_mode = #tpu.pipeline_mode<synchronous>, transform_indices = @transform_5, window_bounds = array<i64: 3, 128>}, {pipeline_mode = #tpu.pipeline_mode<synchronous>, transform_indices = @transform_6, window_bounds = array<i64: 3, 128>}, {pipeline_mode = #tpu.pipeline_mode<synchronous>, transform_indices = @transform_7, window_bounds = array<i64: 1, 128>}, {pipeline_mode = #tpu.pipeline_mode<synchronous>, transform_indices = @transform_8, window_bounds = array<i64: 1, 128>}, {transform_indices = @transform_9, window_bounds = array<i64: 1, 32, 128>}]} {
    %c8_i32 = arith.constant 8 : i32
    %0 = arith.muli %arg1, %c8_i32 : i32
    %c0_i32 = arith.constant 0 : i32
    %c0_i32_0 = arith.constant 0 : i32
    %1 = tpu.memref_slice %arg2[%arg0, %0, %c0_i32, %c0_i32_0] : memref<2x24x24x128xf32, #tpu.memory_space<any>> -> memref<1x16x24x128xf32, #tpu.memory_space<any>>
    %2 = tpu.memref_squeeze %1 : memref<1x16x24x128xf32, #tpu.memory_space<any>> -> memref<16x24x128xf32, #tpu.memory_space<any>>
    tpu.enqueue_dma source(%2 : memref<16x24x128xf32, #tpu.memory_space<any>>) target(%arg12 : memref<16x24x128xf32, #tpu.memory_space<vmem>>) target_semaphore(%arg15 : memref<!tpu.dma_semaphore, #tpu.memory_space<semaphore_mem>>)
    %c0_i32_1 = arith.constant 0 : i32
    %c0_i32_2 = arith.constant 0 : i32
    %3 = tpu.memref_slice %arg2[%arg0, %0, %c0_i32_1, %c0_i32_2] : memref<2x24x24x128xf32, #tpu.memory_space<any>> -> memref<1x16x24x128xf32, #tpu.memory_space<any>>
    %4 = tpu.memref_squeeze %3 : memref<1x16x24x128xf32, #tpu.memory_space<any>> -> memref<16x24x128xf32, #tpu.memory_space<any>>
    tpu.wait_dma2 semaphore(%arg15 : memref<!tpu.dma_semaphore, #tpu.memory_space<semaphore_mem>>) src(%4 : memref<16x24x128xf32, #tpu.memory_space<any>>) dst(%arg12 : memref<16x24x128xf32, #tpu.memory_space<vmem>>)
    %c4 = arith.constant 4 : index
    %c4_3 = arith.constant 4 : index
    %c0 = arith.constant 0 : index
    %5 = vector.load %arg12[%c4, %c4_3, %c0] : memref<16x24x128xf32, #tpu.memory_space<vmem>>, vector<8x16x128xf32>
    %6 = vector.shape_cast %5 : vector<8x16x128xf32> to vector<128x128xf32>
    %c0_4 = arith.constant 0 : index
    %c0_5 = arith.constant 0 : index
    %7 = vector.load %arg3[%c0_4, %c0_5] : memref<128x128xf32, #tpu.memory_space<vmem>>, vector<128x128xf32>
    %cst = arith.constant dense<0.000000e+00> : vector<128x128xf32>
    %8 = tpu.matmul %6, %7, %cst {dimension_numbers = #tpu.dot_dimension_numbers<[1], [0], [0], [1], [0, 0, 1, 1], [], []>} : vector<128x128xf32>, vector<128x128xf32>, vector<128x128xf32> -> vector<128x128xf32>
    %c0_6 = arith.constant 0 : index
    %c0_7 = arith.constant 0 : index
    %9 = vector.load %arg7[%c0_6, %c0_7] : memref<3x128xf32, #tpu.memory_space<vmem>>, vector<1x128xf32>
    %10 = vector.broadcast %9 : vector<1x128xf32> to vector<128x128xf32>
    %11 = arith.mulf %8, %10 : vector<128x128xf32>
    %c0_8 = arith.constant 0 : index
    %c0_9 = arith.constant 0 : index
    %12 = vector.load %arg8[%c0_8, %c0_9] : memref<3x128xf32, #tpu.memory_space<vmem>>, vector<1x128xf32>
    %13 = vector.broadcast %12 : vector<1x128xf32> to vector<128x128xf32>
    %14 = arith.addf %11, %13 : vector<128x128xf32>
    %cst_10 = arith.constant 0.000000e+00 : f32
    %15 = vector.broadcast %cst_10 : f32 to vector<128x128xf32>
    %16 = arith.maximumf %14, %15 : vector<128x128xf32>
    %c0_11 = arith.constant 0 : index
    %c0_12 = arith.constant 0 : index
    %c0_13 = arith.constant 0 : index
    %17 = vector.load %arg5[%c0_11, %c0_12, %c0_13] : memref<3x128x128xf32, #tpu.memory_space<vmem>>, vector<1x128x128xf32>
    %18 = vector.shape_cast %17 : vector<1x128x128xf32> to vector<128x128xf32>
    %cst_14 = arith.constant dense<0.000000e+00> : vector<128x128xf32>
    %19 = tpu.matmul %16, %18, %cst_14 {dimension_numbers = #tpu.dot_dimension_numbers<[1], [0], [0], [1], [0, 0, 1, 1], [], []>} : vector<128x128xf32>, vector<128x128xf32>, vector<128x128xf32> -> vector<128x128xf32>
    %c0_15 = arith.constant 0 : index
    %c0_16 = arith.constant 0 : index
    %20 = vector.load %arg13[%c0_15, %c0_16] : memref<128x128xf32, #tpu.memory_space<vmem>>, vector<128x128xf32>
    tpu.vector_store %arg13[%c0_15, %c0_16], %19 {strides = array<i32>} : memref<128x128xf32, #tpu.memory_space<vmem>>, vector<128x128xf32>,
    %c2 = arith.constant 2 : index
    %c2_17 = arith.constant 2 : index
    %c0_18 = arith.constant 0 : index
    %21 = vector.load %arg12[%c2, %c2_17, %c0_18] : memref<16x24x128xf32, #tpu.memory_space<vmem>>, vector<8x16x128xf32>
    %22 = vector.shape_cast %21 : vector<8x16x128xf32> to vector<128x128xf32>
    %c0_19 = arith.constant 0 : index
    %c0_20 = arith.constant 0 : index
    %c0_21 = arith.constant 0 : index
    %23 = vector.load %arg4[%c0_19, %c0_20, %c0_21] : memref<18x128x128xf32, #tpu.memory_space<vmem>>, vector<1x128x128xf32>
    %24 = vector.shape_cast %23 : vector<1x128x128xf32> to vector<128x128xf32>
    %cst_22 = arith.constant dense<0.000000e+00> : vector<128x128xf32>
    %25 = tpu.matmul %22, %24, %cst_22 {dimension_numbers = #tpu.dot_dimension_numbers<[1], [0], [0], [1], [0, 0, 1, 1], [], []>} : vector<128x128xf32>, vector<128x128xf32>, vector<128x128xf32> -> vector<128x128xf32>
    %c0_23 = arith.constant 0 : index
    %c0_24 = arith.constant 0 : index
    %26 = vector.load %arg14[%c0_23, %c0_24] : memref<128x128xf32, #tpu.memory_space<vmem>>, vector<128x128xf32>
    tpu.vector_store %arg14[%c0_23, %c0_24], %25 {strides = array<i32>} : memref<128x128xf32, #tpu.memory_space<vmem>>, vector<128x128xf32>,
    %c2_25 = arith.constant 2 : index
    %c4_26 = arith.constant 4 : index
    %c0_27 = arith.constant 0 : index
    %27 = vector.load %arg12[%c2_25, %c4_26, %c0_27] : memref<16x24x128xf32, #tpu.memory_space<vmem>>, vector<8x16x128xf32>
    %28 = vector.shape_cast %27 : vector<8x16x128xf32> to vector<128x128xf32>
    %c1 = arith.constant 1 : index
    %c0_28 = arith.constant 0 : index
    %c0_29 = arith.constant 0 : index
    %29 = vector.load %arg4[%c1, %c0_28, %c0_29] : memref<18x128x128xf32, #tpu.memory_space<vmem>>, vector<1x128x128xf32>
    %30 = vector.shape_cast %29 : vector<1x128x128xf32> to vector<128x128xf32>
    %cst_30 = arith.constant dense<0.000000e+00> : vector<128x128xf32>
    %31 = tpu.matmul %28, %30, %cst_30 {dimension_numbers = #tpu.dot_dimension_numbers<[1], [0], [0], [1], [0, 0, 1, 1], [], []>} : vector<128x128xf32>, vector<128x128xf32>, vector<128x128xf32> -> vector<128x128xf32>
    %c0_31 = arith.constant 0 : index
    %c0_32 = arith.constant 0 : index
    %32 = vector.load %arg14[%c0_31, %c0_32] : memref<128x128xf32, #tpu.memory_space<vmem>>, vector<128x128xf32>
    %33 = arith.addf %32, %31 : vector<128x128xf32>
    %c0_33 = arith.constant 0 : index
    %c0_34 = arith.constant 0 : index
    %34 = vector.load %arg14[%c0_33, %c0_34] : memref<128x128xf32, #tpu.memory_space<vmem>>, vector<128x128xf32>
    tpu.vector_store %arg14[%c0_33, %c0_34], %33 {strides = array<i32>} : memref<128x128xf32, #tpu.memory_space<vmem>>, vector<128x128xf32>,
    %c2_35 = arith.constant 2 : index
    %c6 = arith.constant 6 : index
    %c0_36 = arith.constant 0 : index
    %35 = vector.load %arg12[%c2_35, %c6, %c0_36] : memref<16x24x128xf32, #tpu.memory_space<vmem>>, vector<8x16x128xf32>
    %36 = vector.shape_cast %35 : vector<8x16x128xf32> to vector<128x128xf32>
    %c2_37 = arith.constant 2 : index
    %c0_38 = arith.constant 0 : index
    %c0_39 = arith.constant 0 : index
    %37 = vector.load %arg4[%c2_37, %c0_38, %c0_39] : memref<18x128x128xf32, #tpu.memory_space<vmem>>, vector<1x128x128xf32>
    %38 = vector.shape_cast %37 : vector<1x128x128xf32> to vector<128x128xf32>
    %cst_40 = arith.constant dense<0.000000e+00> : vector<128x128xf32>
    %39 = tpu.matmul %36, %38, %cst_40 {dimension_numbers = #tpu.dot_dimension_numbers<[1], [0], [0], [1], [0, 0, 1, 1], [], []>} : vector<128x128xf32>, vector<128x128xf32>, vector<128x128xf32> -> vector<128x128xf32>
    %c0_41 = arith.constant 0 : index
    %c0_42 = arith.constant 0 : index
    %40 = vector.load %arg14[%c0_41, %c0_42] : memref<128x128xf32, #tpu.memory_space<vmem>>, vector<128x128xf32>
    %41 = arith.addf %40, %39 : vector<128x128xf32>
    %c0_43 = arith.constant 0 : index
    %c0_44 = arith.constant 0 : index
    %42 = vector.load %arg14[%c0_43, %c0_44] : memref<128x128xf32, #tpu.memory_space<vmem>>, vector<128x128xf32>
    tpu.vector_store %arg14[%c0_43, %c0_44], %41 {strides = array<i32>} : memref<128x128xf32, #tpu.memory_space<vmem>>, vector<128x128xf32>,
    %c4_45 = arith.constant 4 : index
    %c2_46 = arith.constant 2 : index
    %c0_47 = arith.constant 0 : index
    %43 = vector.load %arg12[%c4_45, %c2_46, %c0_47] : memref<16x24x128xf32, #tpu.memory_space<vmem>>, vector<8x16x128xf32>
    %44 = vector.shape_cast %43 : vector<8x16x128xf32> to vector<128x128xf32>
    %c3 = arith.constant 3 : index
    %c0_48 = arith.constant 0 : index
    %c0_49 = arith.constant 0 : index
    %45 = vector.load %arg4[%c3, %c0_48, %c0_49] : memref<18x128x128xf32, #tpu.memory_space<vmem>>, vector<1x128x128xf32>
    %46 = vector.shape_cast %45 : vector<1x128x128xf32> to vector<128x128xf32>
    %cst_50 = arith.constant dense<0.000000e+00> : vector<128x128xf32>
    %47 = tpu.matmul %44, %46, %cst_50 {dimension_numbers = #tpu.dot_dimension_numbers<[1], [0], [0], [1], [0, 0, 1, 1], [], []>} : vector<128x128xf32>, vector<128x128xf32>, vector<128x128xf32> -> vector<128x128xf32>
    %c0_51 = arith.constant 0 : index
    %c0_52 = arith.constant 0 : index
    %48 = vector.load %arg14[%c0_51, %c0_52] : memref<128x128xf32, #tpu.memory_space<vmem>>, vector<128x128xf32>
    %49 = arith.addf %48, %47 : vector<128x128xf32>
    %c0_53 = arith.constant 0 : index
    %c0_54 = arith.constant 0 : index
    %50 = vector.load %arg14[%c0_53, %c0_54] : memref<128x128xf32, #tpu.memory_space<vmem>>, vector<128x128xf32>
    tpu.vector_store %arg14[%c0_53, %c0_54], %49 {strides = array<i32>} : memref<128x128xf32, #tpu.memory_space<vmem>>, vector<128x128xf32>,
    %c4_55 = arith.constant 4 : index
    %c4_56 = arith.constant 4 : index
    %c0_57 = arith.constant 0 : index
    %51 = vector.load %arg12[%c4_55, %c4_56, %c0_57] : memref<16x24x128xf32, #tpu.memory_space<vmem>>, vector<8x16x128xf32>
    %52 = vector.shape_cast %51 : vector<8x16x128xf32> to vector<128x128xf32>
    %c4_58 = arith.constant 4 : index
    %c0_59 = arith.constant 0 : index
    %c0_60 = arith.constant 0 : index
    %53 = vector.load %arg4[%c4_58, %c0_59, %c0_60] : memref<18x128x128xf32, #tpu.memory_space<vmem>>, vector<1x128x128xf32>
    %54 = vector.shape_cast %53 : vector<1x128x128xf32> to vector<128x128xf32>
    %cst_61 = arith.constant dense<0.000000e+00> : vector<128x128xf32>
    %55 = tpu.matmul %52, %54, %cst_61 {dimension_numbers = #tpu.dot_dimension_numbers<[1], [0], [0], [1], [0, 0, 1, 1], [], []>} : vector<128x128xf32>, vector<128x128xf32>, vector<128x128xf32> -> vector<128x128xf32>
    %c0_62 = arith.constant 0 : index
    %c0_63 = arith.constant 0 : index
    %56 = vector.load %arg14[%c0_62, %c0_63] : memref<128x128xf32, #tpu.memory_space<vmem>>, vector<128x128xf32>
    %57 = arith.addf %56, %55 : vector<128x128xf32>
    %c0_64 = arith.constant 0 : index
    %c0_65 = arith.constant 0 : index
    %58 = vector.load %arg14[%c0_64, %c0_65] : memref<128x128xf32, #tpu.memory_space<vmem>>, vector<128x128xf32>
    tpu.vector_store %arg14[%c0_64, %c0_65], %57 {strides = array<i32>} : memref<128x128xf32, #tpu.memory_space<vmem>>, vector<128x128xf32>,
    %c4_66 = arith.constant 4 : index
    %c6_67 = arith.constant 6 : index
    %c0_68 = arith.constant 0 : index
    %59 = vector.load %arg12[%c4_66, %c6_67, %c0_68] : memref<16x24x128xf32, #tpu.memory_space<vmem>>, vector<8x16x128xf32>
    %60 = vector.shape_cast %59 : vector<8x16x128xf32> to vector<128x128xf32>
    %c5 = arith.constant 5 : index
    %c0_69 = arith.constant 0 : index
    %c0_70 = arith.constant 0 : index
    %61 = vector.load %arg4[%c5, %c0_69, %c0_70] : memref<18x128x128xf32, #tpu.memory_space<vmem>>, vector<1x128x128xf32>
    %62 = vector.shape_cast %61 : vector<1x128x128xf32> to vector<128x128xf32>
    %cst_71 = arith.constant dense<0.000000e+00> : vector<128x128xf32>
    %63 = tpu.matmul %60, %62, %cst_71 {dimension_numbers = #tpu.dot_dimension_numbers<[1], [0], [0], [1], [0, 0, 1, 1], [], []>} : vector<128x128xf32>, vector<128x128xf32>, vector<128x128xf32> -> vector<128x128xf32>
    %c0_72 = arith.constant 0 : index
    %c0_73 = arith.constant 0 : index
    %64 = vector.load %arg14[%c0_72, %c0_73] : memref<128x128xf32, #tpu.memory_space<vmem>>, vector<128x128xf32>
    %65 = arith.addf %64, %63 : vector<128x128xf32>
    %c0_74 = arith.constant 0 : index
    %c0_75 = arith.constant 0 : index
    %66 = vector.load %arg14[%c0_74, %c0_75] : memref<128x128xf32, #tpu.memory_space<vmem>>, vector<128x128xf32>
    tpu.vector_store %arg14[%c0_74, %c0_75], %65 {strides = array<i32>} : memref<128x128xf32, #tpu.memory_space<vmem>>, vector<128x128xf32>,
    %c6_76 = arith.constant 6 : index
    %c2_77 = arith.constant 2 : index
    %c0_78 = arith.constant 0 : index
    %67 = vector.load %arg12[%c6_76, %c2_77, %c0_78] : memref<16x24x128xf32, #tpu.memory_space<vmem>>, vector<8x16x128xf32>
    %68 = vector.shape_cast %67 : vector<8x16x128xf32> to vector<128x128xf32>
    %c6_79 = arith.constant 6 : index
    %c0_80 = arith.constant 0 : index
    %c0_81 = arith.constant 0 : index
    %69 = vector.load %arg4[%c6_79, %c0_80, %c0_81] : memref<18x128x128xf32, #tpu.memory_space<vmem>>, vector<1x128x128xf32>
    %70 = vector.shape_cast %69 : vector<1x128x128xf32> to vector<128x128xf32>
    %cst_82 = arith.constant dense<0.000000e+00> : vector<128x128xf32>
    %71 = tpu.matmul %68, %70, %cst_82 {dimension_numbers = #tpu.dot_dimension_numbers<[1], [0], [0], [1], [0, 0, 1, 1], [], []>} : vector<128x128xf32>, vector<128x128xf32>, vector<128x128xf32> -> vector<128x128xf32>
    %c0_83 = arith.constant 0 : index
    %c0_84 = arith.constant 0 : index
    %72 = vector.load %arg14[%c0_83, %c0_84] : memref<128x128xf32, #tpu.memory_space<vmem>>, vector<128x128xf32>
    %73 = arith.addf %72, %71 : vector<128x128xf32>
    %c0_85 = arith.constant 0 : index
    %c0_86 = arith.constant 0 : index
    %74 = vector.load %arg14[%c0_85, %c0_86] : memref<128x128xf32, #tpu.memory_space<vmem>>, vector<128x128xf32>
    tpu.vector_store %arg14[%c0_85, %c0_86], %73 {strides = array<i32>} : memref<128x128xf32, #tpu.memory_space<vmem>>, vector<128x128xf32>,
    %c6_87 = arith.constant 6 : index
    %c4_88 = arith.constant 4 : index
    %c0_89 = arith.constant 0 : index
    %75 = vector.load %arg12[%c6_87, %c4_88, %c0_89] : memref<16x24x128xf32, #tpu.memory_space<vmem>>, vector<8x16x128xf32>
    %76 = vector.shape_cast %75 : vector<8x16x128xf32> to vector<128x128xf32>
    %c7 = arith.constant 7 : index
    %c0_90 = arith.constant 0 : index
    %c0_91 = arith.constant 0 : index
    %77 = vector.load %arg4[%c7, %c0_90, %c0_91] : memref<18x128x128xf32, #tpu.memory_space<vmem>>, vector<1x128x128xf32>
    %78 = vector.shape_cast %77 : vector<1x128x128xf32> to vector<128x128xf32>
    %cst_92 = arith.constant dense<0.000000e+00> : vector<128x128xf32>
    %79 = tpu.matmul %76, %78, %cst_92 {dimension_numbers = #tpu.dot_dimension_numbers<[1], [0], [0], [1], [0, 0, 1, 1], [], []>} : vector<128x128xf32>, vector<128x128xf32>, vector<128x128xf32> -> vector<128x128xf32>
    %c0_93 = arith.constant 0 : index
    %c0_94 = arith.constant 0 : index
    %80 = vector.load %arg14[%c0_93, %c0_94] : memref<128x128xf32, #tpu.memory_space<vmem>>, vector<128x128xf32>
    %81 = arith.addf %80, %79 : vector<128x128xf32>
    %c0_95 = arith.constant 0 : index
    %c0_96 = arith.constant 0 : index
    %82 = vector.load %arg14[%c0_95, %c0_96] : memref<128x128xf32, #tpu.memory_space<vmem>>, vector<128x128xf32>
    tpu.vector_store %arg14[%c0_95, %c0_96], %81 {strides = array<i32>} : memref<128x128xf32, #tpu.memory_space<vmem>>, vector<128x128xf32>,
    %c6_97 = arith.constant 6 : index
    %c6_98 = arith.constant 6 : index
    %c0_99 = arith.constant 0 : index
    %83 = vector.load %arg12[%c6_97, %c6_98, %c0_99] : memref<16x24x128xf32, #tpu.memory_space<vmem>>, vector<8x16x128xf32>
    %84 = vector.shape_cast %83 : vector<8x16x128xf32> to vector<128x128xf32>
    %c8 = arith.constant 8 : index
    %c0_100 = arith.constant 0 : index
    %c0_101 = arith.constant 0 : index
    %85 = vector.load %arg4[%c8, %c0_100, %c0_101] : memref<18x128x128xf32, #tpu.memory_space<vmem>>, vector<1x128x128xf32>
    %86 = vector.shape_cast %85 : vector<1x128x128xf32> to vector<128x128xf32>
    %cst_102 = arith.constant dense<0.000000e+00> : vector<128x128xf32>
    %87 = tpu.matmul %84, %86, %cst_102 {dimension_numbers = #tpu.dot_dimension_numbers<[1], [0], [0], [1], [0, 0, 1, 1], [], []>} : vector<128x128xf32>, vector<128x128xf32>, vector<128x128xf32> -> vector<128x128xf32>
    %c0_103 = arith.constant 0 : index
    %c0_104 = arith.constant 0 : index
    %88 = vector.load %arg14[%c0_103, %c0_104] : memref<128x128xf32, #tpu.memory_space<vmem>>, vector<128x128xf32>
    %89 = arith.addf %88, %87 : vector<128x128xf32>
    %c0_105 = arith.constant 0 : index
    %c0_106 = arith.constant 0 : index
    %90 = vector.load %arg14[%c0_105, %c0_106] : memref<128x128xf32, #tpu.memory_space<vmem>>, vector<128x128xf32>
    tpu.vector_store %arg14[%c0_105, %c0_106], %89 {strides = array<i32>} : memref<128x128xf32, #tpu.memory_space<vmem>>, vector<128x128xf32>,
    %c0_107 = arith.constant 0 : index
    %c0_108 = arith.constant 0 : index
    %91 = vector.load %arg13[%c0_107, %c0_108] : memref<128x128xf32, #tpu.memory_space<vmem>>, vector<128x128xf32>
    %c0_109 = arith.constant 0 : index
    %c0_110 = arith.constant 0 : index
    %92 = vector.load %arg14[%c0_109, %c0_110] : memref<128x128xf32, #tpu.memory_space<vmem>>, vector<128x128xf32>
    %c1_111 = arith.constant 1 : index
    %c0_112 = arith.constant 0 : index
    %93 = vector.load %arg7[%c1_111, %c0_112] : memref<3x128xf32, #tpu.memory_space<vmem>>, vector<1x128xf32>
    %94 = vector.broadcast %93 : vector<1x128xf32> to vector<128x128xf32>
    %95 = arith.mulf %92, %94 : vector<128x128xf32>
    %c1_113 = arith.constant 1 : index
    %c0_114 = arith.constant 0 : index
    %96 = vector.load %arg8[%c1_113, %c0_114] : memref<3x128xf32, #tpu.memory_space<vmem>>, vector<1x128xf32>
    %97 = vector.broadcast %96 : vector<1x128xf32> to vector<128x128xf32>
    %98 = arith.addf %95, %97 : vector<128x128xf32>
    %cst_115 = arith.constant 0.000000e+00 : f32
    %99 = vector.broadcast %cst_115 : f32 to vector<128x128xf32>
    %100 = arith.maximumf %98, %99 : vector<128x128xf32>
    %c1_116 = arith.constant 1 : index
    %c0_117 = arith.constant 0 : index
    %c0_118 = arith.constant 0 : index
    %101 = vector.load %arg5[%c1_116, %c0_117, %c0_118] : memref<3x128x128xf32, #tpu.memory_space<vmem>>, vector<1x128x128xf32>
    %102 = vector.shape_cast %101 : vector<1x128x128xf32> to vector<128x128xf32>
    %cst_119 = arith.constant dense<0.000000e+00> : vector<128x128xf32>
    %103 = tpu.matmul %100, %102, %cst_119 {dimension_numbers = #tpu.dot_dimension_numbers<[1], [0], [0], [1], [0, 0, 1, 1], [], []>} : vector<128x128xf32>, vector<128x128xf32>, vector<128x128xf32> -> vector<128x128xf32>
    %104 = arith.addf %91, %103 : vector<128x128xf32>
    %c0_120 = arith.constant 0 : index
    %c0_121 = arith.constant 0 : index
    %105 = vector.load %arg13[%c0_120, %c0_121] : memref<128x128xf32, #tpu.memory_space<vmem>>, vector<128x128xf32>
    tpu.vector_store %arg13[%c0_120, %c0_121], %104 {strides = array<i32>} : memref<128x128xf32, #tpu.memory_space<vmem>>, vector<128x128xf32>,
    %c0_122 = arith.constant 0 : index
    %c0_123 = arith.constant 0 : index
    %c0_124 = arith.constant 0 : index
    %106 = vector.load %arg12[%c0_122, %c0_123, %c0_124] : memref<16x24x128xf32, #tpu.memory_space<vmem>>, vector<8x16x128xf32>
    %107 = vector.shape_cast %106 : vector<8x16x128xf32> to vector<128x128xf32>
    %c9 = arith.constant 9 : index
    %c0_125 = arith.constant 0 : index
    %c0_126 = arith.constant 0 : index
    %108 = vector.load %arg4[%c9, %c0_125, %c0_126] : memref<18x128x128xf32, #tpu.memory_space<vmem>>, vector<1x128x128xf32>
    %109 = vector.shape_cast %108 : vector<1x128x128xf32> to vector<128x128xf32>
    %cst_127 = arith.constant dense<0.000000e+00> : vector<128x128xf32>
    %110 = tpu.matmul %107, %109, %cst_127 {dimension_numbers = #tpu.dot_dimension_numbers<[1], [0], [0], [1], [0, 0, 1, 1], [], []>} : vector<128x128xf32>, vector<128x128xf32>, vector<128x128xf32> -> vector<128x128xf32>
    %c0_128 = arith.constant 0 : index
    %c0_129 = arith.constant 0 : index
    %111 = vector.load %arg14[%c0_128, %c0_129] : memref<128x128xf32, #tpu.memory_space<vmem>>, vector<128x128xf32>
    tpu.vector_store %arg14[%c0_128, %c0_129], %110 {strides = array<i32>} : memref<128x128xf32, #tpu.memory_space<vmem>>, vector<128x128xf32>,
    %c0_130 = arith.constant 0 : index
    %c4_131 = arith.constant 4 : index
    %c0_132 = arith.constant 0 : index
    %112 = vector.load %arg12[%c0_130, %c4_131, %c0_132] : memref<16x24x128xf32, #tpu.memory_space<vmem>>, vector<8x16x128xf32>
    %113 = vector.shape_cast %112 : vector<8x16x128xf32> to vector<128x128xf32>
    %c10 = arith.constant 10 : index
    %c0_133 = arith.constant 0 : index
    %c0_134 = arith.constant 0 : index
    %114 = vector.load %arg4[%c10, %c0_133, %c0_134] : memref<18x128x128xf32, #tpu.memory_space<vmem>>, vector<1x128x128xf32>
    %115 = vector.shape_cast %114 : vector<1x128x128xf32> to vector<128x128xf32>
    %cst_135 = arith.constant dense<0.000000e+00> : vector<128x128xf32>
    %116 = tpu.matmul %113, %115, %cst_135 {dimension_numbers = #tpu.dot_dimension_numbers<[1], [0], [0], [1], [0, 0, 1, 1], [], []>} : vector<128x128xf32>, vector<128x128xf32>, vector<128x128xf32> -> vector<128x128xf32>
    %c0_136 = arith.constant 0 : index
    %c0_137 = arith.constant 0 : index
    %117 = vector.load %arg14[%c0_136, %c0_137] : memref<128x128xf32, #tpu.memory_space<vmem>>, vector<128x128xf32>
    %118 = arith.addf %117, %116 : vector<128x128xf32>
    %c0_138 = arith.constant 0 : index
    %c0_139 = arith.constant 0 : index
    %119 = vector.load %arg14[%c0_138, %c0_139] : memref<128x128xf32, #tpu.memory_space<vmem>>, vector<128x128xf32>
    tpu.vector_store %arg14[%c0_138, %c0_139], %118 {strides = array<i32>} : memref<128x128xf32, #tpu.memory_space<vmem>>, vector<128x128xf32>,
    %c0_140 = arith.constant 0 : index
    %c8_141 = arith.constant 8 : index
    %c0_142 = arith.constant 0 : index
    %120 = vector.load %arg12[%c0_140, %c8_141, %c0_142] : memref<16x24x128xf32, #tpu.memory_space<vmem>>, vector<8x16x128xf32>
    %121 = vector.shape_cast %120 : vector<8x16x128xf32> to vector<128x128xf32>
    %c11 = arith.constant 11 : index
    %c0_143 = arith.constant 0 : index
    %c0_144 = arith.constant 0 : index
    %122 = vector.load %arg4[%c11, %c0_143, %c0_144] : memref<18x128x128xf32, #tpu.memory_space<vmem>>, vector<1x128x128xf32>
    %123 = vector.shape_cast %122 : vector<1x128x128xf32> to vector<128x128xf32>
    %cst_145 = arith.constant dense<0.000000e+00> : vector<128x128xf32>
    %124 = tpu.matmul %121, %123, %cst_145 {dimension_numbers = #tpu.dot_dimension_numbers<[1], [0], [0], [1], [0, 0, 1, 1], [], []>} : vector<128x128xf32>, vector<128x128xf32>, vector<128x128xf32> -> vector<128x128xf32>
    %c0_146 = arith.constant 0 : index
    %c0_147 = arith.constant 0 : index
    %125 = vector.load %arg14[%c0_146, %c0_147] : memref<128x128xf32, #tpu.memory_space<vmem>>, vector<128x128xf32>
    %126 = arith.addf %125, %124 : vector<128x128xf32>
    %c0_148 = arith.constant 0 : index
    %c0_149 = arith.constant 0 : index
    %127 = vector.load %arg14[%c0_148, %c0_149] : memref<128x128xf32, #tpu.memory_space<vmem>>, vector<128x128xf32>
    tpu.vector_store %arg14[%c0_148, %c0_149], %126 {strides = array<i32>} : memref<128x128xf32, #tpu.memory_space<vmem>>, vector<128x128xf32>,
    %c4_150 = arith.constant 4 : index
    %c0_151 = arith.constant 0 : index
    %c0_152 = arith.constant 0 : index
    %128 = vector.load %arg12[%c4_150, %c0_151, %c0_152] : memref<16x24x128xf32, #tpu.memory_space<vmem>>, vector<8x16x128xf32>
    %129 = vector.shape_cast %128 : vector<8x16x128xf32> to vector<128x128xf32>
    %c12 = arith.constant 12 : index
    %c0_153 = arith.constant 0 : index
    %c0_154 = arith.constant 0 : index
    %130 = vector.load %arg4[%c12, %c0_153, %c0_154] : memref<18x128x128xf32, #tpu.memory_space<vmem>>, vector<1x128x128xf32>
    %131 = vector.shape_cast %130 : vector<1x128x128xf32> to vector<128x128xf32>
    %cst_155 = arith.constant dense<0.000000e+00> : vector<128x128xf32>
    %132 = tpu.matmul %129, %131, %cst_155 {dimension_numbers = #tpu.dot_dimension_numbers<[1], [0], [0], [1], [0, 0, 1, 1], [], []>} : vector<128x128xf32>, vector<128x128xf32>, vector<128x128xf32> -> vector<128x128xf32>
    %c0_156 = arith.constant 0 : index
    %c0_157 = arith.constant 0 : index
    %133 = vector.load %arg14[%c0_156, %c0_157] : memref<128x128xf32, #tpu.memory_space<vmem>>, vector<128x128xf32>
    %134 = arith.addf %133, %132 : vector<128x128xf32>
    %c0_158 = arith.constant 0 : index
    %c0_159 = arith.constant 0 : index
    %135 = vector.load %arg14[%c0_158, %c0_159] : memref<128x128xf32, #tpu.memory_space<vmem>>, vector<128x128xf32>
    tpu.vector_store %arg14[%c0_158, %c0_159], %134 {strides = array<i32>} : memref<128x128xf32, #tpu.memory_space<vmem>>, vector<128x128xf32>,
    %c4_160 = arith.constant 4 : index
    %c4_161 = arith.constant 4 : index
    %c0_162 = arith.constant 0 : index
    %136 = vector.load %arg12[%c4_160, %c4_161, %c0_162] : memref<16x24x128xf32, #tpu.memory_space<vmem>>, vector<8x16x128xf32>
    %137 = vector.shape_cast %136 : vector<8x16x128xf32> to vector<128x128xf32>
    %c13 = arith.constant 13 : index
    %c0_163 = arith.constant 0 : index
    %c0_164 = arith.constant 0 : index
    %138 = vector.load %arg4[%c13, %c0_163, %c0_164] : memref<18x128x128xf32, #tpu.memory_space<vmem>>, vector<1x128x128xf32>
    %139 = vector.shape_cast %138 : vector<1x128x128xf32> to vector<128x128xf32>
    %cst_165 = arith.constant dense<0.000000e+00> : vector<128x128xf32>
    %140 = tpu.matmul %137, %139, %cst_165 {dimension_numbers = #tpu.dot_dimension_numbers<[1], [0], [0], [1], [0, 0, 1, 1], [], []>} : vector<128x128xf32>, vector<128x128xf32>, vector<128x128xf32> -> vector<128x128xf32>
    %c0_166 = arith.constant 0 : index
    %c0_167 = arith.constant 0 : index
    %141 = vector.load %arg14[%c0_166, %c0_167] : memref<128x128xf32, #tpu.memory_space<vmem>>, vector<128x128xf32>
    %142 = arith.addf %141, %140 : vector<128x128xf32>
    %c0_168 = arith.constant 0 : index
    %c0_169 = arith.constant 0 : index
    %143 = vector.load %arg14[%c0_168, %c0_169] : memref<128x128xf32, #tpu.memory_space<vmem>>, vector<128x128xf32>
    tpu.vector_store %arg14[%c0_168, %c0_169], %142 {strides = array<i32>} : memref<128x128xf32, #tpu.memory_space<vmem>>, vector<128x128xf32>,
    %c4_170 = arith.constant 4 : index
    %c8_171 = arith.constant 8 : index
    %c0_172 = arith.constant 0 : index
    %144 = vector.load %arg12[%c4_170, %c8_171, %c0_172] : memref<16x24x128xf32, #tpu.memory_space<vmem>>, vector<8x16x128xf32>
    %145 = vector.shape_cast %144 : vector<8x16x128xf32> to vector<128x128xf32>
    %c14 = arith.constant 14 : index
    %c0_173 = arith.constant 0 : index
    %c0_174 = arith.constant 0 : index
    %146 = vector.load %arg4[%c14, %c0_173, %c0_174] : memref<18x128x128xf32, #tpu.memory_space<vmem>>, vector<1x128x128xf32>
    %147 = vector.shape_cast %146 : vector<1x128x128xf32> to vector<128x128xf32>
    %cst_175 = arith.constant dense<0.000000e+00> : vector<128x128xf32>
    %148 = tpu.matmul %145, %147, %cst_175 {dimension_numbers = #tpu.dot_dimension_numbers<[1], [0], [0], [1], [0, 0, 1, 1], [], []>} : vector<128x128xf32>, vector<128x128xf32>, vector<128x128xf32> -> vector<128x128xf32>
    %c0_176 = arith.constant 0 : index
    %c0_177 = arith.constant 0 : index
    %149 = vector.load %arg14[%c0_176, %c0_177] : memref<128x128xf32, #tpu.memory_space<vmem>>, vector<128x128xf32>
    %150 = arith.addf %149, %148 : vector<128x128xf32>
    %c0_178 = arith.constant 0 : index
    %c0_179 = arith.constant 0 : index
    %151 = vector.load %arg14[%c0_178, %c0_179] : memref<128x128xf32, #tpu.memory_space<vmem>>, vector<128x128xf32>
    tpu.vector_store %arg14[%c0_178, %c0_179], %150 {strides = array<i32>} : memref<128x128xf32, #tpu.memory_space<vmem>>, vector<128x128xf32>,
    %c8_180 = arith.constant 8 : index
    %c0_181 = arith.constant 0 : index
    %c0_182 = arith.constant 0 : index
    %152 = vector.load %arg12[%c8_180, %c0_181, %c0_182] : memref<16x24x128xf32, #tpu.memory_space<vmem>>, vector<8x16x128xf32>
    %153 = vector.shape_cast %152 : vector<8x16x128xf32> to vector<128x128xf32>
    %c15 = arith.constant 15 : index
    %c0_183 = arith.constant 0 : index
    %c0_184 = arith.constant 0 : index
    %154 = vector.load %arg4[%c15, %c0_183, %c0_184] : memref<18x128x128xf32, #tpu.memory_space<vmem>>, vector<1x128x128xf32>
    %155 = vector.shape_cast %154 : vector<1x128x128xf32> to vector<128x128xf32>
    %cst_185 = arith.constant dense<0.000000e+00> : vector<128x128xf32>
    %156 = tpu.matmul %153, %155, %cst_185 {dimension_numbers = #tpu.dot_dimension_numbers<[1], [0], [0], [1], [0, 0, 1, 1], [], []>} : vector<128x128xf32>, vector<128x128xf32>, vector<128x128xf32> -> vector<128x128xf32>
    %c0_186 = arith.constant 0 : index
    %c0_187 = arith.constant 0 : index
    %157 = vector.load %arg14[%c0_186, %c0_187] : memref<128x128xf32, #tpu.memory_space<vmem>>, vector<128x128xf32>
    %158 = arith.addf %157, %156 : vector<128x128xf32>
    %c0_188 = arith.constant 0 : index
    %c0_189 = arith.constant 0 : index
    %159 = vector.load %arg14[%c0_188, %c0_189] : memref<128x128xf32, #tpu.memory_space<vmem>>, vector<128x128xf32>
    tpu.vector_store %arg14[%c0_188, %c0_189], %158 {strides = array<i32>} : memref<128x128xf32, #tpu.memory_space<vmem>>, vector<128x128xf32>,
    %c8_190 = arith.constant 8 : index
    %c4_191 = arith.constant 4 : index
    %c0_192 = arith.constant 0 : index
    %160 = vector.load %arg12[%c8_190, %c4_191, %c0_192] : memref<16x24x128xf32, #tpu.memory_space<vmem>>, vector<8x16x128xf32>
    %161 = vector.shape_cast %160 : vector<8x16x128xf32> to vector<128x128xf32>
    %c16 = arith.constant 16 : index
    %c0_193 = arith.constant 0 : index
    %c0_194 = arith.constant 0 : index
    %162 = vector.load %arg4[%c16, %c0_193, %c0_194] : memref<18x128x128xf32, #tpu.memory_space<vmem>>, vector<1x128x128xf32>
    %163 = vector.shape_cast %162 : vector<1x128x128xf32> to vector<128x128xf32>
    %cst_195 = arith.constant dense<0.000000e+00> : vector<128x128xf32>
    %164 = tpu.matmul %161, %163, %cst_195 {dimension_numbers = #tpu.dot_dimension_numbers<[1], [0], [0], [1], [0, 0, 1, 1], [], []>} : vector<128x128xf32>, vector<128x128xf32>, vector<128x128xf32> -> vector<128x128xf32>
    %c0_196 = arith.constant 0 : index
    %c0_197 = arith.constant 0 : index
    %165 = vector.load %arg14[%c0_196, %c0_197] : memref<128x128xf32, #tpu.memory_space<vmem>>, vector<128x128xf32>
    %166 = arith.addf %165, %164 : vector<128x128xf32>
    %c0_198 = arith.constant 0 : index
    %c0_199 = arith.constant 0 : index
    %167 = vector.load %arg14[%c0_198, %c0_199] : memref<128x128xf32, #tpu.memory_space<vmem>>, vector<128x128xf32>
    tpu.vector_store %arg14[%c0_198, %c0_199], %166 {strides = array<i32>} : memref<128x128xf32, #tpu.memory_space<vmem>>, vector<128x128xf32>,
    %c8_200 = arith.constant 8 : index
    %c8_201 = arith.constant 8 : index
    %c0_202 = arith.constant 0 : index
    %168 = vector.load %arg12[%c8_200, %c8_201, %c0_202] : memref<16x24x128xf32, #tpu.memory_space<vmem>>, vector<8x16x128xf32>
    %169 = vector.shape_cast %168 : vector<8x16x128xf32> to vector<128x128xf32>
    %c17 = arith.constant 17 : index
    %c0_203 = arith.constant 0 : index
    %c0_204 = arith.constant 0 : index
    %170 = vector.load %arg4[%c17, %c0_203, %c0_204] : memref<18x128x128xf32, #tpu.memory_space<vmem>>, vector<1x128x128xf32>
    %171 = vector.shape_cast %170 : vector<1x128x128xf32> to vector<128x128xf32>
    %cst_205 = arith.constant dense<0.000000e+00> : vector<128x128xf32>
    %172 = tpu.matmul %169, %171, %cst_205 {dimension_numbers = #tpu.dot_dimension_numbers<[1], [0], [0], [1], [0, 0, 1, 1], [], []>} : vector<128x128xf32>, vector<128x128xf32>, vector<128x128xf32> -> vector<128x128xf32>
    %c0_206 = arith.constant 0 : index
    %c0_207 = arith.constant 0 : index
    %173 = vector.load %arg14[%c0_206, %c0_207] : memref<128x128xf32, #tpu.memory_space<vmem>>, vector<128x128xf32>
    %174 = arith.addf %173, %172 : vector<128x128xf32>
    %c0_208 = arith.constant 0 : index
    %c0_209 = arith.constant 0 : index
    %175 = vector.load %arg14[%c0_208, %c0_209] : memref<128x128xf32, #tpu.memory_space<vmem>>, vector<128x128xf32>
    tpu.vector_store %arg14[%c0_208, %c0_209], %174 {strides = array<i32>} : memref<128x128xf32, #tpu.memory_space<vmem>>, vector<128x128xf32>,
    %c0_210 = arith.constant 0 : index
    %c0_211 = arith.constant 0 : index
    %176 = vector.load %arg13[%c0_210, %c0_211] : memref<128x128xf32, #tpu.memory_space<vmem>>, vector<128x128xf32>
    %c0_212 = arith.constant 0 : index
    %c0_213 = arith.constant 0 : index
    %177 = vector.load %arg14[%c0_212, %c0_213] : memref<128x128xf32, #tpu.memory_space<vmem>>, vector<128x128xf32>
    %c2_214 = arith.constant 2 : index
    %c0_215 = arith.constant 0 : index
    %178 = vector.load %arg7[%c2_214, %c0_215] : memref<3x128xf32, #tpu.memory_space<vmem>>, vector<1x128xf32>
    %179 = vector.broadcast %178 : vector<1x128xf32> to vector<128x128xf32>
    %180 = arith.mulf %177, %179 : vector<128x128xf32>
    %c2_216 = arith.constant 2 : index
    %c0_217 = arith.constant 0 : index
    %181 = vector.load %arg8[%c2_216, %c0_217] : memref<3x128xf32, #tpu.memory_space<vmem>>, vector<1x128xf32>
    %182 = vector.broadcast %181 : vector<1x128xf32> to vector<128x128xf32>
    %183 = arith.addf %180, %182 : vector<128x128xf32>
    %cst_218 = arith.constant 0.000000e+00 : f32
    %184 = vector.broadcast %cst_218 : f32 to vector<128x128xf32>
    %185 = arith.maximumf %183, %184 : vector<128x128xf32>
    %c2_219 = arith.constant 2 : index
    %c0_220 = arith.constant 0 : index
    %c0_221 = arith.constant 0 : index
    %186 = vector.load %arg5[%c2_219, %c0_220, %c0_221] : memref<3x128x128xf32, #tpu.memory_space<vmem>>, vector<1x128x128xf32>
    %187 = vector.shape_cast %186 : vector<1x128x128xf32> to vector<128x128xf32>
    %cst_222 = arith.constant dense<0.000000e+00> : vector<128x128xf32>
    %188 = tpu.matmul %185, %187, %cst_222 {dimension_numbers = #tpu.dot_dimension_numbers<[1], [0], [0], [1], [0, 0, 1, 1], [], []>} : vector<128x128xf32>, vector<128x128xf32>, vector<128x128xf32> -> vector<128x128xf32>
    %189 = arith.addf %176, %188 : vector<128x128xf32>
    %c0_223 = arith.constant 0 : index
    %c0_224 = arith.constant 0 : index
    %190 = vector.load %arg13[%c0_223, %c0_224] : memref<128x128xf32, #tpu.memory_space<vmem>>, vector<128x128xf32>
    tpu.vector_store %arg13[%c0_223, %c0_224], %189 {strides = array<i32>} : memref<128x128xf32, #tpu.memory_space<vmem>>, vector<128x128xf32>,
    %c0_225 = arith.constant 0 : index
    %c0_226 = arith.constant 0 : index
    %191 = vector.load %arg13[%c0_225, %c0_226] : memref<128x128xf32, #tpu.memory_space<vmem>>, vector<128x128xf32>
    %c0_227 = arith.constant 0 : index
    %c0_228 = arith.constant 0 : index
    %c0_229 = arith.constant 0 : index
    %192 = vector.load %arg6[%c0_227, %c0_228, %c0_229] : memref<1x1x128xf32, #tpu.memory_space<vmem>>, vector<1x1x128xf32>
    %193 = vector.shape_cast %192 : vector<1x1x128xf32> to vector<1x128xf32>
    %194 = vector.broadcast %193 : vector<1x128xf32> to vector<128x128xf32>
    %195 = arith.addf %191, %194 : vector<128x128xf32>
    %c0_230 = arith.constant 0 : index
    %c0_231 = arith.constant 0 : index
    %196 = vector.load %arg9[%c0_230, %c0_231] : memref<1x128xf32, #tpu.memory_space<vmem>>, vector<1x128xf32>
    %197 = vector.broadcast %196 : vector<1x128xf32> to vector<128x128xf32>
    %198 = arith.mulf %195, %197 : vector<128x128xf32>
    %c0_232 = arith.constant 0 : index
    %c0_233 = arith.constant 0 : index
    %199 = vector.load %arg10[%c0_232, %c0_233] : memref<1x128xf32, #tpu.memory_space<vmem>>, vector<1x128xf32>
    %200 = vector.broadcast %199 : vector<1x128xf32> to vector<128x128xf32>
    %201 = arith.addf %198, %200 : vector<128x128xf32>
    %cst_234 = arith.constant 0.000000e+00 : f32
    %202 = vector.broadcast %cst_234 : f32 to vector<128x128xf32>
    %203 = arith.maximumf %201, %202 : vector<128x128xf32>
    %204 = tpu.transpose %203, [1, 0] : vector<128x128xf32> -> vector<128x128xf32>
    %205 = vector.extract_strided_slice %204 {offsets = [0, 0], sizes = [32, 128], strides = [1, 1]} : vector<128x128xf32> to vector<32x128xf32>
    %c0_235 = arith.constant 0 : index
    %c0_236 = arith.constant 0 : index
    %c0_237 = arith.constant 0 : index
    %206 = vector.load %arg11[%c0_235, %c0_236, %c0_237] : memref<1x32x128xf32, #tpu.memory_space<vmem>>, vector<1x32x128xf32>
    %207 = vector.shape_cast %206 : vector<1x32x128xf32> to vector<32x128xf32>
    %208 = vector.shape_cast %205 : vector<32x128xf32> to vector<1x32x128xf32>
    tpu.vector_store %arg11[%c0_235, %c0_236, %c0_237], %208 {strides = array<i32>} : memref<1x32x128xf32, #tpu.memory_space<vmem>>, vector<1x32x128xf32>,
    return
  }
  func.func @transform_1(%arg0: i32, %arg1: i32) -> (i32, i32) {
    %c0_i32 = arith.constant 0 : i32
    %c0_i32_0 = arith.constant 0 : i32
    %c0_i32_1 = arith.constant 0 : i32
    return %c0_i32, %c0_i32_0 : i32, i32
  }
  func.func @transform_2(%arg0: i32, %arg1: i32) -> (i32, i32, i32) {
    %c0_i32 = arith.constant 0 : i32
    %c0_i32_0 = arith.constant 0 : i32
    %c0_i32_1 = arith.constant 0 : i32
    %c0_i32_2 = arith.constant 0 : i32
    return %c0_i32, %c0_i32_0, %c0_i32_1 : i32, i32, i32
  }
  func.func @transform_3(%arg0: i32, %arg1: i32) -> (i32, i32, i32) {
    %c0_i32 = arith.constant 0 : i32
    %c0_i32_0 = arith.constant 0 : i32
    %c0_i32_1 = arith.constant 0 : i32
    %c0_i32_2 = arith.constant 0 : i32
    return %c0_i32, %c0_i32_0, %c0_i32_1 : i32, i32, i32
  }
  func.func @transform_4(%arg0: i32, %arg1: i32) -> (i32, i32, i32) {
    %c0_i32 = arith.constant 0 : i32
    %c0_i32_0 = arith.constant 0 : i32
    %c0_i32_1 = arith.constant 0 : i32
    return %arg0, %c0_i32, %c0_i32_0 : i32, i32, i32
  }
  func.func @transform_5(%arg0: i32, %arg1: i32) -> (i32, i32) {
    %c0_i32 = arith.constant 0 : i32
    %c0_i32_0 = arith.constant 0 : i32
    %c0_i32_1 = arith.constant 0 : i32
    return %c0_i32, %c0_i32_0 : i32, i32
  }
  func.func @transform_6(%arg0: i32, %arg1: i32) -> (i32, i32) {
    %c0_i32 = arith.constant 0 : i32
    %c0_i32_0 = arith.constant 0 : i32
    %c0_i32_1 = arith.constant 0 : i32
    return %c0_i32, %c0_i32_0 : i32, i32
  }
  func.func @transform_7(%arg0: i32, %arg1: i32) -> (i32, i32) {
    %c0_i32 = arith.constant 0 : i32
    %c0_i32_0 = arith.constant 0 : i32
    %c0_i32_1 = arith.constant 0 : i32
    return %c0_i32, %c0_i32_0 : i32, i32
  }
  func.func @transform_8(%arg0: i32, %arg1: i32) -> (i32, i32) {
    %c0_i32 = arith.constant 0 : i32
    %c0_i32_0 = arith.constant 0 : i32
    %c0_i32_1 = arith.constant 0 : i32
    return %c0_i32, %c0_i32_0 : i32, i32
  }
  func.func @transform_9(%arg0: i32, %arg1: i32) -> (i32, i32, i32) {
    %c0_i32 = arith.constant 0 : i32
    %c0_i32_0 = arith.constant 0 : i32
    return %arg0, %c0_i32, %arg1 : i32, i32, i32
  }
}

</mosaic_0001>

<bundles_post_ra>
// kernel: tpu_custom_call.1
= control target key start
LH: loop header
LB: loop body
LE: loop exit
PB: predicated region body
PF: predicated region fallthrough
CT: control target
= control target key end

     0   :  { %s10444_s0 = inlined_call_operand.hbm [shape: f32[2,24,24,128], index: 0, kind: input, shape index: {}]   ;;  %s10445_s1 = inlined_call_operand.hbm [shape: f32[128,128], index: 1, kind: input, shape index: {}]   ;;  %s10446_s2 = inlined_call_operand.hbm [shape: f32[18,128,128], index: 2, kind: input, shape index: {}]   ;;  %s10447_s3 = inlined_call_operand.hbm [shape: f32[3,128,128], index: 3, kind: input, shape index: {}]   ;;  %s10448_s4 = inlined_call_operand.hbm [shape: f32[2,1,128], index: 4, kind: input, shape index: {}]   ;;  %s10449_s5 = inlined_call_operand.hbm [shape: f32[3,128], index: 5, kind: input, shape index: {}]   ;;  %s10450_s6 = inlined_call_operand.hbm [shape: f32[3,128], index: 6, kind: input, shape index: {}]   ;;  %s10451_s7 = inlined_call_operand.hbm [shape: f32[1,128], index: 7, kind: input, shape index: {}]   ;;  %s10452_s8 = inlined_call_operand.hbm [shape: f32[1,128], index: 8, kind: input, shape index: {}]   ;;  %s10453_s9 = inlined_call_operand.hbm [shape: f32[2,32,256], index: 9, kind: output, shape index: {}]  }
   0x1   :  { %10471 = sst [smem:[#allocation41_spill]] %s10444_s0 }
   0x2   :  { %10472 = sst [smem:[#allocation42_spill]] %s10445_s1 }
   0x3   :  { %10473 = sst [smem:[#allocation43_spill]] %s10446_s2 }
   0x4   :  { %10474 = sst [smem:[#allocation44_spill]] %s10447_s3 }
   0x5   :  { %10475 = sst [smem:[#allocation45_spill]] %s10448_s4 }
   0x6   :  { %10476 = sst [smem:[#allocation46_spill]] %s10449_s5 }
   0x7   :  { %10477 = sst [smem:[#allocation47_spill]] %s10450_s6 }
   0x8   :  { %10478 = sst [smem:[#allocation48_spill]] %s10451_s7 }
   0x9   :  { %10479 = sst [smem:[#allocation49_spill]] %s10452_s8 }
   0xa   :  { %10480 = sst [smem:[#allocation50_spill]] %s10453_s9 }
   0xb   :  { %14 = vsyncpa [#allocation7], 0 }
   0xc   :  { %15 = vsyncpa [#allocation10], 0 }
   0xd   :  { %16 = vsyncpa [#allocation13], 0 }
   0xe   :  { %18 = vsyncpa [#allocation13 + $0x1], 0 }
   0xf   :  { %19 = vsyncpa [#allocation16], 0 }
  0x10   :  { %20 = vsyncpa [#allocation19], 0 }
  0x11   :  { %21 = vsyncpa [#allocation8], 0 }
  0x12   :  { %23 = vsyncpa [#allocation8 + $0x1], 0  ;;  %s9357_s30 = smov 0   ;;  %s9359_s10 = smov 0  }
  0x13   :  { %s9361_s11 = smov 0   ;;  %s9363_s12 = smov 0  }
  0x14   :  { %s9365_s13 = smov 0   ;;  %s9367_s14 = smov 0  }
  0x15   :  { %s9369_s15 = smov 0   ;;  %s9371_s16 = smov 0  }
  0x16   :  { %s9373_s17 = smov 0   ;;  %s9375_s18 = smov 0  }
  0x17   :  { %s9377_s19 = smov 0  }
  0x18 LB: > { %10481 = sst [smem:[#allocation33_spill]] %s9250_s30  ;;  %s9413_s20 = sadd.s32 4294967295, %s9290_s19   ;;  %s9290_s19 = sphi %s9377_s19, %s29_s19   ;;  %s9286_s18 = sphi %s9375_s18, %s10532_s18   ;;  %s9282_s17 = sphi %s9373_s17, %s10539_s17   ;;  %s9278_s16 = sphi %s9371_s16, %s10530_s16   ;;  %s9274_s15 = sphi %s9369_s15, %s10538_s15   ;;  %s9270_s14 = sphi %s9367_s14, %s10537_s14   ;;  %s9266_s13 = sphi %s9365_s13, %s10536_s13   ;;  %s9262_s12 = sphi %s9363_s12, %s10535_s12   ;;  %s9258_s11 = sphi %s9361_s11, %s10534_s11   ;;  %s9254_s10 = sphi %s9359_s10, %s10533_s10   ;;  %s9250_s30 = sphi %s9357_s30, %s10529_s30  }
  0x19   : > { %10482 = sst [smem:[#allocation34_spill]] %s9254_s10  ;;  %p5752_p0 = scmp.ge.s32.totalorder %s9290_s19, 1 }
  0x1a   : > { %10483 = sst [smem:[#allocation35_spill]] %s9274_s15  ;;  %p10464_p1 = scmp.eq.s32.totalorder %s9413_s20, 0 }
  0x1b   : > { %10484 = sst [smem:[#allocation36_spill]] %s9278_s16  ;;  %p247_p2 = scmp.lt.s32.totalorder %s9290_s19, 5 }
  0x1c   : > { %10485 = sst [smem:[#allocation37_spill]] %s9286_s18  ;;  %s9292_s22 = smov [#allocation9]  }
  0x1d   : > { %p9418_p3 = pnand %p5752_p0, %p247_p2  ;;  %s272_s23 = sshll.u32 %s9292_s22, 4  ;;  %s9422_s23 = int_to_ptr.vmem [resolvable:$true] %s272_s23 }
  0x1e   : > { %s9293_s24 = smov [#allocation14]   ;;  %s9294_s27 = smov [#allocation15]  }
  0x1f   : > { %s10486_s21 = scalar_select %p9418_p3, 1, 0 }
  0x20   : > { %p8749_p4 = pneg %p9418_p3  ;;  %s299_s25 = sshll.u32 %s9293_s24, 4  ;;  %s9432_s25 = int_to_ptr.vmem [resolvable:$true] %s299_s25 }
  0x21   : > { %10487 = sst [smem:[#allocation38_spill]] %s10486_s21  ;;  %s310_s28 = sshll.u32 %s9294_s27, 4  ;;  %s9434_s28 = int_to_ptr.vmem [resolvable:$true] %s310_s28 }
  0x22   : > { %p9428_p5 = pnand %p8749_p4, %p10464_p1  ;;  %s10489_s2 = sld [smem:[#allocation43_spill]] }
  0x24   : > { %p9444_p7 = pneg %p9428_p5 }
  0x28   : > { %s8896_s9 = scalar_lea.hbm %s10489_s2, 36864 }
  0x29   : > { %p8897_p6 = scmp.ne.s32.totalorder %s10489_s2, %s8896_s9  ;;  %p8903_p10 = scmp.lt.u32.totalorder %s8896_s9, %s10489_s2 }
  0x2b   : > { %p8899_p8 = pnand %p9444_p7, %p8897_p6 }
  0x2d   : > { %p8900_p9 = pneg %p8899_p8 }
  0x2f   : > { %p8905_p11 = pnand %p8903_p10, %p8900_p9 }
  0x31   : > { %8908 = shalt.err (!%p8905_p11)
}
  0x32   : > { %s8909_s0 = scalar_lea.vmem %s9422_s23, 36864  ;;  %p8917_p2 = scmp.lt.s32.totalorder %s9422_s23, %s9422_s23 }
  0x33   : > { %p8910_p12 = scmp.ne.s32.totalorder %s9422_s23, %s8909_s0  ;;  %p8918_p4 = scmp.lt.s32.totalorder %s8909_s0, %s8909_s0 }
  0x35   : > { %p8912_p13 = pnand %p8910_p12, %p9444_p7  ;;  %p8919_p6 = por %p8918_p4, %p8917_p2 }
  0x37   : > { %p8913_p0 = pneg %p8912_p13 }
  0x39   : > { %p8920_p8 = pnand %p8919_p6, %p8913_p0 }
  0x3b   : > { %8923 = shalt.err (!%p8920_p8)
}
  0x3c   : > { %s10462_s16 = smov 128   ;;  %s9296_s9 = smov 8  }
  0x3d   : > { %8755 = dma.hbm_to_vmem [thread:$0]  (!%p9428_p5), %s10489_s2, 36864, %s9422_s23, [#allocation10], %s10462_s16, %s10462_s16, %s9296_s9  }
  0x3e   : > { %s10491_s5 = sld [smem:[#allocation46_spill]] }
  0x44   : > { %s8924_s0 = scalar_lea.hbm %s10491_s5, 64 }
  0x45   : > { %p8925_p9 = scmp.ne.s32.totalorder %s10491_s5, %s8924_s0  ;;  %p8931_p12 = scmp.lt.u32.totalorder %s8924_s0, %s10491_s5 }
  0x47   : > { %p8927_p10 = pnand %p8925_p9, %p9444_p7 }
  0x49   : > { %p8928_p11 = pneg %p8927_p10 }
  0x4b   : > { %p8933_p13 = pnand %p8931_p12, %p8928_p11 }
  0x4d   : > { %8936 = shalt.err (!%p8933_p13)
}
  0x4e   : > { %s8937_s23 = scalar_lea.vmem %s9432_s25, 64  ;;  %p8945_p6 = scmp.lt.s32.totalorder %s9432_s25, %s9432_s25 }
  0x4f   : > { %p8938_p0 = scmp.ne.s32.totalorder %s9432_s25, %s8937_s23  ;;  %p8946_p8 = scmp.lt.s32.totalorder %s8937_s23, %s8937_s23 }
  0x51   : > { %p8940_p2 = pnand %p8938_p0, %p9444_p7  ;;  %p8947_p9 = por %p8946_p8, %p8945_p6 }
  0x53   : > { %p8941_p4 = pneg %p8940_p2 }
  0x55   : > { %p8948_p10 = pnand %p8947_p9, %p8941_p4 }
  0x57   : > { %8951 = shalt.err (!%p8948_p10)
}
  0x58   : > { %8761 = dma.hbm_to_vmem [thread:$0]  (!%p9428_p5), %s10491_s5, 64, %s9432_s25, [#allocation13]  }
  0x59   : > { %s10492_s6 = sld [smem:[#allocation47_spill]] }
  0x5f   : > { %s8952_s15 = scalar_lea.hbm %s10492_s6, 64 }
  0x60   : > { %p8953_p11 = scmp.ne.s32.totalorder %s10492_s6, %s8952_s15  ;;  %p8959_p0 = scmp.lt.u32.totalorder %s8952_s15, %s10492_s6 }
  0x62   : > { %p8955_p12 = pnand %p8953_p11, %p9444_p7 }
  0x64   : > { %p8956_p13 = pneg %p8955_p12 }
  0x66   : > { %p8961_p2 = pnand %p8959_p0, %p8956_p13 }
  0x68   : > { %8964 = shalt.err (!%p8961_p2)
}
  0x69   : > { %s8965_s25 = scalar_lea.vmem %s9434_s28, 64  ;;  %p8973_p9 = scmp.lt.s32.totalorder %s9434_s28, %s9434_s28 }
  0x6a   : > { %p8966_p4 = scmp.ne.s32.totalorder %s9434_s28, %s8965_s25  ;;  %p8974_p10 = scmp.lt.s32.totalorder %s8965_s25, %s8965_s25 }
  0x6c   : > { %p8968_p6 = pnand %p8966_p4, %p9444_p7  ;;  %p8975_p11 = por %p8974_p10, %p8973_p9 }
  0x6e   : > { %p8969_p8 = pneg %p8968_p6 }
  0x70   : > { %p8976_p12 = pnand %p8975_p11, %p8969_p8 }
  0x72   : > { %8979 = shalt.err (!%p8976_p12)
}
  0x73   : > { %8764 = dma.hbm_to_vmem [thread:$0]  (!%p9428_p5), %s10492_s6, 64, %s9434_s28, [#allocation16]  }
  0x74   : > { %s9297_s30 = smov [#allocation6]   ;;  %s9298_s21 = smov [#allocation11]  }
  0x75   : > { %s259_s10 = sshll.u32 %s9297_s30, 4  ;;  %s285_s15 = sshll.u32 %s9298_s21, 4  ;;  %s260_s10 = int_to_ptr.vmem [resolvable:$true] %s259_s10  ;;  %s286_s15 = int_to_ptr.vmem [resolvable:$true] %s285_s15 }
  0x76   : > { %s10493_s1 = sld [smem:[#allocation42_spill]] }
  0x7c   : > { %s8980_s27 = scalar_lea.hbm %s10493_s1, 2048 }
  0x7d   : > { %p8981_p13 = scmp.ne.s32.totalorder %s10493_s1, %s8980_s27  ;;  %p8987_p4 = scmp.lt.u32.totalorder %s8980_s27, %s10493_s1 }
  0x7f   : > { %p8983_p0 = pnand %p8981_p13, %p9444_p7 }
  0x81   : > { %p8984_p2 = pneg %p8983_p0 }
  0x83   : > { %p8989_p6 = pnand %p8987_p4, %p8984_p2 }
  0x85   : > { %8992 = shalt.err (!%p8989_p6)
}
  0x86   : > { %s8993_s28 = scalar_lea.vmem %s260_s10, 2048  ;;  %p9001_p11 = scmp.lt.s32.totalorder %s260_s10, %s260_s10 }
  0x87   : > { %p8994_p8 = scmp.ne.s32.totalorder %s260_s10, %s8993_s28  ;;  %p9002_p12 = scmp.lt.s32.totalorder %s8993_s28, %s8993_s28 }
  0x89   : > { %p8996_p9 = pnand %p8994_p8, %p9444_p7  ;;  %p9003_p1 = por %p9002_p12, %p9001_p11 }
  0x8b   : > { %p8997_p10 = pneg %p8996_p9 }
  0x8d   : > { %p9004_p3 = pnand %p9003_p1, %p8997_p10 }
  0x8f   : > { %9007 = shalt.err (!%p9004_p3)
}
  0x90   : > { %s10494_s4 = smov 128   ;;  %s10495_s3 = sld [smem:[#allocation44_spill]] }
  0x91   : > { %8752 = dma.hbm_to_vmem [thread:$0]  (!%p9428_p5), %s10493_s1, 2048, %s260_s10, [#allocation7], %s10494_s4, %s10494_s4, %s9296_s9  }
  0x96   : > { %s9008_s22 = scalar_lea.hbm %s10495_s3, 6144 }
  0x97   : > { %p9009_p1 = scmp.ne.s32.totalorder %s10495_s3, %s9008_s22  ;;  %p9015_p0 = scmp.lt.u32.totalorder %s9008_s22, %s10495_s3 }
  0x99   : > { %p9011_p3 = pnand %p9009_p1, %p9444_p7 }
  0x9b   : > { %p9012_p13 = pneg %p9011_p3 }
  0x9d   : > { %p9017_p2 = pnand %p9015_p0, %p9012_p13 }
  0x9f   : > { %9020 = shalt.err (!%p9017_p2)
}
  0xa0   : > { %s9021_s28 = scalar_lea.vmem %s286_s15, 6144  ;;  %p9029_p9 = scmp.lt.s32.totalorder %s286_s15, %s286_s15 }
  0xa1   : > { %p9022_p4 = scmp.ne.s32.totalorder %s286_s15, %s9021_s28  ;;  %p9030_p10 = scmp.lt.s32.totalorder %s9021_s28, %s9021_s28 }
  0xa3   : > { %p9024_p6 = pnand %p9022_p4, %p9444_p7  ;;  %p9031_p11 = por %p9030_p10, %p9029_p9 }
  0xa5   : > { %p9025_p8 = pneg %p9024_p6 }
  0xa7   : > { %p9032_p12 = pnand %p9031_p11, %p9025_p8 }
  0xa9   : > { %9035 = shalt.err (!%p9032_p12)
}
  0xaa   : > { %8758 = dma.hbm_to_vmem [thread:$0]  (!%p9428_p5), %s10495_s3, 6144, %s286_s15, [#allocation10], %s10494_s4, %s10494_s4, %s9296_s9  }
  0xab   : > { %s9299_s30 = smov [#allocation17]   ;;  %s9300_s29 = smov [#allocation18]  }
  0xac   : > { %s321_s21 = sshll.u32 %s9299_s30, 4  ;;  %s332_s22 = sshll.u32 %s9300_s29, 4  ;;  %s322_s21 = int_to_ptr.vmem [resolvable:$true] %s321_s21  ;;  %s333_s22 = int_to_ptr.vmem [resolvable:$true] %s332_s22 }
  0xad   : > { %s10496_s7 = sld [smem:[#allocation48_spill]] }
  0xb3   : > { %s9036_s25 = scalar_lea.hbm %s10496_s7, 16 }
  0xb4   : > { %p9037_p1 = scmp.ne.s32.totalorder %s10496_s7, %s9036_s25  ;;  %p9043_p0 = scmp.lt.u32.totalorder %s9036_s25, %s10496_s7 }
  0xb6   : > { %p9039_p3 = pnand %p9037_p1, %p9444_p7 }
  0xb8   : > { %p9040_p13 = pneg %p9039_p3 }
  0xba   : > { %p9045_p2 = pnand %p9043_p0, %p9040_p13 }
  0xbc   : > { %9048 = shalt.err (!%p9045_p2)
}
  0xbd   : > { %s9049_s9 = scalar_lea.vmem %s322_s21, 16  ;;  %s9056_s15 = scalar_lea.vmem %s322_s21, 32 }
  0xbe   : > { %p9050_p4 = scmp.ne.s32.totalorder %s322_s21, %s9049_s9  ;;  %p9057_p9 = scmp.lt.s32.totalorder %s322_s21, %s322_s21 }
  0xbf   : > { %p9058_p10 = scmp.lt.s32.totalorder %s9056_s15, %s9049_s9 }
  0xc0   : > { %p9052_p6 = pnand %p9050_p4, %p9444_p7 }
  0xc1   : > { %p9059_p11 = por %p9058_p10, %p9057_p9 }
  0xc2   : > { %p9053_p8 = pneg %p9052_p6 }
  0xc4   : > { %p9060_p12 = pnand %p9059_p11, %p9053_p8 }
  0xc6   : > { %9063 = shalt.err (!%p9060_p12)
}
  0xc7   : > { %8767 = dma.hbm_to_vmem [thread:$0]  (!%p9428_p5), %s10496_s7, 16, %s322_s21, [#allocation16]  }
  0xc8   : > { %s10497_s8 = sld [smem:[#allocation49_spill]] }
  0xce   : > { %s9064_s29 = scalar_lea.hbm %s10497_s8, 16 }
  0xcf   : > { %p9065_p1 = scmp.ne.s32.totalorder %s10497_s8, %s9064_s29  ;;  %p9071_p0 = scmp.lt.u32.totalorder %s9064_s29, %s10497_s8 }
  0xd1   : > { %p9067_p3 = pnand %p9065_p1, %p9444_p7 }
  0xd3   : > { %p9068_p13 = pneg %p9067_p3 }
  0xd5   : > { %p9073_p2 = pnand %p9071_p0, %p9068_p13 }
  0xd7   : > { %9076 = shalt.err (!%p9073_p2)
}
  0xd8   : > { %s9077_s28 = scalar_lea.vmem %s333_s22, 16  ;;  %s9084_s21 = scalar_lea.vmem %s333_s22, 32 }
  0xd9   : > { %p9078_p4 = scmp.ne.s32.totalorder %s333_s22, %s9077_s28  ;;  %p9085_p9 = scmp.lt.s32.totalorder %s333_s22, %s333_s22 }
  0xda   : > { %p9086_p10 = scmp.lt.s32.totalorder %s9084_s21, %s9077_s28 }
  0xdb   : > { %p9080_p6 = pnand %p9078_p4, %p9444_p7 }
  0xdc   : > { %p9087_p11 = por %p9086_p10, %p9085_p9 }
  0xdd   : > { %p9081_p8 = pneg %p9080_p6 }
  0xdf   : > { %p9088_p12 = pnand %p9087_p11, %p9081_p8 }
  0xe1   : > { %9091 = shalt.err (!%p9088_p12)
}
  0xe2   : > { %8770 = dma.hbm_to_vmem [thread:$0]  (!%p9428_p5), %s10497_s8, 16, %s333_s22, [#allocation19]  }
  0xe3   : > { %s5751_s24 = sadd.s32 4294967294, %s9290_s19   ;;  %s10498_s15 = sld [smem:[#allocation34_spill]] }
  0xe4   : > { %s38_s26 = sadd.s32 1, %s9282_s17  ;;  %s41_s4 = sadd.s32 1, %s9286_s18 }
  0xe5   : > { %p39_p7 = scmp.ge.s32.totalorder %s38_s26, 2  ;;  %s10499_s16 = sld [smem:[#allocation33_spill]] }
  0xe6   : > { %s111_s1 = sadd.s32 1, %s9270_s14  ;;  %p118_p1 = scmp.ne.s32.totalorder %s9270_s14, %s9266_s13 }
  0xe7   : > { %p119_p3 = scmp.eq.s32.totalorder %s9290_s19, 0  ;;  %s10541_s26 = smov (%p39_p7, %s38_s26), 0 }
  0xe8   : > { %10500 = sst [smem:[#allocation39_spill]] %s10541_s26  ;;  %s10543_s4 = smov (!%p39_p7, %s41_s4), %s9286_s18 }
  0xe9   : > { %p9602_p13 = por %p119_p3, %p118_p1  ;;  %p124_p5 = scmp.ne.s32.totalorder %s9266_s13, %s9262_s12 }
  0xea   : > { %p43_p0 = scmp.ge.s32.totalorder %s10543_s4, 2  ;;  %s219_s30 = ssub.s32 %s9282_s17, %s10541_s26 }
  0xeb   : > { %p10502_p2 = scmp.eq.s32.totalorder %s9413_s20, 0  ;;  %s223_s27 = sadd.s32 1, %s9258_s11 }
  0xec   : > { %s10545_s4 = smov (%p43_p0, %s10543_s4), 0  ;;  %p233_p6 = scmp.ne.s32.totalorder %s9258_s11, %s10498_s15 }
  0xed   : > { %p9612_p4 = por %p10502_p2, %p124_p5  ;;  %10504 = sst [smem:[#allocation40_spill]] %s10545_s4 }
  0xee   : > { %p234_p8 = scmp.eq.s32.totalorder %s9413_s20, 3  ;;  %s108_s0 = ssub.s32 %s9286_s18, %s10545_s4 }
  0xef   : > { %p239_p9 = scmp.ne.s32.totalorder %s10498_s15, %s10499_s16  ;;  %p109_p10 = scmp.eq.s32.totalorder %s108_s0, 0 }
  0xf0   : > { %s220_s12 = sor.u32 %s219_s30, %s108_s0  ;;  %p9626_p12 = por %p234_p8, %p233_p6 }
  0xf1   : > { %p221_p11 = scmp.eq.s32.totalorder %s220_s12, 0  ;;  %p240_p7 = scmp.eq.s32.totalorder %s5751_s24, 3 }
  0xf2   : > { %s10505_s25 = scalar_select %p9626_p12, 1, 0 }
  0xf3   : > { %s9631_s23 = scalar_select %p109_p10, %s9270_s14, %s111_s1  }
  0xf4   : > { %s9634_s28 = scalar_select %p221_p11, %s9258_s11, %s223_s27  }
  0xf5   : > { %p8786_p1 = scmp.lt.s32.totalorder %s9290_s19, 4  ;;  %s343_s21 = sand.u32 1, %s9290_s19  }
  0xf6   : > { %s345_s10 = sand.u32 1, %s9270_s14   ;;  %p9639_p3 = por %p240_p7, %p239_p9 }
  0xf7   : > { %s5761_s15 = sshll.u32 %s9286_s18, 4  ;;  %s10507_s0 = sld [smem:[#allocation45_spill]] }
  0xf8   : > { %s10506_s9 = scalar_select %p9639_p3, 1, 0 }
  0xf9   : > { %s346_s1 = scalar_lea.vmem [#allocation12], %s345_s10  ;;  %p9653_p5 = pnand %p8786_p1, %p9602_p13 }
  0xfa   : > { %s353_s27 = sshll.u32 %s346_s1, 4  ;;  %s344_s2 = scalar_lea.sflag [#allocation13], %s343_s21  ;;  %s9649_s27 = int_to_ptr.vmem [resolvable:$true] %s353_s27 }
  0xfb   : > { %p9094_p2 = pneg %p9653_p5 }
  0xfd   : > { %s9647_s12 = scalar_lea.hbm %s10507_s0, %s5761_s15  ;;  %s9097_s16 = scalar_lea.hbm %s10507_s0, 32 }
  0xfe   : > { %s9092_s3 = scalar_lea.hbm %s9647_s12, 16  ;;  %p9098_p13 = scmp.lt.u32.totalorder %s9647_s12, %s10507_s0 }
  0xff   : > { %p9093_p0 = scmp.ne.s32.totalorder %s9647_s12, %s9092_s3  ;;  %p9099_p9 = scmp.lt.u32.totalorder %s9097_s16, %s9092_s3 }
 0x100   : > { %p9101_p11 = scmp.lt.u32.totalorder %s9092_s3, %s9647_s12 }
 0x101   : > { %p9095_p6 = pnand %p9094_p2, %p9093_p0  ;;  %p9100_p10 = por %p9099_p9, %p9098_p13 }
 0x103   : > { %p9096_p8 = pneg %p9095_p6  ;;  %p9102_p7 = por %p9101_p11, %p9100_p10 }
 0x105   : > { %p9103_p1 = pnand %p9102_p7, %p9096_p8 }
 0x107   : > { %9106 = shalt.err (!%p9103_p1)
}
 0x108   : > { %s9107_s21 = scalar_lea.vmem %s9649_s27, 16  ;;  %s9301_s1 = smov [#allocation12]  }
 0x109   : > { %p9108_p0 = scmp.ne.s32.totalorder %s9649_s27, %s9107_s21  ;;  %s9112_s10 = sshll.u32 %s9301_s1, 4  ;;  %s9113_s10 = int_to_ptr.vmem [resolvable:$false] %s9112_s10 }
 0x10a   : > { %s9114_s15 = scalar_lea.vmem %s9113_s10, 32  ;;  %p9115_p12 = scmp.lt.s32.totalorder %s9649_s27, %s9113_s10 }
 0x10b   : > { %p9110_p6 = pnand %p9108_p0, %p9094_p2  ;;  %p9116_p13 = scmp.lt.s32.totalorder %s9114_s15, %s9107_s21 }
 0x10d   : > { %p9111_p3 = pneg %p9110_p6  ;;  %p9117_p9 = por %p9116_p13, %p9115_p12 }
 0x10f   : > { %p9118_p10 = pnand %p9117_p9, %p9111_p3 }
 0x111   : > { %9121 = shalt.err (!%p9118_p10)
}
 0x112   : > { %8774 = dma.hbm_to_vmem [thread:$0]  (!%p9653_p5), %s9647_s12, 16, %s9649_s27, %s344_s2  }
 0x113   : > { %s10509_s3 = sld [smem:[#allocation38_spill]] }
 0x119   : > { %p10510_p8 = scmp.ne.s32.totalorder %s10509_s3, 0 }
 0x11a   : > { %p10511_p2 = scmp.eq.s32.totalorder (!%p10510_p8), %s9413_s20, 0 }
 0x11b   : > { %362 = sbr.rel (%p10510_p8) target bundleno = 1991 (0x7c7), region = 52 }
 0x122   : > { %9219 = dma.done.wait (%p10511_p2), [#allocation7], 2048   ;;  %p10512_p11 = pmov %p10511_p2 }
 0x123   : > { %p10513_p7 = pmov %p10511_p2 }
 0x124   : > { %9221 = vsyncadd (%p10512_p11), [#allocation7], 4294965248 }
 0x125   : > { %9223 = dma.done.wait (%p10513_p7), [#allocation10], 43008   ;;  %p10514_p12 = pmov %p10511_p2 }
 0x126   : > { %s376_s24 = sand.u32 1, %s9413_s20   ;;  %s378_s2 = sand.u32 1, %s9266_s13  }
 0x127   : > { %9225 = vsyncadd (%p10514_p12), [#allocation10], 4294924288  ;;  %s377_s12 = scalar_lea.sflag [#allocation13], %s376_s24  ;;  %s9694_s27 = scalar_lea.vmem [#allocation12], %s378_s2 }
 0x128   : > { %9227 = dma.done.wait (%p9612_p4), %s377_s12, 16  }
 0x129   : > { %9229 = vsyncadd (%p9612_p4), %s377_s12, 4294967280  ;;  %p10515_p3 = pmov %p10511_p2 }
 0x12a   : > { %p10516_p5 = pmov %p10511_p2 }
 0x12b   : > { %9231 = dma.done.wait (%p10515_p3), [#allocation13], 64  }
 0x12c   : > { %9233 = vsyncadd (%p10516_p5), [#allocation13], 4294967232  ;;  %p10517_p1 = pmov %p10511_p2 }
 0x12e   : > { %9235 = dma.done.wait (%p10517_p1), [#allocation16], 80   ;;  %p10518_p0 = pmov %p10517_p1 }
 0x130   : > { %9237 = vsyncadd (%p10518_p0), [#allocation16], 4294967216  ;;  %p10519_p6 = pmov %p10518_p0 }
 0x131   : > { %p10520_p13 = pmov %p10518_p0 }
 0x132   : > { %9239 = dma.done.wait (%p10519_p6), [#allocation19], 16  }
 0x133   : > { %9241 = vsyncadd (%p10520_p13), [#allocation19], 4294967280  ;;  %s10521_s29 = sld [smem:[#allocation34_spill]]  ;;  %s10522_s16 = sld [smem:[#allocation35_spill]] }
 0x134   : > { %s10523_s22 = sld [smem:[#allocation36_spill]]  ;;  %s9302_s3 = smov [#allocation2]  }
 0x135   : > { %s440_s24 = sshll.u32 %s9302_s3, 4  ;;  %s10524_s5 = sld [smem:[#allocation41_spill]]  ;;  %s441_s24 = int_to_ptr.vmem [resolvable:$true] %s440_s24 }
 0x139   : > { %s424_s30 = sand.u32 1, %s10521_s29   ;;  %s5772_s21 = smul.u32 192, %s10522_s16 }
 0x13a   : > { %s5770_s1 = sshll.u32 %s424_s30, 5  ;;  %s429_s10 = smul.u32 576, %s10523_s22 }
 0x13b   : > { %s9124_s4 = scalar_lea.hbm %s10524_s5, 18432 }
 0x13c   : > { %s430_s15 = sadd.s32 %s5772_s21, %s429_s10 }
 0x13d   : > { %s5773_s2 = sshll.u32 %s430_s15, 4 }
 0x13e   : > { %s432_s6 = scalar_lea.hbm %s10524_s5, %s5773_s2 }
 0x13f   : > { %s9122_s20 = scalar_lea.hbm %s432_s6, 6144  ;;  %p9125_p9 = scmp.lt.u32.totalorder %s432_s6, %s10524_s5 }
 0x140   : > { %p9123_p4 = scmp.ne.s32.totalorder %s432_s6, %s9122_s20  ;;  %p9126_p10 = scmp.lt.u32.totalorder %s9124_s4, %s9122_s20 }
 0x141   : > { %p9128_p2 = scmp.lt.u32.totalorder %s9122_s20, %s432_s6 }
 0x142   : > { %p9127_p8 = por %p9126_p10, %p9125_p9 }
 0x144   : > { %p9129_p11 = por %p9128_p2, %p9127_p8 }
 0x146   : > { %p9130_p7 = pnand %p9129_p11, %p9123_p4 }
 0x148   : > { %9133 = shalt.err (!%p9130_p7)  }
 0x149   : > { %s9134_s21 = scalar_lea.vmem %s441_s24, 6144  ;;  %p9139_p3 = scmp.lt.s32.totalorder %s441_s24, %s441_s24 }
 0x14a   : > { %p9135_p12 = scmp.ne.s32.totalorder %s441_s24, %s9134_s21  ;;  %p9140_p5 = scmp.lt.s32.totalorder %s9134_s21, %s9134_s21 }
 0x14c   : > { %p9141_p1 = por %p9140_p5, %p9139_p3 }
 0x14e   : > { %p9142_p0 = pnand %p9141_p1, %p9135_p12 }
 0x150   : > { %9145 = shalt.err (!%p9142_p0)  }
 0x151   : > { %443 = dma.hbm_to_vmem [thread:$0]  %s432_s6, 6144, %s441_s24, [#allocation5] }
 0x152   : > { %s9726_s7 = scalar_lea.vmem [#allocation20], %s5770_s1 }
 0x153   : > { %9242 = dma.done.wait [#allocation5], 6144 }
 0x154   : > { %9243 = vsyncadd [#allocation5], 4294961152  ;;  %v465_v0 = vld [vmem:[#allocation6] sm:$0xff]  ;;  %v466_v1 = vld [vmem:[#allocation6 + $0x8] sm:$0xff]  ;;  %s5784_s6 = sshll.u32 %s10523_s22, 3  ;;  %s5587_s26 = sshll.u32 %s9726_s7, 4  ;;  %s10378_s26 = int_to_ptr.vmem [resolvable:$true] %s5587_s26 }
 0x155   : > { %v467_v2 = vld [vmem:[#allocation6 + $0x10] sm:$0xff]  ;;  %v7725_v3 = vpack.c.bf16 %v466_v1, %v465_v0  ;;  %v468_v4 = vld [vmem:[#allocation6 + $0x18] sm:$0xff]  ;;  %v469_v6 = vld [vmem:[#allocation6 + $0x20] sm:$0xff]  ;;  %s5584_s8 = sadd.s32 %s10522_s16, %s5784_s6  ;;  %s10383_s16 = scalar_lea.sflag [#allocation8], %s424_s30 }
 0x156   : > { %v7729_v5 = vpack.c.bf16 %v468_v4, %v467_v2  ;;  %v470_v7 = vld [vmem:[#allocation6 + $0x28] sm:$0xff]  ;;  %v471_v10 = vld [vmem:[#allocation6 + $0x30] sm:$0xff]  ;;  %v472_v11 = vld [vmem:[#allocation6 + $0x38] sm:$0xff]  ;;  %s5785_s18 = sshll.u32 %s5584_s8, 7  ;;  %s9146_s22 = scalar_lea.vmem %s10378_s26, 512 }
 0x157   : > { %7726 = vmatprep.subr.bf16.mxu0 %v7725_v3  ;;  %v7733_v8 = vpack.c.bf16 %v470_v7, %v469_v6  ;;  %v9728_v9 = vld [vmem:[#allocation2 + $0x64] sm:$0xff]  ;;  %v7737_v12 = vpack.c.bf16 %v472_v11, %v471_v10  ;;  %v475_v16 = vld [vmem:[#allocation6 + $0x50] sm:$0xff]  ;;  %v476_v17 = vld [vmem:[#allocation6 + $0x58] sm:$0xff]  ;;  %p9147_p6 = scmp.ne.s32.totalorder %s10378_s26, %s9146_s22  ;;  %p10526_p13 = scmp.ne.s32.totalorder %s10505_s25, 0 }
 0x158   : > { %7728 = vmatpush3.bf16.msra.mxu0 %v7725_v3  ;;  %6525 = vmatprep.mubr.f32.mxu0 %v9728_v9  ;;  %v473_v13 = vld [vmem:[#allocation6 + $0x40] sm:$0xff]  ;;  %v474_v14 = vld [vmem:[#allocation6 + $0x48] sm:$0xff]  ;;  %v7745_v18 = vpack.c.bf16 %v476_v17, %v475_v16  ;;  %v479_v22 = vld [vmem:[#allocation6 + $0x70] sm:$0xff]  ;;  %s9303_s10 = smov [#allocation20]  }
 0x159   : > { %7730 = vmatprep.subr.bf16.mxu0 %v7729_v5  ;;  %v7741_v15 = vpack.c.bf16 %v474_v14, %v473_v13  ;;  %v477_v19 = vld [vmem:[#allocation6 + $0x60] sm:$0xff]  ;;  %v478_v20 = vld [vmem:[#allocation6 + $0x68] sm:$0xff]  ;;  %v480_v23 = vld [vmem:[#allocation6 + $0x78] sm:$0xff]  ;;  %p9148_p4 = pnand %p9147_p6, %p10526_p13  ;;  %s9150_s15 = sshll.u32 %s9303_s10, 4  ;;  %s9151_s15 = int_to_ptr.vmem [resolvable:$false] %s9150_s15 }
 0x15a   : > { %v7749_v21 = vpack.c.bf16 %v478_v20, %v477_v19  ;;  %v7753_v24 = vpack.c.bf16 %v480_v23, %v479_v22  ;;  %v684_v25 = vld [vmem:[#allocation11] sm:$0xff]  ;;  %v685_v26 = vld [vmem:[#allocation11 + $0x8] sm:$0xff]  ;;  %v686_v28 = vld [vmem:[#allocation11 + $0x10] sm:$0xff]  ;;  %s9152_s3 = scalar_lea.vmem %s9151_s15, 1024  ;;  %p9153_p10 = scmp.lt.s32.totalorder %s10378_s26, %s9151_s15 }
 0x15b   : > { %v7757_v27 = vpack.c.bf16 %v685_v26, %v684_v25  ;;  %v687_v29 = vld [vmem:[#allocation11 + $0x18] sm:$0xff]  ;;  %v9731_v30 = vld [vmem:[#allocation2 + $0x6c] sm:$0xff]  ;;  %v688_v33 = vld [vmem:[#allocation11 + $0x20] sm:$0xff]  ;;  %p9149_p9 = pneg %p9148_p4  ;;  %p9154_p8 = scmp.lt.s32.totalorder %s9152_s3, %s9146_s22 }
 0x15c   : > { %7732 = vmatpush3.bf16.msra.mxu0 %v7729_v5  ;;  %v9733_v31 = vld [vmem:[#allocation2 + $0x7c] sm:$0xff]  ;;  %v7761_v32 = vpack.c.bf16 %v687_v29, %v686_v28  ;;  %v689_v34 = vld [vmem:[#allocation11 + $0x28] sm:$0xff]  ;;  %v9739_v36 = vld [vmem:[#allocation2 + $0x94] sm:$0xff] }
 0x15d   : > { %7734 = vmatprep.subr.bf16.mxu0 %v7733_v8  ;;  %v9737_v35 = vld [vmem:[#allocation2 + $0x84] sm:$0xff]  ;;  %v7765_v37 = vpack.c.bf16 %v689_v34, %v688_v33  ;;  %v690_v38 = vld [vmem:[#allocation11 + $0x30] sm:$0xff]  ;;  %v691_v39 = vld [vmem:[#allocation11 + $0x38] sm:$0xff]  ;;  %p9155_p2 = por %p9154_p8, %p9153_p10 }
 0x15e   : > { %v9743_v40 = vld [vmem:[#allocation2 + $0x9c] sm:$0xff]  ;;  %v9745_v41 = vld [vmem:[#allocation2 + $0xac] sm:$0xff]  ;;  %v7769_v42 = vpack.c.bf16 %v691_v39, %v690_v38  ;;  %v9749_v45 = vld [vmem:[#allocation2 + $0xb4] sm:$0xff] }
 0x15f   : > { %v692_v43 = vld [vmem:[#allocation11 + $0x40] sm:$0xff]  ;;  %v693_v44 = vld [vmem:[#allocation11 + $0x48] sm:$0xff]  ;;  %v694_v48 = vld [vmem:[#allocation11 + $0x50] sm:$0xff]  ;;  %p9156_p11 = pnand %p9155_p2, %p9149_p9 }
 0x160   : > { %7736 = vmatpush3.bf16.msra.mxu0 %v7733_v8  ;;  %v9751_v46 = vld [vmem:[#allocation2 + $0xc4] sm:$0xff]  ;;  %v7773_v47 = vpack.c.bf16 %v693_v44, %v692_v43  ;;  %v695_v49 = vld [vmem:[#allocation11 + $0x58] sm:$0xff]  ;;  %v9755_v50 = vld [vmem:[#allocation2 + $0xcc] sm:$0xff] }
 0x161   : > { %7738 = vmatprep.subr.bf16.mxu0 %v7737_v12  ;;  %v9757_v51 = vld [vmem:[#allocation2 + $0xdc] sm:$0xff]  ;;  %v7777_v52 = vpack.c.bf16 %v695_v49, %v694_v48  ;;  %v9761_v53 = vld [vmem:[#allocation2 + $0xe4] sm:$0xff]  ;;  %v9763_v54 = vld [vmem:[#allocation2 + $0xf4] sm:$0xff] }
 0x162   : > { %v462_v55 = vld [vmem:[#allocation2 + $0xfc] sm:$0xff]  ;;  %v463_v56 = vld [vmem:[#allocation2 + $0x10c] sm:$0xff]  ;;  %v464_v57 = vld [vmem:[#allocation2 + $0x114] sm:$0xff] }
 0x163   : > { %v696_v58 = vld [vmem:[#allocation11 + $0x60] sm:$0xff]  ;;  %v697_v59 = vld [vmem:[#allocation11 + $0x68] sm:$0xff]  ;;  %v698_v61 = vld [vmem:[#allocation11 + $0x70] sm:$0xff] }
 0x164   : > { %7740 = vmatpush3.bf16.msra.mxu0 %v7737_v12  ;;  %v7781_v60 = vpack.c.bf16 %v697_v59, %v696_v58  ;;  %v699_v62 = vld [vmem:[#allocation11 + $0x78] sm:$0xff]  ;;  %v878_v0 = vld [vmem:[#allocation9] sm:$0xff]  ;;  %v879_v1 = vld [vmem:[#allocation9 + $0x8] sm:$0xff] }
 0x165   : > { %7742 = vmatprep.subr.bf16.mxu0 %v7741_v15  ;;  %v7785_v63 = vpack.c.bf16 %v699_v62, %v698_v61  ;;  %v7789_v2 = vpack.c.bf16 %v879_v1, %v878_v0  ;;  %v9767_v3 = vld [vmem:[#allocation14] ss:$0 sm:$0xff]  ;;  %v9769_v5 = vld [vmem:[#allocation15] ss:$0 sm:$0xff]  ;;  %v880_v13 = vld [vmem:[#allocation9 + $0x10] sm:$0xff] }
 0x166   : > { %v881_v14 = vld [vmem:[#allocation9 + $0x18] sm:$0xff]  ;;  %v883_v25 = vld [vmem:[#allocation9 + $0x28] sm:$0xff]  ;;  %v884_v39 = vld [vmem:[#allocation9 + $0x30] sm:$0xff] }
 0x167   : > { %v886_v58 = vld [vmem:[#allocation9 + $0x40] sm:$0xff]  ;;  %v887_v59 = vld [vmem:[#allocation9 + $0x48] sm:$0xff] }
 0x168   : > { %7744 = vmatpush3.bf16.msra.mxu0 %v7741_v15 }
 0x169   : > { %7746 = vmatprep.subr.bf16.mxu0 %v7745_v18 }
 0x16c   : > { %7748 = vmatpush3.bf16.msra.mxu0 %v7745_v18 }
 0x16d   : > { %7750 = vmatprep.subr.bf16.mxu0 %v7749_v21 }
 0x170   : > { %7752 = vmatpush3.bf16.msra.mxu0 %v7749_v21  ;;  %v7793_v21 = vpack.c.bf16 %v881_v14, %v880_v13 }
 0x171   : > { %7754 = vmatprep.subr.bf16.mxu0 %v7753_v24 }
 0x174   : > { %7756 = vmatpush3.bf16.msra.mxu0 %v7753_v24  ;;  %v882_v24 = vld [vmem:[#allocation9 + $0x20] sm:$0xff] }
 0x175   : > { %7758 = vmatprep.subr.bf16.mxu0 %v7757_v27  ;;  %v7797_v34 = vpack.c.bf16 %v883_v25, %v882_v24 }
 0x177   : > { %6526 = vmatmul.mubr.f32.vlgmr.msra.gmra.mrb[0].mxu0 %v9731_v30 }
 0x178   : > { %6528 = vmatprep.mubr.f32.mxu0 %v9733_v31  ;;  %7760 = vmatpush3.bf16.msra.mxu0 %v7757_v27 }
 0x179   : > { %7762 = vmatprep.subr.bf16.mxu0 %v7761_v32 }
 0x17b   : > { %6529 = vmatmul.mubr.f32.gmra.mrb[2].mxu0 %v9737_v35 }
 0x17c   : > { %6531 = vmatprep.mubr.f32.mxu0 %v9739_v36  ;;  %7764 = vmatpush3.bf16.msra.mxu0 %v7761_v32 }
 0x17d   : > { %7766 = vmatprep.subr.bf16.mxu0 %v7765_v37 }
 0x17f   : > { %6532 = vmatmul.mubr.f32.gmra.mrb[4].mxu0 %v9743_v40 }
 0x180   : > { %6534 = vmatprep.mubr.f32.mxu0 %v9745_v41  ;;  %7768 = vmatpush3.bf16.msra.mxu0 %v7765_v37 }
 0x181   : > { %7770 = vmatprep.subr.bf16.mxu0 %v7769_v42 }
 0x183   : > { %6535 = vmatmul.mubr.f32.gmra.mrb[6].mxu0 %v9749_v45 }
 0x184   : > { %6537 = vmatprep.mubr.f32.mxu0 %v9751_v46  ;;  %7772 = vmatpush3.bf16.msra.mxu0 %v7769_v42  ;;  %v885_v42 = vld [vmem:[#allocation9 + $0x38] sm:$0xff] }
 0x185   : > { %7774 = vmatprep.subr.bf16.mxu0 %v7773_v47 }
 0x187   : > { %6538 = vmatmul.mubr.f32.gmra.mrb[8].mxu0 %v9755_v50 }
 0x188   : > { %6540 = vmatprep.mubr.f32.mxu0 %v9757_v51  ;;  %7776 = vmatpush3.bf16.msra.mxu0 %v7773_v47 }
 0x189   : > { %7778 = vmatprep.subr.bf16.mxu0 %v7777_v52 }
 0x18b   : > { %6541 = vmatmul.mubr.f32.gmra.mrb[10].mxu0 %v9761_v53 }
 0x18c   : > { %6543 = vmatprep.mubr.f32.mxu0 %v9763_v54  ;;  %7780 = vmatpush3.bf16.msra.mxu0 %v7777_v52 }
 0x18d   : > { %7782 = vmatprep.subr.bf16.mxu0 %v7781_v60 }
 0x18f   : > { %6544 = vmatmul.mubr.f32.gmra.mrb[12].mxu0 %v462_v55  ;;  %v7801_v55 = vpack.c.bf16 %v885_v42, %v884_v39 }
 0x190   : > { %6546 = vmatprep.mubr.f32.mxu0 %v463_v56  ;;  %7784 = vmatpush3.bf16.msra.mxu0 %v7781_v60 }
 0x191   : > { %7786 = vmatprep.subr.bf16.mxu0 %v7785_v63 }
 0x193   : > { %6547 = vmatmul.mubr.f32.gmra.mrb[14].mxu0 %v464_v57 }
 0x194   : > { %7788 = vmatpush3.bf16.msra.mxu0 %v7785_v63 }
 0x195   : > { %7790 = vmatprep.subr.bf16.mxu0 %v7789_v2 }
 0x24a   : > { %v6527_v4 = vpop.f32.mrb[0].mxu0 }
 0x24b   : > { %v632_v6 = vmul.f32 %v6527_v4, %v9767_v3  ;;  %v547_v7 = vpop.f32.mrb[1].mxu0 }
 0x24c   : > { %v631_v8 = vmul.f32 %v9767_v3, %v547_v7  ;;  %v888_v7 = vld [vmem:[#allocation9 + $0x50] sm:$0xff] }
 0x24d   : > { %v653_v10 = vadd.f32 %v9769_v5, %v632_v6 }
 0x24e   : > { %v652_v11 = vadd.f32 %v9769_v5, %v631_v8  ;;  %v6530_v12 = vpop.f32.mrb[2].mxu0  ;;  %v889_v8 = vld [vmem:[#allocation9 + $0x58] sm:$0xff] }
 0x24f   : > { %v634_v15 = vmul.f32 %v6530_v12, %v9767_v3  ;;  %v557_v16 = vpop.f32.mrb[3].mxu0  ;;  %v669_v19 = vmax.f32 %v653_v10, 0.0 }
 0x250   : > { %v668_v17 = vmax.f32 %v652_v11, 0.0  ;;  %v633_v18 = vmul.f32 %v9767_v3, %v557_v16  ;;  %v7809_v16 = vpack.c.bf16 %v889_v8, %v888_v7  ;;  %v9808_v7 = vld [vmem:[#allocation2 + $0x7a] sm:$0xff] }
 0x251   : > { %v655_v20 = vadd.f32 %v9769_v5, %v634_v15 }
 0x252   : > { %v654_v22 = vadd.f32 %v9769_v5, %v633_v18  ;;  %v6533_v23 = vpop.f32.mrb[4].mxu0  ;;  %6581 = vmatprep.mubr.f32.mxu0 %v668_v17 }
 0x253   : > { %v636_v26 = vmul.f32 %v6533_v23, %v9767_v3  ;;  %v567_v27 = vpop.f32.mrb[5].mxu0  ;;  %6582 = vmatmul.mubr.f32.vlgmr.msra.gmra.mrb[16].mxu0 %v669_v19  ;;  %v671_v32 = vmax.f32 %v655_v20, 0.0  ;;  %v890_v19 = vld [vmem:[#allocation9 + $0x60] sm:$0xff]  ;;  %v891_v20 = vld [vmem:[#allocation9 + $0x68] sm:$0xff] }
 0x254   : > { %v670_v28 = vmax.f32 %v654_v22, 0.0  ;;  %v635_v29 = vmul.f32 %v9767_v3, %v567_v27  ;;  %7792 = vmatpush3.bf16.msra.mxu0 %v7789_v2  ;;  %v7805_v2 = vpack.c.bf16 %v887_v59, %v886_v58  ;;  %v7813_v27 = vpack.c.bf16 %v891_v20, %v890_v19  ;;  %v1075_v58 = vld [vmem:[#allocation9 + $0x98] sm:$0xff]  ;;  %v1084_v20 = vld [vmem:[#allocation9 + $0xe0] sm:$0xff] }
 0x255   : > { %v657_v33 = vadd.f32 %v9769_v5, %v636_v26  ;;  %7794 = vmatprep.subr.bf16.mxu0 %v7793_v21  ;;  %v863_v59 = vld [vmem:[#allocation2 + $0x3a] sm:$0xff] }
 0x256   : > { %v656_v37 = vadd.f32 %v9769_v5, %v635_v29  ;;  %v6536_v38 = vpop.f32.mrb[6].mxu0  ;;  %6584 = vmatprep.mubr.f32.mxu0 %v670_v28 }
 0x257   : > { %v638_v43 = vmul.f32 %v6536_v38, %v9767_v3  ;;  %v577_v44 = vpop.f32.mrb[7].mxu0  ;;  %6585 = vmatmul.mubr.f32.gmra.mrb[18].mxu0 %v671_v32  ;;  %v673_v49 = vmax.f32 %v657_v33, 0.0  ;;  %v892_v32 = vld [vmem:[#allocation9 + $0x70] sm:$0xff]  ;;  %v893_v33 = vld [vmem:[#allocation9 + $0x78] sm:$0xff] }
 0x258   : > { %v672_v47 = vmax.f32 %v656_v37, 0.0  ;;  %v637_v48 = vmul.f32 %v9767_v3, %v577_v44  ;;  %7796 = vmatpush3.bf16.msra.mxu0 %v7793_v21  ;;  %v7817_v44 = vpack.c.bf16 %v893_v33, %v892_v32  ;;  %v1298_v32 = vld [vmem:[#allocation9 + $0x100] sm:$0xff]  ;;  %v1299_v33 = vld [vmem:[#allocation9 + $0x108] sm:$0xff] }
 0x259   : > { %v659_v52 = vadd.f32 %v9769_v5, %v638_v43  ;;  %7798 = vmatprep.subr.bf16.mxu0 %v7797_v34 }
 0x25a   : > { %v658_v56 = vadd.f32 %v9769_v5, %v637_v48  ;;  %v6539_v57 = vpop.f32.mrb[8].mxu0  ;;  %6587 = vmatprep.mubr.f32.mxu0 %v672_v47  ;;  %v1072_v48 = vld [vmem:[#allocation9 + $0x80] sm:$0xff] }
 0x25b   : > { %v640_v60 = vmul.f32 %v6539_v57, %v9767_v3  ;;  %v587_v61 = vpop.f32.mrb[9].mxu0  ;;  %6588 = vmatmul.mubr.f32.gmra.mrb[20].mxu0 %v673_v49  ;;  %v675_v0 = vmax.f32 %v659_v52, 0.0  ;;  %v1073_v49 = vld [vmem:[#allocation9 + $0x88] sm:$0xff] }
 0x25c   : > { %v674_v62 = vmax.f32 %v658_v56, 0.0  ;;  %v639_v63 = vmul.f32 %v9767_v3, %v587_v61  ;;  %7800 = vmatpush3.bf16.msra.mxu0 %v7797_v34  ;;  %v862_v56 = vld [vmem:[#allocation2 + $0x32] sm:$0xff]  ;;  %v7821_v57 = vpack.c.bf16 %v1073_v49, %v1072_v48  ;;  %v1076_v61 = vld [vmem:[#allocation9 + $0xa0] sm:$0xff]  ;;  %v1303_v49 = vld [vmem:[#allocation9 + $0x128] sm:$0xff] }
 0x25d   : > { %v661_v1 = vadd.f32 %v9769_v5, %v640_v60  ;;  %7802 = vmatprep.subr.bf16.mxu0 %v7801_v55  ;;  %v864_v60 = vld [vmem:[#allocation2 + $0x4a] sm:$0xff]  ;;  %v1302_v48 = vld [vmem:[#allocation9 + $0x120] sm:$0xff] }
 0x25e   : > { %v660_v4 = vadd.f32 %v9769_v5, %v639_v63  ;;  %v6542_v6 = vpop.f32.mrb[10].mxu0  ;;  %6590 = vmatprep.mubr.f32.mxu0 %v674_v62  ;;  %v1077_v62 = vld [vmem:[#allocation9 + $0xa8] sm:$0xff]  ;;  %v865_v63 = vld [vmem:[#allocation2 + $0x52] sm:$0xff] }
 0x25f   : > { %v642_v10 = vmul.f32 %v6542_v6, %v9767_v3  ;;  %v597_v11 = vpop.f32.mrb[11].mxu0  ;;  %6591 = vmatmul.mubr.f32.gmra.mrb[22].mxu0 %v675_v0  ;;  %v677_v14 = vmax.f32 %v661_v1, 0.0  ;;  %v9803_v0 = vld [vmem:[#allocation2 + $0x62] sm:$0xff]  ;;  %v7829_v1 = vpack.c.bf16 %v1077_v62, %v1076_v61  ;;  %v9806_v6 = vld [vmem:[#allocation2 + $0x6a] sm:$0xff]  ;;  %v1309_v61 = vld [vmem:[#allocation9 + $0x158] sm:$0xff] }
 0x260   : > { %v676_v12 = vmax.f32 %v660_v4, 0.0  ;;  %v641_v13 = vmul.f32 %v9767_v3, %v597_v11  ;;  %7804 = vmatpush3.bf16.msra.mxu0 %v7801_v55  ;;  %v1079_v4 = vld [vmem:[#allocation9 + $0xb8] sm:$0xff]  ;;  %v1081_v11 = vld [vmem:[#allocation9 + $0xc8] sm:$0xff] }
 0x261   : > { %v663_v15 = vadd.f32 %v9769_v5, %v642_v10  ;;  %7806 = vmatprep.subr.bf16.mxu0 %v7805_v2  ;;  %v1080_v10 = vld [vmem:[#allocation9 + $0xc0] sm:$0xff] }
 0x262   : > { %v662_v17 = vadd.f32 %v9769_v5, %v641_v13  ;;  %v6545_v18 = vpop.f32.mrb[12].mxu0  ;;  %6593 = vmatprep.mubr.f32.mxu0 %v676_v12  ;;  %v9812_v12 = vld [vmem:[#allocation2 + $0x82] sm:$0xff]  ;;  %v9814_v13 = vld [vmem:[#allocation2 + $0x92] sm:$0xff] }
 0x263   : > { %v644_v21 = vmul.f32 %v6545_v18, %v9767_v3  ;;  %v607_v22 = vpop.f32.mrb[13].mxu0  ;;  %6594 = vmatmul.mubr.f32.gmra.mrb[24].mxu0 %v677_v14  ;;  %v679_v25 = vmax.f32 %v663_v15, 0.0  ;;  %v7837_v14 = vpack.c.bf16 %v1081_v11, %v1080_v10  ;;  %v1082_v15 = vld [vmem:[#allocation9 + $0xd0] sm:$0xff]  ;;  %v1524_v11 = vld [vmem:[#allocation9 + $0x180] sm:$0xff] }
 0x264   : > { %v678_v23 = vmax.f32 %v662_v17, 0.0  ;;  %v643_v24 = vmul.f32 %v9767_v3, %v607_v22  ;;  %7808 = vmatpush3.bf16.msra.mxu0 %v7805_v2  ;;  %v1078_v2 = vld [vmem:[#allocation9 + $0xb0] sm:$0xff]  ;;  %v9818_v17 = vld [vmem:[#allocation2 + $0x9a] sm:$0xff] }
 0x265   : > { %v665_v26 = vadd.f32 %v9769_v5, %v644_v21  ;;  %7810 = vmatprep.subr.bf16.mxu0 %v7809_v16  ;;  %v7833_v8 = vpack.c.bf16 %v1079_v4, %v1078_v2  ;;  %v9820_v18 = vld [vmem:[#allocation2 + $0xaa] sm:$0xff]  ;;  %v9824_v22 = vld [vmem:[#allocation2 + $0xb2] sm:$0xff] }
 0x266   : > { %v664_v28 = vadd.f32 %v9769_v5, %v643_v24  ;;  %v6548_v29 = vpop.f32.mrb[14].mxu0  ;;  %6596 = vmatprep.mubr.f32.mxu0 %v678_v23  ;;  %v1085_v21 = vld [vmem:[#allocation9 + $0xe8] sm:$0xff]  ;;  %v1312_v4 = vld [vmem:[#allocation9 + $0x170] sm:$0xff] }
 0x267   : > { %v646_v34 = vmul.f32 %v6548_v29, %v9767_v3  ;;  %v617_v37 = vpop.f32.mrb[15].mxu0  ;;  %6597 = vmatmul.mubr.f32.gmra.mrb[26].mxu0 %v679_v25  ;;  %v681_v42 = vmax.f32 %v665_v26, 0.0  ;;  %v9826_v23 = vld [vmem:[#allocation2 + $0xc2] sm:$0xff]  ;;  %v7845_v24 = vpack.c.bf16 %v1085_v21, %v1084_v20  ;;  %v1086_v25 = vld [vmem:[#allocation9 + $0xf0] sm:$0xff]  ;;  %v1087_v26 = vld [vmem:[#allocation9 + $0xf8] sm:$0xff] }
 0x268   : > { %v680_v38 = vmax.f32 %v664_v28, 0.0  ;;  %v645_v39 = vmul.f32 %v9767_v3, %v617_v37  ;;  %7812 = vmatpush3.bf16.msra.mxu0 %v7809_v16  ;;  %v1074_v3 = vld [vmem:[#allocation9 + $0x90] sm:$0xff]  ;;  %v1083_v16 = vld [vmem:[#allocation9 + $0xd8] sm:$0xff]  ;;  %v7849_v29 = vpack.c.bf16 %v1087_v26, %v1086_v25  ;;  %v1528_v26 = vld [vmem:[#allocation9 + $0x1a0] sm:$0xff] }
 0x269   : > { %v667_v43 = vadd.f32 %v9769_v5, %v646_v34  ;;  %7814 = vmatprep.subr.bf16.mxu0 %v7813_v27  ;;  %v7841_v19 = vpack.c.bf16 %v1083_v16, %v1082_v15  ;;  %v9832_v28 = vld [vmem:[#allocation2 + $0xda] sm:$0xff]  ;;  %v9836_v34 = vld [vmem:[#allocation2 + $0xe2] sm:$0xff] }
 0x26a   : > { %v666_v47 = vadd.f32 %v9769_v5, %v645_v39  ;;  %6599 = vmatprep.mubr.f32.mxu0 %v680_v38  ;;  %v7825_v5 = vpack.c.bf16 %v1075_v58, %v1074_v3  ;;  %v1055_v37 = vld [vmem:[#allocation2 + $0x34] sm:$0xff]  ;;  %v7853_v38 = vpack.c.bf16 %v1299_v33, %v1298_v32  ;;  %v1306_v58 = vld [vmem:[#allocation9 + $0x140] sm:$0xff] }
 0x26b   : > { %6600 = vmatmul.mubr.f32.gmra.mrb[28].mxu0 %v681_v42  ;;  %v683_v55 = vmax.f32 %v667_v43, 0.0  ;;  %v1300_v39 = vld [vmem:[#allocation9 + $0x110] sm:$0xff]  ;;  %v1301_v42 = vld [vmem:[#allocation9 + $0x118] sm:$0xff]  ;;  %v9851_v33 = vld [vmem:[#allocation2 + $0x66] sm:$0xff] }
 0x26c   : > { %v682_v52 = vmax.f32 %v666_v47, 0.0  ;;  %7816 = vmatpush3.bf16.msra.mxu0 %v7813_v27  ;;  %v9830_v27 = vld [vmem:[#allocation2 + $0xca] sm:$0xff]  ;;  %v1056_v43 = vld [vmem:[#allocation2 + $0x3c] sm:$0xff]  ;;  %v7857_v47 = vpack.c.bf16 %v1301_v42, %v1300_v39 }
 0x26d   : > { %7818 = vmatprep.subr.bf16.mxu0 %v7817_v44  ;;  %v1281_v15 = vld [vmem:[#allocation2 + $0x36] sm:$0xff]  ;;  %v1282_v21 = vld [vmem:[#allocation2 + $0x3e] sm:$0xff]  ;;  %v9854_v42 = vld [vmem:[#allocation2 + $0x6e] sm:$0xff] }
 0x26e   : > { %6602 = vmatprep.mubr.f32.mxu0 %v682_v52  ;;  %v1058_v52 = vld [vmem:[#allocation2 + $0x54] sm:$0xff] }
 0x26f   : > { %6603 = vmatmul.mubr.f32.gmra.mrb[30].mxu0 %v683_v55  ;;  %v7861_v55 = vpack.c.bf16 %v1303_v49, %v1302_v48  ;;  %v1527_v20 = vld [vmem:[#allocation9 + $0x198] sm:$0xff]  ;;  %v1533_v48 = vld [vmem:[#allocation9 + $0x1c8] sm:$0xff] }
 0x270   : > { %7820 = vmatpush3.bf16.msra.mxu0 %v7817_v44  ;;  %6637 = vmatprep.mubr.f32.mxu0 %v862_v56  ;;  %v1057_v44 = vld [vmem:[#allocation2 + $0x4c] sm:$0xff]  ;;  %v1284_v32 = vld [vmem:[#allocation2 + $0x56] sm:$0xff] }
 0x271   : > { %7822 = vmatprep.subr.bf16.mxu0 %v7821_v57  ;;  %v1304_v56 = vld [vmem:[#allocation9 + $0x130] sm:$0xff]  ;;  %v1531_v39 = vld [vmem:[#allocation9 + $0x1b8] sm:$0xff]  ;;  %v9860_v49 = vld [vmem:[#allocation2 + $0x86] sm:$0xff] }
 0x273   : > { %6638 = vmatmul.mubr.f32.vlgmr.msra.gmra.mrb[32].mxu0 %v863_v59  ;;  %v1307_v59 = vld [vmem:[#allocation9 + $0x148] sm:$0xff] }
 0x274   : > { %7824 = vmatpush3.bf16.msra.mxu0 %v7821_v57  ;;  %6640 = vmatprep.mubr.f32.mxu0 %v864_v60  ;;  %v1305_v57 = vld [vmem:[#allocation9 + $0x138] sm:$0xff]  ;;  %v7869_v60 = vpack.c.bf16 %v1307_v59, %v1306_v58  ;;  %v9868_v58 = vld [vmem:[#allocation2 + $0xae] sm:$0xff] }
 0x275   : > { %7826 = vmatprep.subr.bf16.mxu0 %v7825_v5  ;;  %v7865_v3 = vpack.c.bf16 %v1305_v57, %v1304_v56  ;;  %v1534_v56 = vld [vmem:[#allocation9 + $0x1d0] sm:$0xff]  ;;  %v1535_v57 = vld [vmem:[#allocation9 + $0x1d8] sm:$0xff] }
 0x276   : > { %v7905_v59 = vpack.c.bf16 %v1535_v57, %v1534_v56  ;;  %v1764_v56 = vld [vmem:[#allocation9 + $0x270] sm:$0xff]  ;;  %v1765_v57 = vld [vmem:[#allocation9 + $0x278] sm:$0xff] }
 0x277   : > { %6641 = vmatmul.mubr.f32.gmra.mrb[34].mxu0 %v865_v63  ;;  %v1310_v63 = vld [vmem:[#allocation9 + $0x160] sm:$0xff] }
 0x278   : > { %7828 = vmatpush3.bf16.msra.mxu0 %v7825_v5  ;;  %6643 = vmatprep.mubr.f32.mxu0 %v9803_v0  ;;  %v1308_v5 = vld [vmem:[#allocation9 + $0x150] sm:$0xff] }
 0x279   : > { %7830 = vmatprep.subr.bf16.mxu0 %v7829_v1  ;;  %v7873_v62 = vpack.c.bf16 %v1309_v61, %v1308_v5  ;;  %v1537_v5 = vld [vmem:[#allocation9 + $0x1e8] sm:$0xff]  ;;  %v9872_v61 = vld [vmem:[#allocation2 + $0xb6] sm:$0xff] }
 0x27b   : > { %6644 = vmatmul.mubr.f32.gmra.mrb[36].mxu0 %v9806_v6 }
 0x27c   : > { %7832 = vmatpush3.bf16.msra.mxu0 %v7829_v1  ;;  %6646 = vmatprep.mubr.f32.mxu0 %v9808_v7  ;;  %v1311_v1 = vld [vmem:[#allocation9 + $0x168] sm:$0xff] }
 0x27d   : > { %7834 = vmatprep.subr.bf16.mxu0 %v7833_v8  ;;  %v7877_v2 = vpack.c.bf16 %v1311_v1, %v1310_v63  ;;  %v1538_v1 = vld [vmem:[#allocation9 + $0x1f0] sm:$0xff] }
 0x27f   : > { %6647 = vmatmul.mubr.f32.gmra.mrb[38].mxu0 %v9812_v12 }
 0x280   : > { %7836 = vmatpush3.bf16.msra.mxu0 %v7833_v8  ;;  %6649 = vmatprep.mubr.f32.mxu0 %v9814_v13  ;;  %v1313_v8 = vld [vmem:[#allocation9 + $0x178] sm:$0xff] }
 0x281   : > { %7838 = vmatprep.subr.bf16.mxu0 %v7837_v14  ;;  %v7881_v10 = vpack.c.bf16 %v1313_v8, %v1312_v4  ;;  %v9878_v4 = vld [vmem:[#allocation2 + $0xce] sm:$0xff]  ;;  %v9880_v8 = vld [vmem:[#allocation2 + $0xde] sm:$0xff] }
 0x283   : > { %6650 = vmatmul.mubr.f32.gmra.mrb[40].mxu0 %v9818_v17 }
 0x284   : > { %7840 = vmatpush3.bf16.msra.mxu0 %v7837_v14  ;;  %6652 = vmatprep.mubr.f32.mxu0 %v9820_v18  ;;  %v1525_v14 = vld [vmem:[#allocation9 + $0x188] sm:$0xff] }
 0x285   : > { %7842 = vmatprep.subr.bf16.mxu0 %v7841_v19  ;;  %v7885_v16 = vpack.c.bf16 %v1525_v14, %v1524_v11  ;;  %v1750_v11 = vld [vmem:[#allocation9 + $0x200] sm:$0xff]  ;;  %v1751_v14 = vld [vmem:[#allocation9 + $0x208] sm:$0xff] }
 0x287   : > { %6653 = vmatmul.mubr.f32.gmra.mrb[42].mxu0 %v9824_v22 }
 0x288   : > { %7844 = vmatpush3.bf16.msra.mxu0 %v7841_v19  ;;  %6655 = vmatprep.mubr.f32.mxu0 %v9826_v23  ;;  %v1526_v19 = vld [vmem:[#allocation9 + $0x190] sm:$0xff] }
 0x289   : > { %7846 = vmatprep.subr.bf16.mxu0 %v7845_v24  ;;  %v7889_v25 = vpack.c.bf16 %v1527_v20, %v1526_v19  ;;  %v1752_v19 = vld [vmem:[#allocation9 + $0x210] sm:$0xff]  ;;  %v1753_v20 = vld [vmem:[#allocation9 + $0x218] sm:$0xff] }
 0x28b   : > { %6656 = vmatmul.mubr.f32.gmra.mrb[44].mxu0 %v9830_v27 }
 0x28c   : > { %7848 = vmatpush3.bf16.msra.mxu0 %v7845_v24  ;;  %6658 = vmatprep.mubr.f32.mxu0 %v9832_v28  ;;  %v1283_v24 = vld [vmem:[#allocation2 + $0x4e] sm:$0xff] }
 0x28d   : > { %7850 = vmatprep.subr.bf16.mxu0 %v7849_v29 }
 0x28f   : > { %6659 = vmatmul.mubr.f32.gmra.mrb[46].mxu0 %v9836_v34 }
 0x290   : > { %7852 = vmatpush3.bf16.msra.mxu0 %v7849_v29  ;;  %6693 = vmatprep.mubr.f32.mxu0 %v1055_v37  ;;  %v1529_v29 = vld [vmem:[#allocation9 + $0x1a8] sm:$0xff] }
 0x291   : > { %7854 = vmatprep.subr.bf16.mxu0 %v7853_v38  ;;  %v7893_v37 = vpack.c.bf16 %v1529_v29, %v1528_v26  ;;  %v1756_v29 = vld [vmem:[#allocation9 + $0x230] sm:$0xff] }
 0x293   : > { %6694 = vmatmul.mubr.f32.vlgmr.msra.gmra.mrb[32].mxu0 %v1056_v43  ;;  %v9856_v43 = vld [vmem:[#allocation2 + $0x7e] sm:$0xff] }
 0x294   : > { %7856 = vmatpush3.bf16.msra.mxu0 %v7853_v38  ;;  %6696 = vmatprep.mubr.f32.mxu0 %v1057_v44  ;;  %v1530_v38 = vld [vmem:[#allocation9 + $0x1b0] sm:$0xff] }
 0x295   : > { %7858 = vmatprep.subr.bf16.mxu0 %v7857_v47  ;;  %v7897_v44 = vpack.c.bf16 %v1531_v39, %v1530_v38  ;;  %v1759_v38 = vld [vmem:[#allocation9 + $0x248] sm:$0xff]  ;;  %v1761_v39 = vld [vmem:[#allocation9 + $0x258] sm:$0xff] }
 0x297   : > { %6697 = vmatmul.mubr.f32.gmra.mrb[34].mxu0 %v1058_v52  ;;  %v9862_v52 = vld [vmem:[#allocation2 + $0x96] sm:$0xff] }
 0x298   : > { %7860 = vmatpush3.bf16.msra.mxu0 %v7857_v47  ;;  %6699 = vmatprep.mubr.f32.mxu0 %v9728_v9  ;;  %v1532_v47 = vld [vmem:[#allocation9 + $0x1c0] sm:$0xff] }
 0x299   : > { %7862 = vmatprep.subr.bf16.mxu0 %v7861_v55 }
 0x29b   : > { %6700 = vmatmul.mubr.f32.gmra.mrb[36].mxu0 %v9731_v30 }
 0x29c   : > { %7864 = vmatpush3.bf16.msra.mxu0 %v7861_v55  ;;  %6702 = vmatprep.mubr.f32.mxu0 %v9733_v31  ;;  %v7901_v55 = vpack.c.bf16 %v1533_v48, %v1532_v47  ;;  %v1763_v47 = vld [vmem:[#allocation9 + $0x268] sm:$0xff]  ;;  %v9898_v48 = vld [vmem:[#allocation2 + $0xf2] sm:$0xff] }
 0x29d   : > { %7866 = vmatprep.subr.bf16.mxu0 %v7865_v3 }
 0x29f   : > { %6703 = vmatmul.mubr.f32.gmra.mrb[38].mxu0 %v9737_v35 }
 0x2a0   : > { %7868 = vmatpush3.bf16.msra.mxu0 %v7865_v3  ;;  %6705 = vmatprep.mubr.f32.mxu0 %v9739_v36  ;;  %v9866_v3 = vld [vmem:[#allocation2 + $0x9e] sm:$0xff] }
 0x2a1   : > { %7870 = vmatprep.subr.bf16.mxu0 %v7869_v60 }
 0x2a3   : > { %6706 = vmatmul.mubr.f32.gmra.mrb[40].mxu0 %v9743_v40 }
 0x2a4   : > { %7872 = vmatpush3.bf16.msra.mxu0 %v7869_v60  ;;  %6708 = vmatprep.mubr.f32.mxu0 %v9745_v41  ;;  %v1536_v60 = vld [vmem:[#allocation9 + $0x1e0] sm:$0xff] }
 0x2a5   : > { %7874 = vmatprep.subr.bf16.mxu0 %v7873_v62  ;;  %v7909_v63 = vpack.c.bf16 %v1537_v5, %v1536_v60  ;;  %v9904_v60 = vld [vmem:[#allocation2 + $0x10a] sm:$0xff]  ;;  %v7945_v5 = vpack.c.bf16 %v1765_v57, %v1764_v56  ;;  %v2207_v57 = vld [vmem:[#allocation9 + $0x320] sm:$0xff] }
 0x2a7   : > { %6709 = vmatmul.mubr.f32.gmra.mrb[42].mxu0 %v9749_v45 }
 0x2a8   : > { %7876 = vmatpush3.bf16.msra.mxu0 %v7873_v62  ;;  %6711 = vmatprep.mubr.f32.mxu0 %v9751_v46  ;;  %v9874_v62 = vld [vmem:[#allocation2 + $0xc6] sm:$0xff] }
 0x2a9   : > { %7878 = vmatprep.subr.bf16.mxu0 %v7877_v2 }
 0x2ab   : > { %6712 = vmatmul.mubr.f32.gmra.mrb[44].mxu0 %v9755_v50 }
 0x2ac   : > { %7880 = vmatpush3.bf16.msra.mxu0 %v7877_v2  ;;  %6714 = vmatprep.mubr.f32.mxu0 %v9757_v51  ;;  %v1539_v2 = vld [vmem:[#allocation9 + $0x1f8] sm:$0xff] }
 0x2ad   : > { %7882 = vmatprep.subr.bf16.mxu0 %v7881_v10 }
 0x2af   : > { %6715 = vmatmul.mubr.f32.gmra.mrb[46].mxu0 %v9761_v53 }
 0x2b0   : > { %7884 = vmatpush3.bf16.msra.mxu0 %v7881_v10  ;;  %6749 = vmatprep.mubr.f32.mxu0 %v1281_v15  ;;  %v7913_v10 = vpack.c.bf16 %v1539_v2, %v1538_v1  ;;  %v9884_v15 = vld [vmem:[#allocation2 + $0xe6] sm:$0xff]  ;;  %v9908_v2 = vld [vmem:[#allocation2 + $0x112] sm:$0xff] }
 0x2b1   : > { %7886 = vmatprep.subr.bf16.mxu0 %v7885_v16  ;;  %v1977_v1 = vld [vmem:[#allocation9 + $0x288] sm:$0xff] }
 0x2b3   : > { %6750 = vmatmul.mubr.f32.vlgmr.msra.gmra.mrb[32].mxu0 %v1282_v21  ;;  %v7921_v21 = vpack.c.bf16 %v1753_v20, %v1752_v19  ;;  %v1980_v19 = vld [vmem:[#allocation9 + $0x2a0] sm:$0xff]  ;;  %v1981_v20 = vld [vmem:[#allocation9 + $0x2a8] sm:$0xff] }
 0x2b4   : > { %7888 = vmatpush3.bf16.msra.mxu0 %v7885_v16  ;;  %6752 = vmatprep.mubr.f32.mxu0 %v1283_v24  ;;  %v7917_v16 = vpack.c.bf16 %v1751_v14, %v1750_v11  ;;  %v1754_v24 = vld [vmem:[#allocation9 + $0x220] sm:$0xff]  ;;  %v1978_v11 = vld [vmem:[#allocation9 + $0x290] sm:$0xff]  ;;  %v1979_v14 = vld [vmem:[#allocation9 + $0x298] sm:$0xff] }
 0x2b5   : > { %7890 = vmatprep.subr.bf16.mxu0 %v7889_v25 }
 0x2b7   : > { %6753 = vmatmul.mubr.f32.gmra.mrb[34].mxu0 %v1284_v32  ;;  %v1757_v32 = vld [vmem:[#allocation9 + $0x238] sm:$0xff] }
 0x2b8   : > { %7892 = vmatpush3.bf16.msra.mxu0 %v7889_v25  ;;  %6755 = vmatprep.mubr.f32.mxu0 %v9851_v33  ;;  %v1755_v25 = vld [vmem:[#allocation9 + $0x228] sm:$0xff] }
 0x2b9   : > { %7894 = vmatprep.subr.bf16.mxu0 %v7893_v37  ;;  %v7925_v26 = vpack.c.bf16 %v1755_v25, %v1754_v24  ;;  %v1982_v24 = vld [vmem:[#allocation9 + $0x2b0] sm:$0xff]  ;;  %v1983_v25 = vld [vmem:[#allocation9 + $0x2b8] sm:$0xff] }
 0x2bb   : > { %6756 = vmatmul.mubr.f32.gmra.mrb[36].mxu0 %v9854_v42 }
 0x2bc   : > { %7896 = vmatpush3.bf16.msra.mxu0 %v7893_v37  ;;  %6758 = vmatprep.mubr.f32.mxu0 %v9856_v43  ;;  %v1758_v37 = vld [vmem:[#allocation9 + $0x240] sm:$0xff] }
 0x2bd   : > { %7898 = vmatprep.subr.bf16.mxu0 %v7897_v44 }
 0x2bf   : > { %6759 = vmatmul.mubr.f32.gmra.mrb[38].mxu0 %v9860_v49 }
 0x2c0   : > { %7900 = vmatpush3.bf16.msra.mxu0 %v7897_v44  ;;  %6761 = vmatprep.mubr.f32.mxu0 %v9862_v52  ;;  %v1762_v44 = vld [vmem:[#allocation9 + $0x260] sm:$0xff] }
 0x2c1   : > { %7902 = vmatprep.subr.bf16.mxu0 %v7901_v55 }
 0x2c3   : > { %6762 = vmatmul.mubr.f32.gmra.mrb[40].mxu0 %v9866_v3 }
 0x2c4   : > { %7904 = vmatpush3.bf16.msra.mxu0 %v7901_v55  ;;  %6764 = vmatprep.mubr.f32.mxu0 %v9868_v58  ;;  %v7941_v55 = vpack.c.bf16 %v1763_v47, %v1762_v44  ;;  %v2957_v44 = vld [vmem:[#allocation11 + $0x90] sm:$0xff] }
 0x2c5   : > { %7906 = vmatprep.subr.bf16.mxu0 %v7905_v59 }
 0x2c7   : > { %6765 = vmatmul.mubr.f32.gmra.mrb[42].mxu0 %v9872_v61 }
 0x2c8   : > { %7908 = vmatpush3.bf16.msra.mxu0 %v7905_v59  ;;  %6767 = vmatprep.mubr.f32.mxu0 %v9874_v62  ;;  %v9902_v59 = vld [vmem:[#allocation2 + $0xfa] sm:$0xff] }
 0x2c9   : > { %7910 = vmatprep.subr.bf16.mxu0 %v7909_v63 }
 0x2cb   : > { %6768 = vmatmul.mubr.f32.gmra.mrb[44].mxu0 %v9878_v4 }
 0x2cc   : > { %7912 = vmatpush3.bf16.msra.mxu0 %v7909_v63  ;;  %6770 = vmatprep.mubr.f32.mxu0 %v9880_v8  ;;  %v1976_v63 = vld [vmem:[#allocation9 + $0x280] sm:$0xff] }
 0x2cd   : > { %7914 = vmatprep.subr.bf16.mxu0 %v7913_v10 }
 0x2cf   : > { %6771 = vmatmul.mubr.f32.gmra.mrb[46].mxu0 %v9884_v15 }
 0x2d0   : > { %7916 = vmatpush3.bf16.msra.mxu0 %v7913_v10  ;;  %6805 = vmatprep.mubr.f32.mxu0 %v9803_v0  ;;  %v7929_v0 = vpack.c.bf16 %v1757_v32, %v1756_v29  ;;  %v7949_v10 = vpack.c.bf16 %v1977_v1, %v1976_v63  ;;  %v1985_v29 = vld [vmem:[#allocation9 + $0x2c8] sm:$0xff]  ;;  %v1987_v32 = vld [vmem:[#allocation9 + $0x2d8] sm:$0xff]  ;;  %v2959_v1 = vld [vmem:[#allocation11 + $0xa0] sm:$0xff] }
 0x2d1   : > { %7918 = vmatprep.subr.bf16.mxu0 %v7917_v16  ;;  %v2208_v63 = vld [vmem:[#allocation9 + $0x328] sm:$0xff] }
 0x2d3   : > { %6806 = vmatmul.mubr.f32.vlgmr.msra.gmra.mrb[32].mxu0 %v9806_v6  ;;  %v7933_v6 = vpack.c.bf16 %v1759_v38, %v1758_v37  ;;  %v1991_v37 = vld [vmem:[#allocation9 + $0x2f8] sm:$0xff] }
 0x2d4   : > { %7920 = vmatpush3.bf16.msra.mxu0 %v7917_v16  ;;  %6808 = vmatprep.mubr.f32.mxu0 %v9808_v7  ;;  %v1760_v7 = vld [vmem:[#allocation9 + $0x250] sm:$0xff]  ;;  %v7953_v16 = vpack.c.bf16 %v1979_v14, %v1978_v11  ;;  %v7989_v11 = vpack.c.bf16 %v2208_v63, %v2207_v57 }
 0x2d5   : > { %7922 = vmatprep.subr.bf16.mxu0 %v7921_v21  ;;  %v2209_v14 = vld [vmem:[#allocation9 + $0x330] sm:$0xff] }
 0x2d6   : > { %v2431_v63 = vld [vmem:[#allocation9 + $0x390] sm:$0xff] }
 0x2d7   : > { %6809 = vmatmul.mubr.f32.gmra.mrb[34].mxu0 %v9812_v12  ;;  %v7937_v12 = vpack.c.bf16 %v1761_v39, %v1760_v7  ;;  %v2205_v7 = vld [vmem:[#allocation9 + $0x310] sm:$0xff]  ;;  %v2206_v39 = vld [vmem:[#allocation9 + $0x318] sm:$0xff] }
 0x2d8   : > { %7924 = vmatpush3.bf16.msra.mxu0 %v7921_v21  ;;  %6811 = vmatprep.mubr.f32.mxu0 %v9814_v13  ;;  %v7957_v21 = vpack.c.bf16 %v1981_v20, %v1980_v19  ;;  %v7985_v56 = vpack.c.bf16 %v2206_v39, %v2205_v7  ;;  %v2961_v19 = vld [vmem:[#allocation11 + $0xb0] sm:$0xff]  ;;  %v2962_v20 = vld [vmem:[#allocation11 + $0xb8] sm:$0xff] }
 0x2d9   : > { %7926 = vmatprep.subr.bf16.mxu0 %v7925_v26  ;;  %v9952_v7 = vld [vmem:[#allocation2 + $0xfe] sm:$0xff]  ;;  %v9954_v39 = vld [vmem:[#allocation2 + $0x10e] sm:$0xff] }
 0x2db   : > { %6812 = vmatmul.mubr.f32.gmra.mrb[36].mxu0 %v9818_v17 }
 0x2dc   : > { %7928 = vmatpush3.bf16.msra.mxu0 %v7925_v26  ;;  %6814 = vmatprep.mubr.f32.mxu0 %v9820_v18  ;;  %v1984_v26 = vld [vmem:[#allocation9 + $0x2c0] sm:$0xff] }
 0x2dd   : > { %7930 = vmatprep.subr.bf16.mxu0 %v7929_v0 }
 0x2df   : > { %6815 = vmatmul.mubr.f32.gmra.mrb[38].mxu0 %v9824_v22 }
 0x2e0   : > { %7932 = vmatpush3.bf16.msra.mxu0 %v7929_v0  ;;  %6817 = vmatprep.mubr.f32.mxu0 %v9826_v23  ;;  %v1989_v0 = vld [vmem:[#allocation9 + $0x2e8] sm:$0xff] }
 0x2e1   : > { %7934 = vmatprep.subr.bf16.mxu0 %v7933_v6 }
 0x2e3   : > { %6818 = vmatmul.mubr.f32.gmra.mrb[40].mxu0 %v9830_v27 }
 0x2e4   : > { %7936 = vmatpush3.bf16.msra.mxu0 %v7933_v6  ;;  %6820 = vmatprep.mubr.f32.mxu0 %v9832_v28  ;;  %v2203_v6 = vld [vmem:[#allocation9 + $0x300] sm:$0xff] }
 0x2e5   : > { %7938 = vmatprep.subr.bf16.mxu0 %v7937_v12 }
 0x2e7   : > { %6821 = vmatmul.mubr.f32.gmra.mrb[42].mxu0 %v9836_v34 }
 0x2e8   : > { %7940 = vmatpush3.bf16.msra.mxu0 %v7937_v12  ;;  %6823 = vmatprep.mubr.f32.mxu0 %v9898_v48  ;;  %v2956_v12 = vld [vmem:[#allocation11 + $0x88] sm:$0xff] }
 0x2e9   : > { %7942 = vmatprep.subr.bf16.mxu0 %v7941_v55 }
 0x2eb   : > { %6824 = vmatmul.mubr.f32.gmra.mrb[44].mxu0 %v9902_v59 }
 0x2ec   : > { %7944 = vmatpush3.bf16.msra.mxu0 %v7941_v55  ;;  %6826 = vmatprep.mubr.f32.mxu0 %v9904_v60  ;;  %v2958_v55 = vld [vmem:[#allocation11 + $0x98] sm:$0xff] }
 0x2ed   : > { %7946 = vmatprep.subr.bf16.mxu0 %v7945_v5 }
 0x2ef   : > { %6827 = vmatmul.mubr.f32.gmra.mrb[46].mxu0 %v9908_v2 }
 0x2f0   : > { %7948 = vmatpush3.bf16.msra.mxu0 %v7945_v5  ;;  %6861 = vmatprep.mubr.f32.mxu0 %v9728_v9  ;;  %v7961_v9 = vpack.c.bf16 %v1983_v25, %v1982_v24  ;;  %v8081_v5 = vpack.c.bf16 %v2958_v55, %v2957_v44  ;;  %v8089_v24 = vpack.c.bf16 %v2962_v20, %v2961_v19  ;;  %v2963_v25 = vld [vmem:[#allocation11 + $0xc0] sm:$0xff] }
 0x2f1   : > { %7950 = vmatprep.subr.bf16.mxu0 %v7949_v10  ;;  %v2429_v44 = vld [vmem:[#allocation9 + $0x380] sm:$0xff] }
 0x2f3   : > { %6862 = vmatmul.mubr.f32.vlgmr.msra.gmra.mrb[32].mxu0 %v9731_v30  ;;  %v7965_v30 = vpack.c.bf16 %v1985_v29, %v1984_v26  ;;  %v2213_v26 = vld [vmem:[#allocation9 + $0x350] sm:$0xff] }
 0x2f4   : > { %7952 = vmatpush3.bf16.msra.mxu0 %v7949_v10  ;;  %6864 = vmatprep.mubr.f32.mxu0 %v9733_v31  ;;  %v1986_v31 = vld [vmem:[#allocation9 + $0x2d0] sm:$0xff]  ;;  %v2960_v10 = vld [vmem:[#allocation11 + $0xa8] sm:$0xff] }
 0x2f5   : > { %7954 = vmatprep.subr.bf16.mxu0 %v7953_v16 }
 0x2f7   : > { %6865 = vmatmul.mubr.f32.gmra.mrb[34].mxu0 %v9737_v35  ;;  %v7969_v35 = vpack.c.bf16 %v1987_v32, %v1986_v31  ;;  %v2965_v31 = vld [vmem:[#allocation11 + $0xd0] sm:$0xff]  ;;  %v2966_v32 = vld [vmem:[#allocation11 + $0xd8] sm:$0xff] }
 0x2f8   : > { %7956 = vmatpush3.bf16.msra.mxu0 %v7953_v16  ;;  %6867 = vmatprep.mubr.f32.mxu0 %v9739_v36  ;;  %v1988_v36 = vld [vmem:[#allocation9 + $0x2e0] sm:$0xff]  ;;  %v2210_v16 = vld [vmem:[#allocation9 + $0x338] sm:$0xff] }
 0x2f9   : > { %7958 = vmatprep.subr.bf16.mxu0 %v7957_v21 }
 0x2fb   : > { %6868 = vmatmul.mubr.f32.gmra.mrb[36].mxu0 %v9743_v40  ;;  %v7973_v40 = vpack.c.bf16 %v1989_v0, %v1988_v36  ;;  %v8097_v36 = vpack.c.bf16 %v2966_v32, %v2965_v31  ;;  %v2215_v0 = vld [vmem:[#allocation9 + $0x360] sm:$0xff]  ;;  %v2442_v32 = vld [vmem:[#allocation9 + $0x3e8] sm:$0xff] }
 0x2fc   : > { %7960 = vmatpush3.bf16.msra.mxu0 %v7957_v21  ;;  %6870 = vmatprep.mubr.f32.mxu0 %v9745_v41  ;;  %v1990_v41 = vld [vmem:[#allocation9 + $0x2f0] sm:$0xff]  ;;  %v2211_v21 = vld [vmem:[#allocation9 + $0x340] sm:$0xff] }
 0x2fd   : > { %7962 = vmatprep.subr.bf16.mxu0 %v7961_v9  ;;  %v7977_v38 = vpack.c.bf16 %v1991_v37, %v1990_v41  ;;  %v9944_v41 = vld [vmem:[#allocation2 + $0xf6] sm:$0xff] }
 0x2ff   : > { %6871 = vmatmul.mubr.f32.gmra.mrb[38].mxu0 %v9749_v45  ;;  %v9924_v45 = vld [vmem:[#allocation2 + $0xfc] sm:$0xff] }
 0x300   : > { %7964 = vmatpush3.bf16.msra.mxu0 %v7961_v9  ;;  %6873 = vmatprep.mubr.f32.mxu0 %v9751_v46  ;;  %v9926_v46 = vld [vmem:[#allocation2 + $0x10c] sm:$0xff] }
 0x301   : > { %7966 = vmatprep.subr.bf16.mxu0 %v7965_v30  ;;  %v2964_v9 = vld [vmem:[#allocation11 + $0xc8] sm:$0xff] }
 0x302   : > { %v8093_v29 = vpack.c.bf16 %v2964_v9, %v2963_v25  ;;  %v2438_v9 = vld [vmem:[#allocation9 + $0x3c8] sm:$0xff] }
 0x303   : > { %6874 = vmatmul.mubr.f32.gmra.mrb[40].mxu0 %v9755_v50  ;;  %v2204_v50 = vld [vmem:[#allocation9 + $0x308] sm:$0xff] }
 0x304   : > { %7968 = vmatpush3.bf16.msra.mxu0 %v7965_v30  ;;  %6876 = vmatprep.mubr.f32.mxu0 %v9757_v51  ;;  %v9930_v51 = vld [vmem:[#allocation2 + $0x114] sm:$0xff] }
 0x305   : > { %7970 = vmatprep.subr.bf16.mxu0 %v7969_v35  ;;  %v2214_v30 = vld [vmem:[#allocation9 + $0x358] sm:$0xff] }
 0x307   : > { %6877 = vmatmul.mubr.f32.gmra.mrb[42].mxu0 %v9761_v53  ;;  %v7981_v53 = vpack.c.bf16 %v2204_v50, %v2203_v6  ;;  %v2217_v6 = vld [vmem:[#allocation9 + $0x370] sm:$0xff]  ;;  %v2218_v50 = vld [vmem:[#allocation9 + $0x378] sm:$0xff] }
 0x308   : > { %7972 = vmatpush3.bf16.msra.mxu0 %v7969_v35  ;;  %6879 = vmatprep.mubr.f32.mxu0 %v9763_v54  ;;  %v2955_v54 = vld [vmem:[#allocation11 + $0x80] sm:$0xff]  ;;  %v8001_v35 = vpack.c.bf16 %v2214_v30, %v2213_v26 }
 0x309   : > { %7974 = vmatprep.subr.bf16.mxu0 %v7973_v40  ;;  %v8077_v47 = vpack.c.bf16 %v2956_v12, %v2955_v54  ;;  %v8009_v54 = vpack.c.bf16 %v2218_v50, %v2217_v6  ;;  %v2655_v6 = vld [vmem:[#allocation9 + $0x400] sm:$0xff]  ;;  %v2656_v50 = vld [vmem:[#allocation9 + $0x408] sm:$0xff] }
 0x30b   : > { %6880 = vmatmul.mubr.f32.gmra.mrb[44].mxu0 %v9924_v45  ;;  %8078 = vmatprep.subr.bf16.mxu1 %v8077_v47 }
 0x30c   : > { %7976 = vmatpush3.bf16.msra.mxu0 %v7973_v40  ;;  %6882 = vmatprep.mubr.f32.mxu0 %v9926_v46  ;;  %v2216_v40 = vld [vmem:[#allocation9 + $0x368] sm:$0xff] }
 0x30d   : > { %7978 = vmatprep.subr.bf16.mxu0 %v7977_v38  ;;  %8080 = vmatpush3.bf16.msra.mxu1 %v8077_v47  ;;  %v8005_v37 = vpack.c.bf16 %v2216_v40, %v2215_v0  ;;  %v2430_v47 = vld [vmem:[#allocation9 + $0x388] sm:$0xff]  ;;  %v2444_v0 = vld [vmem:[#allocation9 + $0x3f8] sm:$0xff] }
 0x30e   : > { %8082 = vmatprep.subr.bf16.mxu1 %v8081_v5  ;;  %v8013_v57 = vpack.c.bf16 %v2430_v47, %v2429_v44  ;;  %v2200_v40 = vld [vmem:[#allocation2 + $0x13a] sm:$0xff]  ;;  %v2657_v44 = vld [vmem:[#allocation9 + $0x410] sm:$0xff] }
 0x30f   : > { %6883 = vmatmul.mubr.f32.gmra.mrb[46].mxu0 %v9930_v51  ;;  %v2658_v47 = vld [vmem:[#allocation9 + $0x418] sm:$0xff] }
 0x310   : > { %7980 = vmatpush3.bf16.msra.mxu0 %v7977_v38  ;;  %6917 = vmatprep.mubr.f32.mxu0 %v9851_v33  ;;  %v8085_v33 = vpack.c.bf16 %v2960_v10, %v2959_v1  ;;  %v2432_v1 = vld [vmem:[#allocation9 + $0x398] sm:$0xff] }
 0x311   : > { %7982 = vmatprep.subr.bf16.mxu0 %v7981_v53  ;;  %8084 = vmatpush3.bf16.msra.mxu1 %v8081_v5 }
 0x312   : > { %8086 = vmatprep.subr.bf16.mxu1 %v8085_v33 }
 0x313   : > { %6918 = vmatmul.mubr.f32.vlgmr.msra.gmra.mrb[32].mxu0 %v9854_v42  ;;  %v7993_v42 = vpack.c.bf16 %v2210_v16, %v2209_v14  ;;  %v2434_v16 = vld [vmem:[#allocation9 + $0x3a8] sm:$0xff] }
 0x314   : > { %7984 = vmatpush3.bf16.msra.mxu0 %v7981_v53  ;;  %6920 = vmatprep.mubr.f32.mxu0 %v9856_v43  ;;  %v2212_v43 = vld [vmem:[#allocation9 + $0x348] sm:$0xff] }
 0x315   : > { %7986 = vmatprep.subr.bf16.mxu0 %v7985_v56  ;;  %8088 = vmatpush3.bf16.msra.mxu1 %v8085_v33  ;;  %v2433_v33 = vld [vmem:[#allocation9 + $0x3a0] sm:$0xff] }
 0x316   : > { %8090 = vmatprep.subr.bf16.mxu1 %v8089_v24  ;;  %v8021_v20 = vpack.c.bf16 %v2434_v16, %v2433_v33  ;;  %v10010_v33 = vld [vmem:[#allocation2 + $0xb4] sm:$0xff]  ;;  %v2416_v16 = vld [vmem:[#allocation2 + $0xc4] sm:$0xff] }
 0x317   : > { %6921 = vmatmul.mubr.f32.gmra.mrb[34].mxu0 %v9860_v49  ;;  %v7997_v49 = vpack.c.bf16 %v2212_v43, %v2211_v21  ;;  %v2435_v21 = vld [vmem:[#allocation9 + $0x3b0] sm:$0xff] }
 0x318   : > { %7988 = vmatpush3.bf16.msra.mxu0 %v7985_v56  ;;  %6923 = vmatprep.mubr.f32.mxu0 %v9862_v52  ;;  %v9962_v56 = vld [vmem:[#allocation2 + $0x116] sm:$0xff] }
 0x319   : > { %7990 = vmatprep.subr.bf16.mxu0 %v7989_v11  ;;  %8092 = vmatpush3.bf16.msra.mxu1 %v8089_v24  ;;  %v2436_v24 = vld [vmem:[#allocation9 + $0x3b8] sm:$0xff] }
 0x31a   : > { %8094 = vmatprep.subr.bf16.mxu1 %v8093_v29  ;;  %v8025_v43 = vpack.c.bf16 %v2436_v24, %v2435_v21  ;;  %v2661_v21 = vld [vmem:[#allocation9 + $0x430] sm:$0xff]  ;;  %v2662_v24 = vld [vmem:[#allocation9 + $0x438] sm:$0xff] }
 0x31b   : > { %6924 = vmatmul.mubr.f32.gmra.mrb[36].mxu0 %v9866_v3 }
 0x31c   : > { %7992 = vmatpush3.bf16.msra.mxu0 %v7989_v11  ;;  %6926 = vmatprep.mubr.f32.mxu0 %v9868_v58  ;;  %v8017_v11 = vpack.c.bf16 %v2432_v1, %v2431_v63  ;;  %v8049_v63 = vpack.c.bf16 %v2658_v47, %v2657_v44  ;;  %v2659_v1 = vld [vmem:[#allocation9 + $0x420] sm:$0xff] }
 0x31d   : > { %7994 = vmatprep.subr.bf16.mxu0 %v7993_v42  ;;  %8096 = vmatpush3.bf16.msra.mxu1 %v8093_v29  ;;  %v2440_v29 = vld [vmem:[#allocation9 + $0x3d8] sm:$0xff]  ;;  %v10030_v47 = vld [vmem:[#allocation15 + $0x1] ss:$0 sm:$0xff] }
 0x31e   : > { %8098 = vmatprep.subr.bf16.mxu1 %v8097_v36 }
 0x31f   : > { %6927 = vmatmul.mubr.f32.gmra.mrb[38].mxu0 %v9872_v61 }
 0x320   : > { %7996 = vmatpush3.bf16.msra.mxu0 %v7993_v42  ;;  %6929 = vmatprep.mubr.f32.mxu0 %v9874_v62 }
 0x321   : > { %7998 = vmatprep.subr.bf16.mxu0 %v7997_v49  ;;  %8100 = vmatpush3.bf16.msra.mxu1 %v8097_v36 }
 0x323   : > { %6930 = vmatmul.mubr.f32.gmra.mrb[40].mxu0 %v9878_v4 }
 0x324   : > { %8000 = vmatpush3.bf16.msra.mxu0 %v7997_v49  ;;  %6932 = vmatprep.mubr.f32.mxu0 %v9880_v8 }
 0x325   : > { %8002 = vmatprep.subr.bf16.mxu0 %v8001_v35 }
 0x326   : > { %v9946_v38 = vpop.f32.mrb[16].mxu0 }
 0x327   : > { %v9948_v53 = vpop.f32.mrb[17].mxu0  ;;  %6933 = vmatmul.mubr.f32.gmra.mrb[42].mxu0 %v9884_v15 }
 0x328   : > { %8004 = vmatpush3.bf16.msra.mxu0 %v8001_v35  ;;  %6935 = vmatprep.mubr.f32.mxu0 %v9944_v41  ;;  %v2198_v35 = vld [vmem:[#allocation2 + $0x122] sm:$0xff] }
 0x329   : > { %8006 = vmatprep.subr.bf16.mxu0 %v8005_v37 }
 0x32a   : > { %v9956_v12 = vpop.f32.mrb[18].mxu0 }
 0x32b   : > { %v9958_v55 = vpop.f32.mrb[19].mxu0  ;;  %6936 = vmatmul.mubr.f32.gmra.mrb[44].mxu0 %v9952_v7 }
 0x32c   : > { %8008 = vmatpush3.bf16.msra.mxu0 %v8005_v37  ;;  %6938 = vmatprep.mubr.f32.mxu0 %v9954_v39 }
 0x32d   : > { %8010 = vmatprep.subr.bf16.mxu0 %v8009_v54 }
 0x32e   : > { %v9964_v5 = vpop.f32.mrb[20].mxu0 }
 0x32f   : > { %v9966_v10 = vpop.f32.mrb[21].mxu0  ;;  %6939 = vmatmul.mubr.f32.gmra.mrb[46].mxu0 %v9962_v56 }
 0x330   : > { %8012 = vmatpush3.bf16.msra.mxu0 %v8009_v54  ;;  %6973 = vmatprep.mubr.f32.mxu0 %v9814_v13  ;;  %v8045_v54 = vpack.c.bf16 %v2656_v50, %v2655_v6  ;;  %v2670_v6 = vld [vmem:[#allocation9 + $0x478] sm:$0xff]  ;;  %v2425_v50 = vld [vmem:[#allocation2 + $0x12c] sm:$0xff] }
 0x331   : > { %8014 = vmatprep.subr.bf16.mxu0 %v8013_v57 }
 0x332   : > { %v9970_v14 = vpop.f32.mrb[22].mxu0 }
 0x333   : > { %v9972_v19 = vpop.f32.mrb[23].mxu0  ;;  %6974 = vmatmul.mubr.f32.vlgmr.msra.gmra.mrb[32].mxu0 %v9818_v17  ;;  %v2437_v17 = vld [vmem:[#allocation9 + $0x3c0] sm:$0xff] }
 0x334   : > { %8016 = vmatpush3.bf16.msra.mxu0 %v8013_v57  ;;  %6976 = vmatprep.mubr.f32.mxu0 %v9820_v18  ;;  %v8029_v49 = vpack.c.bf16 %v2438_v9, %v2437_v17  ;;  %v10006_v57 = vld [vmem:[#allocation2 + $0xac] sm:$0xff]  ;;  %v2418_v17 = vld [vmem:[#allocation2 + $0xdc] sm:$0xff]  ;;  %v8057_v9 = vpack.c.bf16 %v2662_v24, %v2661_v21 }
 0x335   : > { %8018 = vmatprep.subr.bf16.mxu0 %v8017_v11  ;;  %v3167_v24 = vld [vmem:[#allocation9 + $0x490] sm:$0xff] }
 0x336   : > { %v9976_v42 = vpop.f32.mrb[24].mxu0 }
 0x337   : > { %v9978_v13 = vpop.f32.mrb[25].mxu0  ;;  %6977 = vmatmul.mubr.f32.gmra.mrb[34].mxu0 %v9824_v22  ;;  %v2439_v22 = vld [vmem:[#allocation9 + $0x3d0] sm:$0xff] }
 0x338   : > { %8020 = vmatpush3.bf16.msra.mxu0 %v8017_v11  ;;  %6979 = vmatprep.mubr.f32.mxu0 %v9826_v23  ;;  %v8033_v30 = vpack.c.bf16 %v2440_v29, %v2439_v22  ;;  %v2660_v11 = vld [vmem:[#allocation9 + $0x428] sm:$0xff] }
 0x339   : > { %8022 = vmatprep.subr.bf16.mxu0 %v8021_v20  ;;  %v2664_v22 = vld [vmem:[#allocation9 + $0x448] sm:$0xff] }
 0x33a   : > { %v9982_v25 = vpop.f32.mrb[26].mxu0  ;;  %v2419_v29 = vld [vmem:[#allocation2 + $0xe4] sm:$0xff] }
 0x33b   : > { %v9984_v18 = vpop.f32.mrb[27].mxu0  ;;  %6980 = vmatmul.mubr.f32.gmra.mrb[36].mxu0 %v9830_v27  ;;  %v2441_v27 = vld [vmem:[#allocation9 + $0x3e0] sm:$0xff] }
 0x33c   : > { %8024 = vmatpush3.bf16.msra.mxu0 %v8021_v20  ;;  %6982 = vmatprep.mubr.f32.mxu0 %v9832_v28  ;;  %v8037_v36 = vpack.c.bf16 %v2442_v32, %v2441_v27  ;;  %v8053_v20 = vpack.c.bf16 %v2660_v11, %v2659_v1  ;;  %v2665_v32 = vld [vmem:[#allocation9 + $0x450] sm:$0xff] }
 0x33d   : > { %8026 = vmatprep.subr.bf16.mxu0 %v8025_v43 }
 0x33e   : > { %v9988_v26 = vpop.f32.mrb[28].mxu0 }
 0x33f   : > { %v9990_v23 = vpop.f32.mrb[29].mxu0  ;;  %6983 = vmatmul.mubr.f32.gmra.mrb[38].mxu0 %v9836_v34  ;;  %v2443_v34 = vld [vmem:[#allocation9 + $0x3f0] sm:$0xff] }
 0x340   : > { %8028 = vmatpush3.bf16.msra.mxu0 %v8025_v43  ;;  %6985 = vmatprep.mubr.f32.mxu0 %v9898_v48  ;;  %v2199_v48 = vld [vmem:[#allocation2 + $0x12a] sm:$0xff]  ;;  %v8041_v37 = vpack.c.bf16 %v2444_v0, %v2443_v34  ;;  %v2667_v34 = vld [vmem:[#allocation9 + $0x460] sm:$0xff] }
 0x341   : > { %8030 = vmatprep.subr.bf16.mxu0 %v8029_v49  ;;  %v2417_v43 = vld [vmem:[#allocation2 + $0xcc] sm:$0xff] }
 0x342   : > { %v9994_v31 = vpop.f32.mrb[30].mxu0  ;;  %v2668_v0 = vld [vmem:[#allocation9 + $0x468] sm:$0xff] }
 0x343   : > { %v9996_v28 = vpop.f32.mrb[31].mxu0  ;;  %6986 = vmatmul.mubr.f32.gmra.mrb[40].mxu0 %v9902_v59  ;;  %v2201_v59 = vld [vmem:[#allocation2 + $0x142] sm:$0xff] }
 0x344   : > { %8032 = vmatpush3.bf16.msra.mxu0 %v8029_v49  ;;  %6988 = vmatprep.mubr.f32.mxu0 %v9904_v60  ;;  %v10001_v60 = vld [vmem:[#allocation2 + $0x94] sm:$0xff]  ;;  %v2663_v49 = vld [vmem:[#allocation9 + $0x440] sm:$0xff] }
 0x345   : > { %8034 = vmatprep.subr.bf16.mxu0 %v8033_v30  ;;  %v8061_v27 = vpack.c.bf16 %v2664_v22, %v2663_v49 }
 0x347   : > { %6989 = vmatmul.mubr.f32.gmra.mrb[42].mxu0 %v9908_v2  ;;  %v10004_v2 = vld [vmem:[#allocation2 + $0x9c] sm:$0xff] }
 0x348   : > { %8036 = vmatpush3.bf16.msra.mxu0 %v8033_v30  ;;  %6991 = vmatprep.mubr.f32.mxu0 %v2198_v35  ;;  %v2420_v30 = vld [vmem:[#allocation2 + $0xf4] sm:$0xff] }
 0x349   : > { %8038 = vmatprep.subr.bf16.mxu0 %v8037_v36  ;;  %v2666_v35 = vld [vmem:[#allocation9 + $0x458] sm:$0xff] }
 0x34b   : > { %6992 = vmatmul.mubr.f32.gmra.mrb[44].mxu0 %v2199_v48  ;;  %v2424_v48 = vld [vmem:[#allocation2 + $0x124] sm:$0xff] }
 0x34c   : > { %8040 = vmatpush3.bf16.msra.mxu0 %v8037_v36  ;;  %6994 = vmatprep.mubr.f32.mxu0 %v2200_v40  ;;  %v8065_v36 = vpack.c.bf16 %v2666_v35, %v2665_v32  ;;  %v8069_v40 = vpack.c.bf16 %v2668_v0, %v2667_v34  ;;  %v3170_v34 = vld [vmem:[#allocation9 + $0x4a8] sm:$0xff] }
 0x34d   : > { %8042 = vmatprep.subr.bf16.mxu0 %v8041_v37 }
 0x34f   : > { %6995 = vmatmul.mubr.f32.gmra.mrb[46].mxu0 %v2201_v59  ;;  %v2426_v59 = vld [vmem:[#allocation2 + $0x13c] sm:$0xff] }
 0x350   : > { %8044 = vmatpush3.bf16.msra.mxu0 %v8041_v37  ;;  %7029 = vmatprep.mubr.f32.mxu0 %v10001_v60  ;;  %v2669_v37 = vld [vmem:[#allocation9 + $0x470] sm:$0xff] }
 0x351   : > { %8046 = vmatprep.subr.bf16.mxu0 %v8045_v54 }
 0x353   : > { %7030 = vmatmul.mubr.f32.vlgmr.msra.gmra.mrb[32].mxu0 %v10004_v2 }
 0x354   : > { %8048 = vmatpush3.bf16.msra.mxu0 %v8045_v54  ;;  %7032 = vmatprep.mubr.f32.mxu0 %v10006_v57  ;;  %v8073_v54 = vpack.c.bf16 %v2670_v6, %v2669_v37 }
 0x355   : > { %8050 = vmatprep.subr.bf16.mxu0 %v8049_v63 }
 0x357   : > { %7033 = vmatmul.mubr.f32.gmra.mrb[34].mxu0 %v10010_v33 }
 0x358   : > { %8052 = vmatpush3.bf16.msra.mxu0 %v8049_v63  ;;  %7035 = vmatprep.mubr.f32.mxu0 %v2416_v16 }
 0x359   : > { %8054 = vmatprep.subr.bf16.mxu0 %v8053_v20 }
 0x35b   : > { %7036 = vmatmul.mubr.f32.gmra.mrb[36].mxu0 %v2417_v43  ;;  %v3168_v43 = vld [vmem:[#allocation9 + $0x498] sm:$0xff] }
 0x35c   : > { %8056 = vmatpush3.bf16.msra.mxu0 %v8053_v20  ;;  %7038 = vmatprep.mubr.f32.mxu0 %v2418_v17 }
 0x35d   : > { %8058 = vmatprep.subr.bf16.mxu0 %v8057_v9 }
 0x35f   : > { %7039 = vmatmul.mubr.f32.gmra.mrb[38].mxu0 %v2419_v29 }
 0x360   : > { %8060 = vmatpush3.bf16.msra.mxu0 %v8057_v9  ;;  %7041 = vmatprep.mubr.f32.mxu0 %v2420_v30 }
 0x361   : > { %8062 = vmatprep.subr.bf16.mxu0 %v8061_v27 }
 0x363   : > { %7042 = vmatmul.mubr.f32.gmra.mrb[40].mxu0 %v9924_v45  ;;  %v2427_v45 = vld [vmem:[#allocation2 + $0x144] sm:$0xff] }
 0x364   : > { %8064 = vmatpush3.bf16.msra.mxu0 %v8061_v27  ;;  %7044 = vmatprep.mubr.f32.mxu0 %v9926_v46  ;;  %v2970_v46 = vld [vmem:[#allocation11 + $0xf8] sm:$0xff]  ;;  %v8113_v27 = vpack.c.bf16 %v3168_v43, %v3167_v24 }
 0x365   : > { %8066 = vmatprep.subr.bf16.mxu0 %v8065_v36 }
 0x367   : > { %7045 = vmatmul.mubr.f32.gmra.mrb[42].mxu0 %v9930_v51 }
 0x368   : > { %8068 = vmatpush3.bf16.msra.mxu0 %v8065_v36  ;;  %7047 = vmatprep.mubr.f32.mxu0 %v2424_v48  ;;  %v3169_v36 = vld [vmem:[#allocation9 + $0x4a0] sm:$0xff] }
 0x369   : > { %8070 = vmatprep.subr.bf16.mxu0 %v8069_v40 }
 0x36b   : > { %7048 = vmatmul.mubr.f32.gmra.mrb[44].mxu0 %v2425_v50 }
 0x36c   : > { %8072 = vmatpush3.bf16.msra.mxu0 %v8069_v40  ;;  %7050 = vmatprep.mubr.f32.mxu0 %v2426_v59  ;;  %v8117_v59 = vpack.c.bf16 %v3170_v34, %v3169_v36 }
 0x36d   : > { %8074 = vmatprep.subr.bf16.mxu0 %v8073_v54 }
 0x36f   : > { %7051 = vmatmul.mubr.f32.gmra.mrb[46].mxu0 %v2427_v45 }
 0x370   : > { %8076 = vmatpush3.bf16.msra.mxu0 %v8073_v54  ;;  %7085 = vmatprep.mubr.f32.mxu0 %v9862_v52  ;;  %v2650_v52 = vld [vmem:[#allocation2 + $0x126] sm:$0xff] }
 0x373   : > { %7086 = vmatmul.mubr.f32.vlgmr.msra.gmra.mrb[32].mxu0 %v9866_v3  ;;  %v2651_v3 = vld [vmem:[#allocation2 + $0x12e] sm:$0xff] }
 0x374   : > { %7088 = vmatprep.mubr.f32.mxu0 %v9868_v58  ;;  %v2652_v58 = vld [vmem:[#allocation2 + $0x13e] sm:$0xff] }
 0x377   : > { %7089 = vmatmul.mubr.f32.gmra.mrb[34].mxu0 %v9872_v61  ;;  %v2653_v61 = vld [vmem:[#allocation2 + $0x146] sm:$0xff] }
 0x378   : > { %7091 = vmatprep.mubr.f32.mxu0 %v9874_v62  ;;  %v2967_v62 = vld [vmem:[#allocation11 + $0xe0] sm:$0xff] }
 0x37b   : > { %7092 = vmatmul.mubr.f32.gmra.mrb[36].mxu0 %v9878_v4  ;;  %v2968_v4 = vld [vmem:[#allocation11 + $0xe8] sm:$0xff] }
 0x37c   : > { %7094 = vmatprep.mubr.f32.mxu0 %v9880_v8  ;;  %v8101_v8 = vpack.c.bf16 %v2968_v4, %v2967_v62 }
 0x37e   : > { %8102 = vmatprep.subr.bf16.mxu1 %v8101_v8 }
 0x37f   : > { %7095 = vmatmul.mubr.f32.gmra.mrb[38].mxu0 %v9884_v15  ;;  %8104 = vmatpush3.bf16.msra.mxu1 %v8101_v8  ;;  %v2969_v15 = vld [vmem:[#allocation11 + $0xf0] sm:$0xff] }
 0x380   : > { %7097 = vmatprep.mubr.f32.mxu0 %v9944_v41  ;;  %v8105_v51 = vpack.c.bf16 %v2970_v46, %v2969_v15  ;;  %v3165_v41 = vld [vmem:[#allocation9 + $0x480] sm:$0xff] }
 0x382   : > { %8106 = vmatprep.subr.bf16.mxu1 %v8105_v51 }
 0x383   : > { %7098 = vmatmul.mubr.f32.gmra.mrb[40].mxu0 %v9952_v7  ;;  %8108 = vmatpush3.bf16.msra.mxu1 %v8105_v51  ;;  %v3166_v7 = vld [vmem:[#allocation9 + $0x488] sm:$0xff] }
 0x384   : > { %7100 = vmatprep.mubr.f32.mxu0 %v9954_v39  ;;  %v8109_v39 = vpack.c.bf16 %v3166_v7, %v3165_v41  ;;  %v3173_v7 = vld [vmem:[#allocation9 + $0x4c0] sm:$0xff] }
 0x386   : > { %8110 = vmatprep.subr.bf16.mxu1 %v8109_v39 }
 0x387   : > { %7101 = vmatmul.mubr.f32.gmra.mrb[42].mxu0 %v9962_v56  ;;  %v10028_v56 = vld [vmem:[#allocation14 + $0x1] ss:$0 sm:$0xff] }
 0x388   : > { %7103 = vmatprep.mubr.f32.mxu0 %v2650_v52  ;;  %v3171_v52 = vld [vmem:[#allocation9 + $0x4b0] sm:$0xff] }
 0x38b   : > { %7104 = vmatmul.mubr.f32.gmra.mrb[44].mxu0 %v2651_v3  ;;  %v3172_v3 = vld [vmem:[#allocation9 + $0x4b8] sm:$0xff] }
 0x38c   : > { %7106 = vmatprep.mubr.f32.mxu0 %v2652_v58  ;;  %v8121_v46 = vpack.c.bf16 %v3172_v3, %v3171_v52 }
 0x38f   : > { %7107 = vmatmul.mubr.f32.gmra.mrb[46].mxu0 %v2653_v61 }
 0x446   : > { %v7087_v44 = vpop.f32.mrb[32].mxu0 }
 0x447   : > { %v2902_v63 = vmul.f32 %v7087_v44, %v10028_v56  ;;  %v2737_v1 = vpop.f32.mrb[33].mxu0 }
 0x448   : > { %v2901_v11 = vmul.f32 %v10028_v56, %v2737_v1 }
 0x449   : > { %v2923_v16 = vadd.f32 %v10030_v47, %v2902_v63 }
 0x44a   : > { %v7090_v20 = vpop.f32.mrb[34].mxu0  ;;  %v2922_v21 = vadd.f32 %v10030_v47, %v2901_v11 }
 0x44b   : > { %v2904_v17 = vmul.f32 %v7090_v20, %v10028_v56  ;;  %v2747_v9 = vpop.f32.mrb[35].mxu0  ;;  %v2939_v29 = vmax.f32 %v2923_v16, 0.0 }
 0x44c   : > { %v2903_v49 = vmul.f32 %v10028_v56, %v2747_v9  ;;  %v2938_v22 = vmax.f32 %v2922_v21, 0.0  ;;  %v3176_v9 = vld [vmem:[#allocation9 + $0x4d8] sm:$0xff] }
 0x44d   : > { %v2925_v30 = vadd.f32 %v10030_v47, %v2904_v17  ;;  %v3175_v17 = vld [vmem:[#allocation9 + $0x4d0] sm:$0xff] }
 0x44e   : > { %v2924_v32 = vadd.f32 %v10030_v47, %v2903_v49  ;;  %v7093_v35 = vpop.f32.mrb[36].mxu0  ;;  %7141 = vmatprep.mubr.f32.mxu1 %v2938_v22 }
 0x44f   : > { %v2906_v0 = vmul.f32 %v7093_v35, %v10028_v56  ;;  %v2757_v48 = vpop.f32.mrb[37].mxu0  ;;  %7142 = vmatmul.mubr.f32.vlgmr.msra.gmra.mrb[0].mxu1 %v2939_v29  ;;  %v2941_v6 = vmax.f32 %v2925_v30, 0.0  ;;  %v8129_v35 = vpack.c.bf16 %v3176_v9, %v3175_v17  ;;  %v3364_v17 = vld [vmem:[#allocation9 + $0x528] sm:$0xff]  ;;  %v10067_v9 = vld [vmem:[#allocation2 + $0x20] sm:$0xff] }
 0x450   : > { %v2940_v40 = vmax.f32 %v2924_v32, 0.0  ;;  %v2905_v37 = vmul.f32 %v10028_v56, %v2757_v48  ;;  %8112 = vmatpush3.bf16.msra.mxu1 %v8109_v39  ;;  %v3174_v39 = vld [vmem:[#allocation9 + $0x4c8] sm:$0xff] }
 0x451   : > { %v2927_v50 = vadd.f32 %v10030_v47, %v2906_v0  ;;  %8114 = vmatprep.subr.bf16.mxu1 %v8113_v27  ;;  %v8125_v21 = vpack.c.bf16 %v3174_v39, %v3173_v7  ;;  %v3177_v0 = vld [vmem:[#allocation9 + $0x4e0] sm:$0xff]  ;;  %v3178_v48 = vld [vmem:[#allocation9 + $0x4e8] sm:$0xff] }
 0x452   : > { %v2926_v54 = vadd.f32 %v10030_v47, %v2905_v37  ;;  %v7096_v45 = vpop.f32.mrb[38].mxu0  ;;  %7144 = vmatprep.mubr.f32.mxu1 %v2940_v40  ;;  %v3359_v39 = vld [vmem:[#allocation9 + $0x500] sm:$0xff] }
 0x453   : > { %v2908_v58 = vmul.f32 %v7096_v45, %v10028_v56  ;;  %v2767_v61 = vpop.f32.mrb[39].mxu0  ;;  %7145 = vmatmul.mubr.f32.gmra.mrb[2].mxu1 %v2941_v6  ;;  %v2943_v8 = vmax.f32 %v2927_v50, 0.0  ;;  %v8133_v45 = vpack.c.bf16 %v3178_v48, %v3177_v0  ;;  %v10073_v0 = vld [vmem:[#allocation2 + $0x50] sm:$0xff]  ;;  %v10075_v48 = vld [vmem:[#allocation2 + $0x60] sm:$0xff] }
 0x454   : > { %v2942_v62 = vmax.f32 %v2926_v54, 0.0  ;;  %v2907_v4 = vmul.f32 %v10028_v56, %v2767_v61  ;;  %8116 = vmatpush3.bf16.msra.mxu1 %v8113_v27  ;;  %v3180_v61 = vld [vmem:[#allocation9 + $0x4f8] sm:$0xff] }
 0x455   : > { %v2929_v15 = vadd.f32 %v10030_v47, %v2908_v58  ;;  %8118 = vmatprep.subr.bf16.mxu1 %v8117_v59  ;;  %v3179_v58 = vld [vmem:[#allocation9 + $0x4f0] sm:$0xff] }
 0x456   : > { %v2928_v51 = vadd.f32 %v10030_v47, %v2907_v4  ;;  %v7099_v41 = vpop.f32.mrb[40].mxu0  ;;  %7147 = vmatprep.mubr.f32.mxu1 %v2942_v62 }
 0x457   : > { %v2910_v44 = vmul.f32 %v7099_v41, %v10028_v56  ;;  %v2777_v63 = vpop.f32.mrb[41].mxu0  ;;  %7148 = vmatmul.mubr.f32.gmra.mrb[4].mxu1 %v2943_v8  ;;  %v2945_v16 = vmax.f32 %v2929_v15, 0.0  ;;  %v8137_v41 = vpack.c.bf16 %v3180_v61, %v3179_v58  ;;  %v10087_v58 = vld [vmem:[#allocation2 + $0x90] sm:$0xff] }
 0x458   : > { %v2944_v1 = vmax.f32 %v2928_v51, 0.0  ;;  %v2909_v11 = vmul.f32 %v10028_v56, %v2777_v63  ;;  %8120 = vmatpush3.bf16.msra.mxu1 %v8117_v59 }
 0x459   : > { %v2931_v20 = vadd.f32 %v10030_v47, %v2910_v44  ;;  %8122 = vmatprep.subr.bf16.mxu1 %v8121_v46  ;;  %v3360_v44 = vld [vmem:[#allocation9 + $0x508] sm:$0xff] }
 0x45a   : > { %v2930_v24 = vadd.f32 %v10030_v47, %v2909_v11  ;;  %v7102_v43 = vpop.f32.mrb[42].mxu0  ;;  %7150 = vmatprep.mubr.f32.mxu1 %v2944_v1  ;;  %v3148_v11 = vld [vmem:[#allocation2] sm:$0xff] }
 0x45b   : > { %v2912_v49 = vmul.f32 %v7102_v43, %v10028_v56  ;;  %v2787_v22 = vpop.f32.mrb[43].mxu0  ;;  %7151 = vmatmul.mubr.f32.gmra.mrb[6].mxu1 %v2945_v16  ;;  %v2947_v27 = vmax.f32 %v2931_v20, 0.0  ;;  %v8141_v16 = vpack.c.bf16 %v3360_v44, %v3359_v39  ;;  %v3362_v20 = vld [vmem:[#allocation9 + $0x518] sm:$0xff]  ;;  %v3363_v43 = vld [vmem:[#allocation9 + $0x520] sm:$0xff] }
 0x45c   : > { %v2946_v29 = vmax.f32 %v2930_v24, 0.0  ;;  %v2911_v30 = vmul.f32 %v10028_v56, %v2787_v22  ;;  %8124 = vmatpush3.bf16.msra.mxu1 %v8121_v46  ;;  %v8149_v22 = vpack.c.bf16 %v3364_v17, %v3363_v43  ;;  %v3342_v39 = vld [vmem:[#allocation2 + $0x4] sm:$0xff]  ;;  %v3346_v43 = vld [vmem:[#allocation2 + $0x34] sm:$0xff] }
 0x45d   : > { %v2933_v32 = vadd.f32 %v10030_v47, %v2912_v49  ;;  %8126 = vmatprep.subr.bf16.mxu1 %v8125_v21  ;;  %v3152_v49 = vld [vmem:[#allocation2 + $0x30] sm:$0xff] }
 0x45e   : > { %v2932_v36 = vadd.f32 %v10030_v47, %v2911_v30  ;;  %v7105_v34 = vpop.f32.mrb[44].mxu0  ;;  %7153 = vmatprep.mubr.f32.mxu1 %v2946_v29  ;;  %v3365_v29 = vld [vmem:[#allocation9 + $0x530] sm:$0xff]  ;;  %v3366_v30 = vld [vmem:[#allocation9 + $0x538] sm:$0xff] }
 0x45f   : > { %v2914_v40 = vmul.f32 %v7105_v34, %v10028_v56  ;;  %v2797_v37 = vpop.f32.mrb[45].mxu0  ;;  %7154 = vmatmul.mubr.f32.gmra.mrb[8].mxu1 %v2947_v27  ;;  %v2949_v59 = vmax.f32 %v2933_v32, 0.0  ;;  %v10070_v27 = vld [vmem:[#allocation2 + $0x38] sm:$0xff]  ;;  %v3154_v32 = vld [vmem:[#allocation2 + $0x48] sm:$0xff] }
 0x460   : > { %v2948_v6 = vmax.f32 %v2932_v36, 0.0  ;;  %v2913_v50 = vmul.f32 %v10028_v56, %v2797_v37  ;;  %8128 = vmatpush3.bf16.msra.mxu1 %v8125_v21  ;;  %v10064_v21 = vld [vmem:[#allocation2 + $0x8] sm:$0xff]  ;;  %v3367_v36 = vld [vmem:[#allocation9 + $0x540] sm:$0xff]  ;;  %v3369_v37 = vld [vmem:[#allocation9 + $0x550] sm:$0xff] }
 0x461   : > { %v2935_v54 = vadd.f32 %v10030_v47, %v2914_v40  ;;  %8130 = vmatprep.subr.bf16.mxu1 %v8129_v35  ;;  %v3368_v34 = vld [vmem:[#allocation9 + $0x548] sm:$0xff] }
 0x462   : > { %v2934_v52 = vadd.f32 %v10030_v47, %v2913_v50  ;;  %v7108_v3 = vpop.f32.mrb[46].mxu0  ;;  %7156 = vmatprep.mubr.f32.mxu1 %v2948_v6  ;;  %v8157_v40 = vpack.c.bf16 %v3368_v34, %v3367_v36  ;;  %v3370_v6 = vld [vmem:[#allocation9 + $0x558] sm:$0xff]  ;;  %v10079_v50 = vld [vmem:[#allocation2 + $0x68] sm:$0xff] }
 0x463   : > { %v2916_v62 = vmul.f32 %v7108_v3, %v10028_v56  ;;  %v2807_v4 = vpop.f32.mrb[47].mxu0  ;;  %7157 = vmatmul.mubr.f32.gmra.mrb[10].mxu1 %v2949_v59  ;;  %v2951_v46 = vmax.f32 %v2935_v54, 0.0  ;;  %v10081_v59 = vld [vmem:[#allocation2 + $0x78] sm:$0xff]  ;;  %v8161_v54 = vpack.c.bf16 %v3370_v6, %v3369_v37  ;;  %v10085_v3 = vld [vmem:[#allocation2 + $0x80] sm:$0xff]  ;;  %v3594_v36 = vld [vmem:[#allocation9 + $0x5c8] sm:$0xff] }
 0x464   : > { %v2950_v8 = vmax.f32 %v2934_v52, 0.0  ;;  %v2915_v15 = vmul.f32 %v10028_v56, %v2807_v4  ;;  %8132 = vmatpush3.bf16.msra.mxu1 %v8129_v35  ;;  %v3361_v56 = vld [vmem:[#allocation9 + $0x510] sm:$0xff]  ;;  %v8153_v35 = vpack.c.bf16 %v3366_v30, %v3365_v29  ;;  %v3372_v52 = vld [vmem:[#allocation9 + $0x568] sm:$0xff]  ;;  %v3374_v4 = vld [vmem:[#allocation9 + $0x578] sm:$0xff] }
 0x465   : > { %v2937_v51 = vadd.f32 %v10030_v47, %v2916_v62  ;;  %8134 = vmatprep.subr.bf16.mxu1 %v8133_v45  ;;  %v8145_v24 = vpack.c.bf16 %v3362_v20, %v3361_v56  ;;  %v3373_v62 = vld [vmem:[#allocation9 + $0x570] sm:$0xff]  ;;  %v3589_v20 = vld [vmem:[#allocation9 + $0x5a0] sm:$0xff] }
 0x466   : > { %v2936_v7 = vadd.f32 %v10030_v47, %v2915_v15  ;;  %7159 = vmatprep.mubr.f32.mxu1 %v2950_v8  ;;  %v3150_v47 = vld [vmem:[#allocation2 + $0x18] sm:$0xff]  ;;  %v10093_v15 = vld [vmem:[#allocation2 + $0xa8] sm:$0xff]  ;;  %v3595_v6 = vld [vmem:[#allocation9 + $0x5d0] sm:$0xff] }
 0x467   : > { %7160 = vmatmul.mubr.f32.gmra.mrb[12].mxu1 %v2951_v46  ;;  %v2953_v1 = vmax.f32 %v2937_v51, 0.0  ;;  %v10091_v8 = vld [vmem:[#allocation2 + $0x98] sm:$0xff]  ;;  %v8169_v46 = vpack.c.bf16 %v3374_v4, %v3373_v62  ;;  %v3585_v51 = vld [vmem:[#allocation9 + $0x580] sm:$0xff]  ;;  %v3348_v30 = vld [vmem:[#allocation2 + $0x4c] sm:$0xff] }
 0x468   : > { %v2952_v63 = vmax.f32 %v2936_v7, 0.0  ;;  %8136 = vmatpush3.bf16.msra.mxu1 %v8133_v45  ;;  %v3371_v45 = vld [vmem:[#allocation9 + $0x560] sm:$0xff]  ;;  %v10097_v7 = vld [vmem:[#allocation2 + $0xb0] sm:$0xff]  ;;  %v3598_v4 = vld [vmem:[#allocation9 + $0x5e8] sm:$0xff] }
 0x469   : > { %8138 = vmatprep.subr.bf16.mxu1 %v8137_v41  ;;  %v8165_v61 = vpack.c.bf16 %v3372_v52, %v3371_v45  ;;  %v3347_v29 = vld [vmem:[#allocation2 + $0x3c] sm:$0xff]  ;;  %v3349_v34 = vld [vmem:[#allocation2 + $0x54] sm:$0xff]  ;;  %v10103_v45 = vld [vmem:[#allocation2 + $0x6c] sm:$0xff] }
 0x46a   : > { %7162 = vmatprep.mubr.f32.mxu1 %v2952_v63  ;;  %v3587_v63 = vld [vmem:[#allocation9 + $0x590] sm:$0xff]  ;;  %v10105_v52 = vld [vmem:[#allocation2 + $0x7c] sm:$0xff] }
 0x46b   : > { %7163 = vmatmul.mubr.f32.gmra.mrb[14].mxu1 %v2953_v1  ;;  %v3588_v1 = vld [vmem:[#allocation9 + $0x598] sm:$0xff]  ;;  %v3597_v62 = vld [vmem:[#allocation9 + $0x5e0] sm:$0xff] }
 0x46c   : > { %8140 = vmatpush3.bf16.msra.mxu1 %v8137_v41  ;;  %7197 = vmatprep.mubr.f32.mxu1 %v3148_v11  ;;  %v3586_v41 = vld [vmem:[#allocation9 + $0x588] sm:$0xff]  ;;  %v8177_v56 = vpack.c.bf16 %v3588_v1, %v3587_v63  ;;  %v3811_v63 = vld [vmem:[#allocation9 + $0x600] sm:$0xff] }
 0x46d   : > { %8142 = vmatprep.subr.bf16.mxu1 %v8141_v16  ;;  %v8173_v44 = vpack.c.bf16 %v3586_v41, %v3585_v51  ;;  %v3343_v11 = vld [vmem:[#allocation2 + $0xc] sm:$0xff]  ;;  %v8197_v51 = vpack.c.bf16 %v3598_v4, %v3597_v62  ;;  %v4037_v4 = vld [vmem:[#allocation9 + $0x680] sm:$0xff] }
 0x46e   : > { %v3599_v41 = vld [vmem:[#allocation9 + $0x5f0] sm:$0xff]  ;;  %v3812_v1 = vld [vmem:[#allocation9 + $0x608] sm:$0xff] }
 0x46f   : > { %7198 = vmatmul.mubr.f32.vlgmr.msra.gmra.mrb[16].mxu1 %v10064_v21 }
 0x470   : > { %8144 = vmatpush3.bf16.msra.mxu1 %v8141_v16  ;;  %7200 = vmatprep.mubr.f32.mxu1 %v3150_v47  ;;  %v3344_v16 = vld [vmem:[#allocation2 + $0x1c] sm:$0xff]  ;;  %v3590_v47 = vld [vmem:[#allocation9 + $0x5a8] sm:$0xff] }
 0x471   : > { %8146 = vmatprep.subr.bf16.mxu1 %v8145_v24  ;;  %v8181_v17 = vpack.c.bf16 %v3590_v47, %v3589_v20  ;;  %v3569_v20 = vld [vmem:[#allocation2 + $0x10] sm:$0xff]  ;;  %v3815_v47 = vld [vmem:[#allocation9 + $0x620] sm:$0xff] }
 0x473   : > { %7201 = vmatmul.mubr.f32.gmra.mrb[18].mxu1 %v10067_v9 }
 0x474   : > { %8148 = vmatpush3.bf16.msra.mxu1 %v8145_v24  ;;  %7203 = vmatprep.mubr.f32.mxu1 %v3152_v49  ;;  %v3345_v24 = vld [vmem:[#allocation2 + $0x24] sm:$0xff]  ;;  %v3591_v49 = vld [vmem:[#allocation9 + $0x5b0] sm:$0xff] }
 0x475   : > { %8150 = vmatprep.subr.bf16.mxu1 %v8149_v22 }
 0x477   : > { %7204 = vmatmul.mubr.f32.gmra.mrb[20].mxu1 %v10070_v27 }
 0x478   : > { %8152 = vmatpush3.bf16.msra.mxu1 %v8149_v22  ;;  %7206 = vmatprep.mubr.f32.mxu1 %v3154_v32  ;;  %v3592_v22 = vld [vmem:[#allocation9 + $0x5b8] sm:$0xff] }
 0x479   : > { %8154 = vmatprep.subr.bf16.mxu1 %v8153_v35  ;;  %v8185_v32 = vpack.c.bf16 %v3592_v22, %v3591_v49  ;;  %v3819_v49 = vld [vmem:[#allocation9 + $0x640] sm:$0xff]  ;;  %v3820_v22 = vld [vmem:[#allocation9 + $0x648] sm:$0xff] }
 0x47b   : > { %7207 = vmatmul.mubr.f32.gmra.mrb[22].mxu1 %v10073_v0 }
 0x47c   : > { %8156 = vmatpush3.bf16.msra.mxu1 %v8153_v35  ;;  %7209 = vmatprep.mubr.f32.mxu1 %v10075_v48  ;;  %v3593_v35 = vld [vmem:[#allocation9 + $0x5c0] sm:$0xff] }
 0x47d   : > { %8158 = vmatprep.subr.bf16.mxu1 %v8157_v40  ;;  %v8189_v37 = vpack.c.bf16 %v3594_v36, %v3593_v35  ;;  %v10121_v35 = vld [vmem:[#allocation2 + $0x70] sm:$0xff]  ;;  %v3823_v36 = vld [vmem:[#allocation9 + $0x660] sm:$0xff] }
 0x47f   : > { %7210 = vmatmul.mubr.f32.gmra.mrb[24].mxu1 %v10079_v50 }
 0x480   : > { %8160 = vmatpush3.bf16.msra.mxu1 %v8157_v40  ;;  %7212 = vmatprep.mubr.f32.mxu1 %v10081_v59  ;;  %v10100_v40 = vld [vmem:[#allocation2 + $0x64] sm:$0xff] }
 0x481   : > { %8162 = vmatprep.subr.bf16.mxu1 %v8161_v54 }
 0x483   : > { %7213 = vmatmul.mubr.f32.gmra.mrb[26].mxu1 %v10085_v3 }
 0x484   : > { %8164 = vmatpush3.bf16.msra.mxu1 %v8161_v54  ;;  %7215 = vmatprep.mubr.f32.mxu1 %v10087_v58  ;;  %v3596_v54 = vld [vmem:[#allocation9 + $0x5d8] sm:$0xff] }
 0x485   : > { %8166 = vmatprep.subr.bf16.mxu1 %v8165_v61 }
 0x487   : > { %7216 = vmatmul.mubr.f32.gmra.mrb[28].mxu1 %v10091_v8 }
 0x488   : > { %8168 = vmatpush3.bf16.msra.mxu1 %v8165_v61  ;;  %7218 = vmatprep.mubr.f32.mxu1 %v10093_v15  ;;  %v8193_v61 = vpack.c.bf16 %v3596_v54, %v3595_v6  ;;  %v3825_v6 = vld [vmem:[#allocation9 + $0x670] sm:$0xff]  ;;  %v3826_v54 = vld [vmem:[#allocation9 + $0x678] sm:$0xff] }
 0x489   : > { %8170 = vmatprep.subr.bf16.mxu1 %v8169_v46  ;;  %v8233_v62 = vpack.c.bf16 %v3826_v54, %v3825_v6  ;;  %v10165_v6 = vld [vmem:[#allocation2 + $0x110] sm:$0xff] }
 0x48b   : > { %7219 = vmatmul.mubr.f32.gmra.mrb[30].mxu1 %v10097_v7 }
 0x48c   : > { %8172 = vmatpush3.bf16.msra.mxu1 %v8169_v46  ;;  %7253 = vmatprep.mubr.f32.mxu1 %v3342_v39  ;;  %v10109_v46 = vld [vmem:[#allocation2 + $0x84] sm:$0xff]  ;;  %v3600_v39 = vld [vmem:[#allocation9 + $0x5f8] sm:$0xff] }
 0x48d   : > { %8174 = vmatprep.subr.bf16.mxu1 %v8173_v44 }
 0x48f   : > { %7254 = vmatmul.mubr.f32.vlgmr.msra.gmra.mrb[16].mxu1 %v3343_v11  ;;  %v8205_v11 = vpack.c.bf16 %v3812_v1, %v3811_v63  ;;  %v4040_v63 = vld [vmem:[#allocation9 + $0x698] sm:$0xff] }
 0x490   : > { %8176 = vmatpush3.bf16.msra.mxu1 %v8173_v44  ;;  %7256 = vmatprep.mubr.f32.mxu1 %v3344_v16  ;;  %v8201_v44 = vpack.c.bf16 %v3600_v39, %v3599_v41  ;;  %v3813_v16 = vld [vmem:[#allocation9 + $0x610] sm:$0xff]  ;;  %v10133_v41 = vld [vmem:[#allocation2 + $0xb8] sm:$0xff] }
 0x491   : > { %8178 = vmatprep.subr.bf16.mxu1 %v8177_v56 }
 0x493   : > { %7257 = vmatmul.mubr.f32.gmra.mrb[18].mxu1 %v3345_v24  ;;  %v3816_v24 = vld [vmem:[#allocation9 + $0x628] sm:$0xff] }
 0x494   : > { %8180 = vmatpush3.bf16.msra.mxu1 %v8177_v56  ;;  %7259 = vmatprep.mubr.f32.mxu1 %v3346_v43  ;;  %v3814_v56 = vld [vmem:[#allocation9 + $0x618] sm:$0xff]  ;;  %v3817_v43 = vld [vmem:[#allocation9 + $0x630] sm:$0xff] }
 0x495   : > { %8182 = vmatprep.subr.bf16.mxu1 %v8181_v17 }
 0x497   : > { %7260 = vmatmul.mubr.f32.gmra.mrb[20].mxu1 %v3347_v29  ;;  %v3575_v29 = vld [vmem:[#allocation2 + $0x58] sm:$0xff] }
 0x498   : > { %8184 = vmatpush3.bf16.msra.mxu1 %v8181_v17  ;;  %7262 = vmatprep.mubr.f32.mxu1 %v3348_v30  ;;  %v3818_v17 = vld [vmem:[#allocation9 + $0x638] sm:$0xff]  ;;  %v3821_v30 = vld [vmem:[#allocation9 + $0x650] sm:$0xff] }
 0x499   : > { %8186 = vmatprep.subr.bf16.mxu1 %v8185_v32 }
 0x49b   : > { %7263 = vmatmul.mubr.f32.gmra.mrb[22].mxu1 %v3349_v34  ;;  %v3824_v34 = vld [vmem:[#allocation9 + $0x668] sm:$0xff] }
 0x49c   : > { %8188 = vmatpush3.bf16.msra.mxu1 %v8185_v32  ;;  %7265 = vmatprep.mubr.f32.mxu1 %v10100_v40  ;;  %v3822_v32 = vld [vmem:[#allocation9 + $0x658] sm:$0xff] }
 0x49d   : > { %8190 = vmatprep.subr.bf16.mxu1 %v8189_v37 }
 0x49f   : > { %7266 = vmatmul.mubr.f32.gmra.mrb[24].mxu1 %v10103_v45 }
 0x4a0   : > { %8192 = vmatpush3.bf16.msra.mxu1 %v8189_v37  ;;  %7268 = vmatprep.mubr.f32.mxu1 %v10105_v52  ;;  %v8229_v37 = vpack.c.bf16 %v3824_v34, %v3823_v36  ;;  %v4263_v34 = vld [vmem:[#allocation9 + $0x700] sm:$0xff] }
 0x4a1   : > { %8194 = vmatprep.subr.bf16.mxu1 %v8193_v61 }
 0x4a3   : > { %7269 = vmatmul.mubr.f32.gmra.mrb[26].mxu1 %v10109_v46 }
 0x4a4   : > { %8196 = vmatpush3.bf16.msra.mxu1 %v8193_v61  ;;  %7271 = vmatprep.mubr.f32.mxu1 %v10001_v60  ;;  %v8209_v60 = vpack.c.bf16 %v3814_v56, %v3813_v16  ;;  %v10129_v61 = vld [vmem:[#allocation2 + $0xa0] sm:$0xff]  ;;  %v4042_v16 = vld [vmem:[#allocation9 + $0x6a8] sm:$0xff] }
 0x4a5   : > { %8198 = vmatprep.subr.bf16.mxu1 %v8197_v51 }
 0x4a7   : > { %7272 = vmatmul.mubr.f32.gmra.mrb[28].mxu1 %v10004_v2  ;;  %v3571_v2 = vld [vmem:[#allocation2 + $0x28] sm:$0xff] }
 0x4a8   : > { %8200 = vmatpush3.bf16.msra.mxu1 %v8197_v51  ;;  %7274 = vmatprep.mubr.f32.mxu1 %v10006_v57  ;;  %v8213_v57 = vpack.c.bf16 %v3816_v24, %v3815_v47  ;;  %v4038_v51 = vld [vmem:[#allocation9 + $0x688] sm:$0xff]  ;;  %v4045_v47 = vld [vmem:[#allocation9 + $0x6c0] sm:$0xff] }
 0x4a9   : > { %8202 = vmatprep.subr.bf16.mxu1 %v8201_v44  ;;  %v8237_v39 = vpack.c.bf16 %v4038_v51, %v4037_v4  ;;  %v4046_v24 = vld [vmem:[#allocation9 + $0x6c8] sm:$0xff]  ;;  %v4266_v4 = vld [vmem:[#allocation9 + $0x718] sm:$0xff] }
 0x4ab   : > { %7275 = vmatmul.mubr.f32.gmra.mrb[30].mxu1 %v10010_v33  ;;  %v3573_v33 = vld [vmem:[#allocation2 + $0x40] sm:$0xff] }
 0x4ac   : > { %8204 = vmatpush3.bf16.msra.mxu1 %v8201_v44  ;;  %7309 = vmatprep.mubr.f32.mxu1 %v10064_v21  ;;  %v8217_v21 = vpack.c.bf16 %v3818_v17, %v3817_v43  ;;  %v4039_v44 = vld [vmem:[#allocation9 + $0x690] sm:$0xff]  ;;  %v4048_v43 = vld [vmem:[#allocation9 + $0x6d8] sm:$0xff] }
 0x4ad   : > { %8206 = vmatprep.subr.bf16.mxu1 %v8205_v11  ;;  %v8241_v1 = vpack.c.bf16 %v4040_v63, %v4039_v44  ;;  %v10149_v17 = vld [vmem:[#allocation2 + $0xd8] sm:$0xff]  ;;  %v4268_v44 = vld [vmem:[#allocation9 + $0x728] sm:$0xff] }
 0x4ae   : > { %v4024_v63 = vld [vmem:[#allocation2 + $0x94] sm:$0xff] }
 0x4af   : > { %7310 = vmatmul.mubr.f32.vlgmr.msra.gmra.mrb[16].mxu1 %v3569_v20  ;;  %v4043_v20 = vld [vmem:[#allocation9 + $0x6b0] sm:$0xff] }
 0x4b0   : > { %8208 = vmatpush3.bf16.msra.mxu1 %v8205_v11  ;;  %7312 = vmatprep.mubr.f32.mxu1 %v10067_v9  ;;  %v8221_v9 = vpack.c.bf16 %v3820_v22, %v3819_v49  ;;  %v4041_v11 = vld [vmem:[#allocation9 + $0x6a0] sm:$0xff]  ;;  %v4050_v49 = vld [vmem:[#allocation9 + $0x6e8] sm:$0xff]  ;;  %v10155_v22 = vld [vmem:[#allocation2 + $0xf0] sm:$0xff] }
 0x4b1   : > { %8210 = vmatprep.subr.bf16.mxu1 %v8209_v60  ;;  %v8245_v56 = vpack.c.bf16 %v4042_v16, %v4041_v11  ;;  %v4269_v11 = vld [vmem:[#allocation9 + $0x730] sm:$0xff]  ;;  %v4270_v16 = vld [vmem:[#allocation9 + $0x738] sm:$0xff] }
 0x4b3   : > { %7313 = vmatmul.mubr.f32.gmra.mrb[18].mxu1 %v3571_v2  ;;  %v8253_v2 = vpack.c.bf16 %v4046_v24, %v4045_v47  ;;  %v4273_v24 = vld [vmem:[#allocation9 + $0x750] sm:$0xff] }
 0x4b4   : > { %8212 = vmatpush3.bf16.msra.mxu1 %v8209_v60  ;;  %7315 = vmatprep.mubr.f32.mxu1 %v10070_v27  ;;  %v8225_v27 = vpack.c.bf16 %v3822_v32, %v3821_v30  ;;  %v4044_v60 = vld [vmem:[#allocation9 + $0x6b8] sm:$0xff] }
 0x4b5   : > { %8214 = vmatprep.subr.bf16.mxu1 %v8213_v57  ;;  %v4052_v30 = vld [vmem:[#allocation9 + $0x6f8] sm:$0xff] }
 0x4b6   : > { %v10159_v32 = vld [vmem:[#allocation2 + $0xf8] sm:$0xff] }
 0x4b7   : > { %7316 = vmatmul.mubr.f32.gmra.mrb[20].mxu1 %v3573_v33 }
 0x4b8   : > { %8216 = vmatpush3.bf16.msra.mxu1 %v8213_v57  ;;  %7318 = vmatprep.mubr.f32.mxu1 %v10073_v0  ;;  %v10125_v0 = vld [vmem:[#allocation2 + $0x88] sm:$0xff]  ;;  %v4047_v57 = vld [vmem:[#allocation9 + $0x6d0] sm:$0xff] }
 0x4b9   : > { %8218 = vmatprep.subr.bf16.mxu1 %v8217_v21  ;;  %v8257_v33 = vpack.c.bf16 %v4048_v43, %v4047_v57  ;;  %v10177_v57 = vld [vmem:[#allocation2 + $0xdc] sm:$0xff] }
 0x4bb   : > { %7319 = vmatmul.mubr.f32.gmra.mrb[22].mxu1 %v3575_v29 }
 0x4bc   : > { %8220 = vmatpush3.bf16.msra.mxu1 %v8217_v21  ;;  %7321 = vmatprep.mubr.f32.mxu1 %v10079_v50  ;;  %v4049_v21 = vld [vmem:[#allocation9 + $0x6e0] sm:$0xff] }
 0x4bd   : > { %8222 = vmatprep.subr.bf16.mxu1 %v8221_v9  ;;  %v8261_v29 = vpack.c.bf16 %v4050_v49, %v4049_v21  ;;  %v4276_v21 = vld [vmem:[#allocation9 + $0x768] sm:$0xff] }
 0x4be   : > { %v10181_v49 = vld [vmem:[#allocation2 + $0xe4] sm:$0xff] }
 0x4bf   : > { %7322 = vmatmul.mubr.f32.gmra.mrb[24].mxu1 %v10121_v35 }
 0x4c0   : > { %8224 = vmatpush3.bf16.msra.mxu1 %v8221_v9  ;;  %7324 = vmatprep.mubr.f32.mxu1 %v10085_v3  ;;  %v4051_v9 = vld [vmem:[#allocation9 + $0x6f0] sm:$0xff] }
 0x4c1   : > { %8226 = vmatprep.subr.bf16.mxu1 %v8225_v27  ;;  %v8265_v36 = vpack.c.bf16 %v4052_v30, %v4051_v9  ;;  %v4277_v30 = vld [vmem:[#allocation9 + $0x770] sm:$0xff] }
 0x4c3   : > { %7325 = vmatmul.mubr.f32.gmra.mrb[26].mxu1 %v10125_v0 }
 0x4c4   : > { %8228 = vmatpush3.bf16.msra.mxu1 %v8225_v27  ;;  %7327 = vmatprep.mubr.f32.mxu1 %v10091_v8  ;;  %v10161_v27 = vld [vmem:[#allocation2 + $0x108] sm:$0xff] }
 0x4c5   : > { %8230 = vmatprep.subr.bf16.mxu1 %v8229_v37 }
 0x4c7   : > { %7328 = vmatmul.mubr.f32.gmra.mrb[28].mxu1 %v10129_v61 }
 0x4c8   : > { %8232 = vmatpush3.bf16.msra.mxu1 %v8229_v37  ;;  %7330 = vmatprep.mubr.f32.mxu1 %v10097_v7  ;;  %v4264_v37 = vld [vmem:[#allocation9 + $0x708] sm:$0xff] }
 0x4c9   : > { %8234 = vmatprep.subr.bf16.mxu1 %v8233_v62  ;;  %v8269_v54 = vpack.c.bf16 %v4264_v37, %v4263_v34  ;;  %v10187_v34 = vld [vmem:[#allocation2 + $0xfc] sm:$0xff]  ;;  %v10189_v37 = vld [vmem:[#allocation2 + $0x10c] sm:$0xff] }
 0x4cb   : > { %7331 = vmatmul.mubr.f32.gmra.mrb[30].mxu1 %v10133_v41 }
 0x4cc   : > { %8236 = vmatpush3.bf16.msra.mxu1 %v8233_v62  ;;  %7365 = vmatprep.mubr.f32.mxu1 %v10075_v48  ;;  %v8249_v48 = vpack.c.bf16 %v4044_v60, %v4043_v20  ;;  %v4265_v62 = vld [vmem:[#allocation9 + $0x710] sm:$0xff]  ;;  %v8281_v20 = vpack.c.bf16 %v4270_v16, %v4269_v11  ;;  %v4271_v60 = vld [vmem:[#allocation9 + $0x740] sm:$0xff]  ;;  %v4495_v16 = vld [vmem:[#allocation9 + $0x7a8] sm:$0xff] }
 0x4cd   : > { %8238 = vmatprep.subr.bf16.mxu1 %v8237_v39  ;;  %v8273_v51 = vpack.c.bf16 %v4266_v4, %v4265_v62  ;;  %v4490_v62 = vld [vmem:[#allocation9 + $0x780] sm:$0xff]  ;;  %v4491_v4 = vld [vmem:[#allocation9 + $0x788] sm:$0xff] }
 0x4ce   : > { %v4494_v11 = vld [vmem:[#allocation9 + $0x7a0] sm:$0xff] }
 0x4cf   : > { %7366 = vmatmul.mubr.f32.vlgmr.msra.gmra.mrb[16].mxu1 %v10079_v50 }
 0x4d0   : > { %8240 = vmatpush3.bf16.msra.mxu1 %v8237_v39  ;;  %7368 = vmatprep.mubr.f32.mxu1 %v10081_v59  ;;  %v10143_v59 = vld [vmem:[#allocation2 + $0xc0] sm:$0xff] }
 0x4d1   : > { %8242 = vmatprep.subr.bf16.mxu1 %v8241_v1  ;;  %v4267_v39 = vld [vmem:[#allocation9 + $0x720] sm:$0xff] }
 0x4d3   : > { %7369 = vmatmul.mubr.f32.gmra.mrb[18].mxu1 %v10085_v3 }
 0x4d4   : > { %8244 = vmatpush3.bf16.msra.mxu1 %v8241_v1  ;;  %7371 = vmatprep.mubr.f32.mxu1 %v10087_v58  ;;  %v10147_v58 = vld [vmem:[#allocation2 + $0xc8] sm:$0xff]  ;;  %v8277_v1 = vpack.c.bf16 %v4268_v44, %v4267_v39  ;;  %v8301_v39 = vpack.c.bf16 %v4491_v4, %v4490_v62  ;;  %v4492_v44 = vld [vmem:[#allocation9 + $0x790] sm:$0xff]  ;;  %v4719_v62 = vld [vmem:[#allocation9 + $0x818] sm:$0xff] }
 0x4d5   : > { %8246 = vmatprep.subr.bf16.mxu1 %v8245_v56 }
 0x4d7   : > { %7372 = vmatmul.mubr.f32.gmra.mrb[20].mxu1 %v10091_v8 }
 0x4d8   : > { %8248 = vmatpush3.bf16.msra.mxu1 %v8245_v56  ;;  %7374 = vmatprep.mubr.f32.mxu1 %v10093_v15  ;;  %v10153_v15 = vld [vmem:[#allocation2 + $0xe0] sm:$0xff] }
 0x4d9   : > { %8250 = vmatprep.subr.bf16.mxu1 %v8249_v48  ;;  %v4025_v56 = vld [vmem:[#allocation2 + $0x9c] sm:$0xff] }
 0x4db   : > { %7375 = vmatmul.mubr.f32.gmra.mrb[22].mxu1 %v10097_v7 }
 0x4dc   : > { %8252 = vmatpush3.bf16.msra.mxu1 %v8249_v48  ;;  %7377 = vmatprep.mubr.f32.mxu1 %v10143_v59  ;;  %v4272_v48 = vld [vmem:[#allocation9 + $0x748] sm:$0xff] }
 0x4dd   : > { %8254 = vmatprep.subr.bf16.mxu1 %v8253_v2  ;;  %v8285_v47 = vpack.c.bf16 %v4272_v48, %v4271_v60  ;;  %v4498_v60 = vld [vmem:[#allocation9 + $0x7c0] sm:$0xff]  ;;  %v4499_v48 = vld [vmem:[#allocation9 + $0x7c8] sm:$0xff] }
 0x4df   : > { %7378 = vmatmul.mubr.f32.gmra.mrb[24].mxu1 %v10147_v58 }
 0x4e0   : > { %8256 = vmatpush3.bf16.msra.mxu1 %v8253_v2  ;;  %7380 = vmatprep.mubr.f32.mxu1 %v10149_v17  ;;  %v4274_v2 = vld [vmem:[#allocation9 + $0x758] sm:$0xff] }
 0x4e1   : > { %8258 = vmatprep.subr.bf16.mxu1 %v8257_v33  ;;  %v8289_v43 = vpack.c.bf16 %v4274_v2, %v4273_v24  ;;  %v4503_v24 = vld [vmem:[#allocation9 + $0x7e8] sm:$0xff]  ;;  %v4504_v2 = vld [vmem:[#allocation9 + $0x7f0] sm:$0xff] }
 0x4e3   : > { %7381 = vmatmul.mubr.f32.gmra.mrb[26].mxu1 %v10153_v15 }
 0x4e4   : > { %8260 = vmatpush3.bf16.msra.mxu1 %v8257_v33  ;;  %7383 = vmatprep.mubr.f32.mxu1 %v10155_v22  ;;  %v4275_v33 = vld [vmem:[#allocation9 + $0x760] sm:$0xff] }
 0x4e5   : > { %8262 = vmatprep.subr.bf16.mxu1 %v8261_v29  ;;  %v8293_v9 = vpack.c.bf16 %v4276_v21, %v4275_v33  ;;  %v4716_v21 = vld [vmem:[#allocation9 + $0x800] sm:$0xff] }
 0x4e7   : > { %7384 = vmatmul.mubr.f32.gmra.mrb[28].mxu1 %v10159_v32 }
 0x4e8   : > { %8264 = vmatpush3.bf16.msra.mxu1 %v8261_v29  ;;  %7386 = vmatprep.mubr.f32.mxu1 %v10161_v27  ;;  %v10183_v29 = vld [vmem:[#allocation2 + $0xf4] sm:$0xff] }
 0x4e9   : > { %8266 = vmatprep.subr.bf16.mxu1 %v8265_v36 }
 0x4eb   : > { %7387 = vmatmul.mubr.f32.gmra.mrb[30].mxu1 %v10165_v6 }
 0x4ec   : > { %8268 = vmatpush3.bf16.msra.mxu1 %v8265_v36  ;;  %7421 = vmatprep.mubr.f32.mxu1 %v10100_v40  ;;  %v4026_v40 = vld [vmem:[#allocation2 + $0xac] sm:$0xff]  ;;  %v4278_v36 = vld [vmem:[#allocation9 + $0x778] sm:$0xff] }
 0x4ed   : > { %8270 = vmatprep.subr.bf16.mxu1 %v8269_v54 }
 0x4ef   : > { %7422 = vmatmul.mubr.f32.vlgmr.msra.gmra.mrb[16].mxu1 %v10103_v45  ;;  %v4027_v45 = vld [vmem:[#allocation2 + $0xb4] sm:$0xff] }
 0x4f0   : > { %8272 = vmatpush3.bf16.msra.mxu1 %v8269_v54  ;;  %7424 = vmatprep.mubr.f32.mxu1 %v10105_v52  ;;  %v10172_v52 = vld [vmem:[#allocation2 + $0xc4] sm:$0xff]  ;;  %v8297_v54 = vpack.c.bf16 %v4278_v36, %v4277_v30  ;;  %v10217_v30 = vld [vmem:[#allocation2 + $0x118] sm:$0xff] }
 0x4f1   : > { %8274 = vmatprep.subr.bf16.mxu1 %v8273_v51 }
 0x4f3   : > { %7425 = vmatmul.mubr.f32.gmra.mrb[18].mxu1 %v10109_v46  ;;  %v10175_v46 = vld [vmem:[#allocation2 + $0xcc] sm:$0xff] }
 0x4f4   : > { %8276 = vmatpush3.bf16.msra.mxu1 %v8273_v51  ;;  %7427 = vmatprep.mubr.f32.mxu1 %v4024_v63  ;;  %v10193_v51 = vld [vmem:[#allocation2 + $0x114] sm:$0xff] }
 0x4f5   : > { %8278 = vmatprep.subr.bf16.mxu1 %v8277_v1  ;;  %v4493_v63 = vld [vmem:[#allocation9 + $0x798] sm:$0xff] }
 0x4f7   : > { %7428 = vmatmul.mubr.f32.gmra.mrb[20].mxu1 %v4025_v56  ;;  %v8309_v56 = vpack.c.bf16 %v4495_v16, %v4494_v11  ;;  %v4723_v11 = vld [vmem:[#allocation9 + $0x838] sm:$0xff]  ;;  %v4724_v16 = vld [vmem:[#allocation9 + $0x840] sm:$0xff] }
 0x4f8   : > { %8280 = vmatpush3.bf16.msra.mxu1 %v8277_v1  ;;  %7430 = vmatprep.mubr.f32.mxu1 %v4026_v40  ;;  %v8305_v1 = vpack.c.bf16 %v4493_v63, %v4492_v44  ;;  %v4496_v40 = vld [vmem:[#allocation9 + $0x7b0] sm:$0xff]  ;;  %v4721_v44 = vld [vmem:[#allocation9 + $0x828] sm:$0xff] }
 0x4f9   : > { %8282 = vmatprep.subr.bf16.mxu1 %v8281_v20 }
 0x4fb   : > { %7431 = vmatmul.mubr.f32.gmra.mrb[22].mxu1 %v4027_v45  ;;  %v4501_v45 = vld [vmem:[#allocation9 + $0x7d8] sm:$0xff] }
 0x4fc   : > { %8284 = vmatpush3.bf16.msra.mxu1 %v8281_v20  ;;  %7433 = vmatprep.mubr.f32.mxu1 %v10172_v52  ;;  %v4497_v20 = vld [vmem:[#allocation9 + $0x7b8] sm:$0xff] }
 0x4fd   : > { %8286 = vmatprep.subr.bf16.mxu1 %v8285_v47 }
 0x4ff   : > { %7434 = vmatmul.mubr.f32.gmra.mrb[24].mxu1 %v10175_v46 }
 0x500   : > { %8288 = vmatpush3.bf16.msra.mxu1 %v8285_v47  ;;  %7436 = vmatprep.mubr.f32.mxu1 %v10177_v57  ;;  %v4502_v47 = vld [vmem:[#allocation9 + $0x7e0] sm:$0xff] }
 0x501   : > { %8290 = vmatprep.subr.bf16.mxu1 %v8289_v43 }
 0x503   : > { %7437 = vmatmul.mubr.f32.gmra.mrb[26].mxu1 %v10181_v49 }
 0x504   : > { %8292 = vmatpush3.bf16.msra.mxu1 %v8289_v43  ;;  %7439 = vmatprep.mubr.f32.mxu1 %v10183_v29  ;;  %v10213_v43 = vld [vmem:[#allocation2 + $0x100] sm:$0xff] }
 0x505   : > { %8294 = vmatprep.subr.bf16.mxu1 %v8293_v9 }
 0x507   : > { %7440 = vmatmul.mubr.f32.gmra.mrb[28].mxu1 %v10187_v34 }
 0x508   : > { %8296 = vmatpush3.bf16.msra.mxu1 %v8293_v9  ;;  %7442 = vmatprep.mubr.f32.mxu1 %v10189_v37  ;;  %v4717_v9 = vld [vmem:[#allocation9 + $0x808] sm:$0xff] }
 0x509   : > { %8298 = vmatprep.subr.bf16.mxu1 %v8297_v54  ;;  %v8333_v36 = vpack.c.bf16 %v4717_v9, %v4716_v21  ;;  %v4943_v21 = vld [vmem:[#allocation9 + $0x888] sm:$0xff]  ;;  %v10237_v9 = vld [vmem:[#allocation2 + $0x170] sm:$0xff] }
 0x50b   : > { %7443 = vmatmul.mubr.f32.gmra.mrb[30].mxu1 %v10193_v51 }
 0x50c   : > { %8300 = vmatpush3.bf16.msra.mxu1 %v8297_v54  ;;  %7477 = vmatprep.mubr.f32.mxu1 %v10079_v50  ;;  %v8313_v50 = vpack.c.bf16 %v4497_v20, %v4496_v40  ;;  %v4718_v54 = vld [vmem:[#allocation9 + $0x810] sm:$0xff] }
 0x50d   : > { %8302 = vmatprep.subr.bf16.mxu1 %v8301_v39  ;;  %v8337_v4 = vpack.c.bf16 %v4719_v62, %v4718_v54  ;;  %v4726_v20 = vld [vmem:[#allocation9 + $0x850] sm:$0xff]  ;;  %v4945_v62 = vld [vmem:[#allocation9 + $0x898] sm:$0xff] }
 0x50e   : > { %v4944_v54 = vld [vmem:[#allocation9 + $0x890] sm:$0xff] }
 0x50f   : > { %7478 = vmatmul.mubr.f32.vlgmr.msra.gmra.mrb[16].mxu1 %v10121_v35  ;;  %v4500_v35 = vld [vmem:[#allocation9 + $0x7d0] sm:$0xff] }
 0x510   : > { %8304 = vmatpush3.bf16.msra.mxu1 %v8301_v39  ;;  %7480 = vmatprep.mubr.f32.mxu1 %v10085_v3  ;;  %v8317_v3 = vpack.c.bf16 %v4499_v48, %v4498_v60  ;;  %v4720_v39 = vld [vmem:[#allocation9 + $0x820] sm:$0xff]  ;;  %v10228_v60 = vld [vmem:[#allocation2 + $0x128] sm:$0xff] }
 0x511   : > { %8306 = vmatprep.subr.bf16.mxu1 %v8305_v1  ;;  %v8341_v63 = vpack.c.bf16 %v4721_v44, %v4720_v39  ;;  %v4946_v39 = vld [vmem:[#allocation9 + $0x8a0] sm:$0xff]  ;;  %v4947_v44 = vld [vmem:[#allocation9 + $0x8a8] sm:$0xff] }
 0x513   : > { %7481 = vmatmul.mubr.f32.gmra.mrb[18].mxu1 %v10125_v0  ;;  %v10205_v0 = vld [vmem:[#allocation2 + $0xd0] sm:$0xff] }
 0x514   : > { %8308 = vmatpush3.bf16.msra.mxu1 %v8305_v1  ;;  %7483 = vmatprep.mubr.f32.mxu1 %v10091_v8  ;;  %v8321_v8 = vpack.c.bf16 %v4501_v45, %v4500_v35  ;;  %v4722_v1 = vld [vmem:[#allocation9 + $0x830] sm:$0xff]  ;;  %v4729_v35 = vld [vmem:[#allocation9 + $0x868] sm:$0xff] }
 0x515   : > { %8310 = vmatprep.subr.bf16.mxu1 %v8309_v56  ;;  %v4485_v45 = vld [vmem:[#allocation2 + $0x150] sm:$0xff] }
 0x517   : > { %7484 = vmatmul.mubr.f32.gmra.mrb[20].mxu1 %v10129_v61  ;;  %v8325_v61 = vpack.c.bf16 %v4503_v24, %v4502_v47  ;;  %v4730_v47 = vld [vmem:[#allocation9 + $0x870] sm:$0xff]  ;;  %v4731_v24 = vld [vmem:[#allocation9 + $0x878] sm:$0xff] }
 0x518   : > { %8312 = vmatpush3.bf16.msra.mxu1 %v8309_v56  ;;  %7486 = vmatprep.mubr.f32.mxu1 %v10097_v7  ;;  %v10209_v7 = vld [vmem:[#allocation2 + $0xe8] sm:$0xff] }
 0x519   : > { %8314 = vmatprep.subr.bf16.mxu1 %v8313_v50  ;;  %v4725_v56 = vld [vmem:[#allocation9 + $0x848] sm:$0xff] }
 0x51a   : > { %v8349_v40 = vpack.c.bf16 %v4725_v56, %v4724_v16  ;;  %v4951_v16 = vld [vmem:[#allocation9 + $0x8c8] sm:$0xff]  ;;  %v4952_v56 = vld [vmem:[#allocation9 + $0x8d0] sm:$0xff] }
 0x51b   : > { %7487 = vmatmul.mubr.f32.gmra.mrb[22].mxu1 %v10133_v41  ;;  %v4505_v41 = vld [vmem:[#allocation9 + $0x7f8] sm:$0xff] }
 0x51c   : > { %8316 = vmatpush3.bf16.msra.mxu1 %v8313_v50  ;;  %7489 = vmatprep.mubr.f32.mxu1 %v10147_v58  ;;  %v8329_v33 = vpack.c.bf16 %v4505_v41, %v4504_v2  ;;  %v4727_v50 = vld [vmem:[#allocation9 + $0x858] sm:$0xff]  ;;  %v4487_v2 = vld [vmem:[#allocation2 + $0x168] sm:$0xff]  ;;  %v8361_v41 = vpack.c.bf16 %v4731_v24, %v4730_v47 }
 0x51d   : > { %8318 = vmatprep.subr.bf16.mxu1 %v8317_v3  ;;  %v8353_v48 = vpack.c.bf16 %v4727_v50, %v4726_v20  ;;  %v4954_v20 = vld [vmem:[#allocation9 + $0x8e0] sm:$0xff]  ;;  %v4955_v50 = vld [vmem:[#allocation9 + $0x8e8] sm:$0xff]  ;;  %v4714_v24 = vld [vmem:[#allocation2 + $0x174] sm:$0xff] }
 0x51e   : > { %v5243_v47 = vld [vmem:[#allocation11 + $0x108] sm:$0xff] }
 0x51f   : > { %7490 = vmatmul.mubr.f32.gmra.mrb[24].mxu1 %v10205_v0 }
 0x520   : > { %8320 = vmatpush3.bf16.msra.mxu1 %v8317_v3  ;;  %7492 = vmatprep.mubr.f32.mxu1 %v10153_v15  ;;  %v4728_v3 = vld [vmem:[#allocation9 + $0x860] sm:$0xff] }
 0x521   : > { %8322 = vmatprep.subr.bf16.mxu1 %v8321_v8 }
 0x523   : > { %7493 = vmatmul.mubr.f32.gmra.mrb[26].mxu1 %v10209_v7 }
 0x524   : > { %8324 = vmatpush3.bf16.msra.mxu1 %v8321_v8  ;;  %7495 = vmatprep.mubr.f32.mxu1 %v10159_v32  ;;  %v8357_v8 = vpack.c.bf16 %v4729_v35, %v4728_v3  ;;  %v4957_v3 = vld [vmem:[#allocation9 + $0x8f8] sm:$0xff]  ;;  %v4713_v35 = vld [vmem:[#allocation2 + $0x16c] sm:$0xff] }
 0x525   : > { %8326 = vmatprep.subr.bf16.mxu1 %v8325_v61 }
 0x527   : > { %7496 = vmatmul.mubr.f32.gmra.mrb[28].mxu1 %v10213_v43 }
 0x528   : > { %8328 = vmatpush3.bf16.msra.mxu1 %v8325_v61  ;;  %7498 = vmatprep.mubr.f32.mxu1 %v10165_v6  ;;  %v10234_v61 = vld [vmem:[#allocation2 + $0x158] sm:$0xff] }
 0x529   : > { %8330 = vmatprep.subr.bf16.mxu1 %v8329_v33 }
 0x52b   : > { %7499 = vmatmul.mubr.f32.gmra.mrb[30].mxu1 %v10217_v30 }
 0x52c   : > { %8332 = vmatpush3.bf16.msra.mxu1 %v8329_v33  ;;  %7533 = vmatprep.mubr.f32.mxu1 %v10143_v59  ;;  %v8345_v59 = vpack.c.bf16 %v4723_v11, %v4722_v1  ;;  %v4942_v33 = vld [vmem:[#allocation9 + $0x880] sm:$0xff]  ;;  %v4948_v1 = vld [vmem:[#allocation9 + $0x8b0] sm:$0xff]  ;;  %v4949_v11 = vld [vmem:[#allocation9 + $0x8b8] sm:$0xff] }
 0x52d   : > { %8334 = vmatprep.subr.bf16.mxu1 %v8333_v36 }
 0x52f   : > { %7534 = vmatmul.mubr.f32.vlgmr.msra.gmra.mrb[16].mxu1 %v10147_v58 }
 0x530   : > { %8336 = vmatpush3.bf16.msra.mxu1 %v8333_v36  ;;  %7536 = vmatprep.mubr.f32.mxu1 %v10149_v17  ;;  %v4481_v17 = vld [vmem:[#allocation2 + $0x120] sm:$0xff]  ;;  %v8365_v36 = vpack.c.bf16 %v4943_v21, %v4942_v33  ;;  %v5245_v33 = vld [vmem:[#allocation11 + $0x118] sm:$0xff] }
 0x531   : > { %8338 = vmatprep.subr.bf16.mxu1 %v8337_v4 }
 0x533   : > { %7537 = vmatmul.mubr.f32.gmra.mrb[18].mxu1 %v10153_v15 }
 0x534   : > { %8340 = vmatpush3.bf16.msra.mxu1 %v8337_v4  ;;  %7539 = vmatprep.mubr.f32.mxu1 %v10155_v22  ;;  %v4483_v22 = vld [vmem:[#allocation2 + $0x138] sm:$0xff]  ;;  %v8369_v4 = vpack.c.bf16 %v4945_v62, %v4944_v54  ;;  %v5247_v54 = vld [vmem:[#allocation11 + $0x128] sm:$0xff] }
 0x535   : > { %8342 = vmatprep.subr.bf16.mxu1 %v8341_v63 }
 0x537   : > { %7540 = vmatmul.mubr.f32.gmra.mrb[20].mxu1 %v10159_v32 }
 0x538   : > { %8344 = vmatpush3.bf16.msra.mxu1 %v8341_v63  ;;  %7542 = vmatprep.mubr.f32.mxu1 %v10161_v27  ;;  %v10231_v27 = vld [vmem:[#allocation2 + $0x140] sm:$0xff]  ;;  %v8373_v63 = vpack.c.bf16 %v4947_v44, %v4946_v39  ;;  %v5249_v39 = vld [vmem:[#allocation11 + $0x138] sm:$0xff] }
 0x539   : > { %8346 = vmatprep.subr.bf16.mxu1 %v8345_v59  ;;  %v5250_v44 = vld [vmem:[#allocation11 + $0x140] sm:$0xff] }
 0x53b   : > { %7543 = vmatmul.mubr.f32.gmra.mrb[22].mxu1 %v10165_v6 }
 0x53c   : > { %8348 = vmatpush3.bf16.msra.mxu1 %v8345_v59  ;;  %7545 = vmatprep.mubr.f32.mxu1 %v4481_v17  ;;  %v4950_v59 = vld [vmem:[#allocation9 + $0x8c0] sm:$0xff]  ;;  %v4953_v17 = vld [vmem:[#allocation9 + $0x8d8] sm:$0xff] }
 0x53d   : > { %8350 = vmatprep.subr.bf16.mxu1 %v8349_v40 }
 0x53f   : > { %7546 = vmatmul.mubr.f32.gmra.mrb[24].mxu1 %v10228_v60 }
 0x540   : > { %8352 = vmatpush3.bf16.msra.mxu1 %v8349_v40  ;;  %7548 = vmatprep.mubr.f32.mxu1 %v4483_v22  ;;  %v8385_v40 = vpack.c.bf16 %v4953_v17, %v4952_v56  ;;  %v8389_v22 = vpack.c.bf16 %v4955_v50, %v4954_v20 }
 0x541   : > { %8354 = vmatprep.subr.bf16.mxu1 %v8353_v48 }
 0x543   : > { %7549 = vmatmul.mubr.f32.gmra.mrb[26].mxu1 %v10231_v27 }
 0x544   : > { %8356 = vmatpush3.bf16.msra.mxu1 %v8353_v48  ;;  %7551 = vmatprep.mubr.f32.mxu1 %v4485_v45  ;;  %v4956_v48 = vld [vmem:[#allocation9 + $0x8f0] sm:$0xff] }
 0x545   : > { %8358 = vmatprep.subr.bf16.mxu1 %v8357_v8  ;;  %v8393_v45 = vpack.c.bf16 %v4957_v3, %v4956_v48 }
 0x547   : > { %7552 = vmatmul.mubr.f32.gmra.mrb[28].mxu1 %v10234_v61 }
 0x548   : > { %8360 = vmatpush3.bf16.msra.mxu1 %v8357_v8  ;;  %7554 = vmatprep.mubr.f32.mxu1 %v4487_v2  ;;  %v5242_v8 = vld [vmem:[#allocation11 + $0x100] sm:$0xff] }
 0x549   : > { %8362 = vmatprep.subr.bf16.mxu1 %v8361_v41  ;;  %v8397_v2 = vpack.c.bf16 %v5243_v47, %v5242_v8 }
 0x54b   : > { %7555 = vmatmul.mubr.f32.gmra.mrb[30].mxu1 %v10237_v9 }
 0x54c   : > { %8364 = vmatpush3.bf16.msra.mxu1 %v8361_v41  ;;  %7589 = vmatprep.mubr.f32.mxu1 %v10172_v52  ;;  %v8377_v52 = vpack.c.bf16 %v4949_v11, %v4948_v1  ;;  %v5244_v41 = vld [vmem:[#allocation11 + $0x110] sm:$0xff]  ;;  %v5253_v1 = vld [vmem:[#allocation11 + $0x158] sm:$0xff]  ;;  %v4936_v11 = vld [vmem:[#allocation2 + $0x148] sm:$0xff] }
 0x54d   : > { %8366 = vmatprep.subr.bf16.mxu1 %v8365_v36  ;;  %v8401_v21 = vpack.c.bf16 %v5245_v33, %v5244_v41 }
 0x54f   : > { %7590 = vmatmul.mubr.f32.vlgmr.msra.gmra.mrb[16].mxu1 %v10175_v46  ;;  %v4707_v46 = vld [vmem:[#allocation2 + $0x124] sm:$0xff] }
 0x550   : > { %8368 = vmatpush3.bf16.msra.mxu1 %v8365_v36  ;;  %7592 = vmatprep.mubr.f32.mxu1 %v10177_v57  ;;  %v8381_v57 = vpack.c.bf16 %v4951_v16, %v4950_v59  ;;  %v5246_v36 = vld [vmem:[#allocation11 + $0x120] sm:$0xff]  ;;  %v5256_v59 = vld [vmem:[#allocation11 + $0x170] sm:$0xff] }
 0x551   : > { %8370 = vmatprep.subr.bf16.mxu1 %v8369_v4  ;;  %v8405_v62 = vpack.c.bf16 %v5247_v54, %v5246_v36 }
 0x553   : > { %7593 = vmatmul.mubr.f32.gmra.mrb[18].mxu1 %v10181_v49  ;;  %v4708_v49 = vld [vmem:[#allocation2 + $0x12c] sm:$0xff] }
 0x554   : > { %8372 = vmatpush3.bf16.msra.mxu1 %v8369_v4  ;;  %7595 = vmatprep.mubr.f32.mxu1 %v10183_v29  ;;  %v4709_v29 = vld [vmem:[#allocation2 + $0x13c] sm:$0xff]  ;;  %v5248_v4 = vld [vmem:[#allocation11 + $0x130] sm:$0xff] }
 0x555   : > { %8374 = vmatprep.subr.bf16.mxu1 %v8373_v63 }
 0x557   : > { %7596 = vmatmul.mubr.f32.gmra.mrb[20].mxu1 %v10187_v34  ;;  %v4710_v34 = vld [vmem:[#allocation2 + $0x144] sm:$0xff] }
 0x558   : > { %8376 = vmatpush3.bf16.msra.mxu1 %v8373_v63  ;;  %7598 = vmatprep.mubr.f32.mxu1 %v10189_v37  ;;  %v4711_v37 = vld [vmem:[#allocation2 + $0x154] sm:$0xff]  ;;  %v5251_v63 = vld [vmem:[#allocation11 + $0x148] sm:$0xff] }
 0x559   : > { %8378 = vmatprep.subr.bf16.mxu1 %v8377_v52 }
 0x55b   : > { %7599 = vmatmul.mubr.f32.gmra.mrb[22].mxu1 %v10193_v51  ;;  %v4712_v51 = vld [vmem:[#allocation2 + $0x15c] sm:$0xff] }
 0x55c   : > { %8380 = vmatpush3.bf16.msra.mxu1 %v8377_v52  ;;  %7601 = vmatprep.mubr.f32.mxu1 %v4707_v46  ;;  %v10260_v46 = vld [vmem:[#allocation14 + $0x2] ss:$0 sm:$0xff] }
 0x55d   : > { %8382 = vmatprep.subr.bf16.mxu1 %v8381_v57 }
 0x55f   : > { %7602 = vmatmul.mubr.f32.gmra.mrb[24].mxu1 %v4708_v49 }
 0x560   : > { %8384 = vmatpush3.bf16.msra.mxu1 %v8381_v57  ;;  %7604 = vmatprep.mubr.f32.mxu1 %v4709_v29  ;;  %v10262_v57 = vld [vmem:[#allocation15 + $0x2] ss:$0 sm:$0xff] }
 0x561   : > { %8386 = vmatprep.subr.bf16.mxu1 %v8385_v40 }
 0x563   : > { %7605 = vmatmul.mubr.f32.gmra.mrb[26].mxu1 %v4710_v34 }
 0x564   : > { %8388 = vmatpush3.bf16.msra.mxu1 %v8385_v40  ;;  %7607 = vmatprep.mubr.f32.mxu1 %v4711_v37 }
 0x565   : > { %8390 = vmatprep.subr.bf16.mxu1 %v8389_v22 }
 0x567   : > { %7608 = vmatmul.mubr.f32.gmra.mrb[28].mxu1 %v4712_v51 }
 0x568   : > { %8392 = vmatpush3.bf16.msra.mxu1 %v8389_v22  ;;  %7610 = vmatprep.mubr.f32.mxu1 %v4713_v35 }
 0x569   : > { %8394 = vmatprep.subr.bf16.mxu1 %v8393_v45 }
 0x56b   : > { %7611 = vmatmul.mubr.f32.gmra.mrb[30].mxu1 %v4714_v24 }
 0x56c   : > { %8396 = vmatpush3.bf16.msra.mxu1 %v8393_v45  ;;  %7645 = vmatprep.mubr.f32.mxu1 %v10147_v58  ;;  %v8409_v58 = vpack.c.bf16 %v5249_v39, %v5248_v4 }
 0x56d   : > { %8398 = vmatprep.subr.bf16.mxu1 %v8397_v2 }
 0x56f   : > { %7646 = vmatmul.mubr.f32.vlgmr.msra.gmra.mrb[16].mxu1 %v10205_v0  ;;  %v5252_v0 = vld [vmem:[#allocation11 + $0x150] sm:$0xff] }
 0x570   : > { %7648 = vmatprep.mubr.f32.mxu1 %v10153_v15  ;;  %8400 = vmatpush3.bf16.msra.mxu1 %v8397_v2  ;;  %v8413_v15 = vpack.c.bf16 %v5251_v63, %v5250_v44 }
 0x571   : > { %8402 = vmatprep.subr.bf16.mxu1 %v8401_v21 }
 0x573   : > { %7649 = vmatmul.mubr.f32.gmra.mrb[18].mxu1 %v10209_v7  ;;  %v4934_v7 = vld [vmem:[#allocation2 + $0x130] sm:$0xff] }
 0x574   : > { %7651 = vmatprep.mubr.f32.mxu1 %v10159_v32  ;;  %8404 = vmatpush3.bf16.msra.mxu1 %v8401_v21  ;;  %v8417_v32 = vpack.c.bf16 %v5253_v1, %v5252_v0 }
 0x575   : > { %8406 = vmatprep.subr.bf16.mxu1 %v8405_v62 }
 0x577   : > { %7652 = vmatmul.mubr.f32.gmra.mrb[20].mxu1 %v10213_v43  ;;  %v4940_v43 = vld [vmem:[#allocation2 + $0x178] sm:$0xff] }
 0x578   : > { %7654 = vmatprep.mubr.f32.mxu1 %v10165_v6  ;;  %8408 = vmatpush3.bf16.msra.mxu1 %v8405_v62  ;;  %v4938_v6 = vld [vmem:[#allocation2 + $0x160] sm:$0xff] }
 0x579   : > { %8410 = vmatprep.subr.bf16.mxu1 %v8409_v58 }
 0x57b   : > { %7655 = vmatmul.mubr.f32.gmra.mrb[22].mxu1 %v10217_v30  ;;  %v5254_v30 = vld [vmem:[#allocation11 + $0x160] sm:$0xff] }
 0x57c   : > { %7657 = vmatprep.mubr.f32.mxu1 %v10228_v60  ;;  %8412 = vmatpush3.bf16.msra.mxu1 %v8409_v58  ;;  %v5255_v60 = vld [vmem:[#allocation11 + $0x168] sm:$0xff] }
 0x57d   : > { %8414 = vmatprep.subr.bf16.mxu1 %v8413_v15  ;;  %v8421_v52 = vpack.c.bf16 %v5255_v60, %v5254_v30 }
 0x57f   : > { %7658 = vmatmul.mubr.f32.gmra.mrb[24].mxu1 %v4934_v7 }
 0x580   : > { %7660 = vmatprep.mubr.f32.mxu1 %v10231_v27  ;;  %8416 = vmatpush3.bf16.msra.mxu1 %v8413_v15  ;;  %v5257_v27 = vld [vmem:[#allocation11 + $0x178] sm:$0xff] }
 0x581   : > { %8418 = vmatprep.subr.bf16.mxu1 %v8417_v32  ;;  %v8425_v16 = vpack.c.bf16 %v5257_v27, %v5256_v59 }
 0x583   : > { %7661 = vmatmul.mubr.f32.gmra.mrb[26].mxu1 %v4936_v11 }
 0x584   : > { %7663 = vmatprep.mubr.f32.mxu1 %v10234_v61  ;;  %8420 = vmatpush3.bf16.msra.mxu1 %v8417_v32 }
 0x585   : > { %8422 = vmatprep.subr.bf16.mxu1 %v8421_v52 }
 0x587   : > { %7664 = vmatmul.mubr.f32.gmra.mrb[28].mxu1 %v4938_v6 }
 0x588   : > { %7666 = vmatprep.mubr.f32.mxu1 %v10237_v9  ;;  %8424 = vmatpush3.bf16.msra.mxu1 %v8421_v52 }
 0x589   : > { %8426 = vmatprep.subr.bf16.mxu1 %v8425_v16 }
 0x58b   : > { %7667 = vmatmul.mubr.f32.gmra.mrb[30].mxu1 %v4940_v43 }
 0x58c   : > { %8428 = vmatpush3.bf16.msra.mxu1 %v8425_v16 }
 0x642   : > { %v7647_v61 = vpop.f32.mrb[16].mxu1 }
 0x643   : > { %v5189_v56 = vmul.f32 %v7647_v61, %v10260_v46  ;;  %v5024_v9 = vpop.f32.mrb[17].mxu1 }
 0x644   : > { %v5188_v17 = vmul.f32 %v10260_v46, %v5024_v9 }
 0x645   : > { %v5210_v49 = vadd.f32 %v10262_v57, %v5189_v56 }
 0x646   : > { %v5209_v29 = vadd.f32 %v10262_v57, %v5188_v17  ;;  %v7650_v40 = vpop.f32.mrb[18].mxu1 }
 0x647   : > { %v5191_v20 = vmul.f32 %v7650_v40, %v10260_v46  ;;  %v5034_v50 = vpop.f32.mrb[19].mxu1  ;;  %v5226_v22 = vmax.f32 %v5210_v49, 0.0 }
 0x648   : > { %v5225_v34 = vmax.f32 %v5209_v29, 0.0  ;;  %v5190_v37 = vmul.f32 %v10260_v46, %v5034_v50 }
 0x649   : > { %v5212_v48 = vadd.f32 %v10262_v57, %v5191_v20 }
 0x64a   : > { %v5211_v3 = vadd.f32 %v10262_v57, %v5190_v37  ;;  %v7653_v51 = vpop.f32.mrb[20].mxu1  ;;  %7701 = vmatprep.mubr.f32.mxu1 %v5225_v34 }
 0x64b   : > { %v5193_v35 = vmul.f32 %v7653_v51, %v10260_v46  ;;  %v5044_v45 = vpop.f32.mrb[21].mxu1  ;;  %7702 = vmatmul.mubr.f32.vlgmr.msra.gmra.mrb[0].mxu1 %v5226_v22  ;;  %v5228_v24 = vmax.f32 %v5212_v48, 0.0 }
 0x64c   : > { %v5227_v8 = vmax.f32 %v5211_v3, 0.0  ;;  %v5192_v47 = vmul.f32 %v10260_v46, %v5044_v45 }
 0x64d   : > { %v5214_v2 = vadd.f32 %v10262_v57, %v5193_v35 }
 0x64e   : > { %v5213_v41 = vadd.f32 %v10262_v57, %v5192_v47  ;;  %v7656_v33 = vpop.f32.mrb[22].mxu1  ;;  %7704 = vmatprep.mubr.f32.mxu1 %v5227_v8 }
 0x64f   : > { %v5195_v21 = vmul.f32 %v7656_v33, %v10260_v46  ;;  %v5054_v36 = vpop.f32.mrb[23].mxu1  ;;  %7705 = vmatmul.mubr.f32.gmra.mrb[2].mxu1 %v5228_v24  ;;  %v5230_v4 = vmax.f32 %v5214_v2, 0.0  ;;  %v10297_v24 = vld [vmem:[%s9694_s27] ss:$0 sm:$0xff]  ;;  %s10525_s27 = sld [smem:[#allocation50_spill]] }
 0x650   : > { %v5229_v54 = vmax.f32 %v5213_v41, 0.0  ;;  %v5194_v62 = vmul.f32 %v10260_v46, %v5054_v36 }
 0x651   : > { %v5216_v39 = vadd.f32 %v10262_v57, %v5195_v21 }
 0x652   : > { %v5215_v58 = vadd.f32 %v10262_v57, %v5194_v62  ;;  %v7659_v44 = vpop.f32.mrb[24].mxu1  ;;  %7707 = vmatprep.mubr.f32.mxu1 %v5229_v54 }
 0x653   : > { %v5197_v63 = vmul.f32 %v7659_v44, %v10260_v46  ;;  %v5064_v15 = vpop.f32.mrb[25].mxu1  ;;  %7708 = vmatmul.mubr.f32.gmra.mrb[4].mxu1 %v5230_v4  ;;  %v5232_v7 = vmax.f32 %v5216_v39, 0.0  ;;  %v10306_v4 = vld [vmem:[#allocation18] ss:$0 sm:$0xff] }
 0x654   : > { %v5231_v0 = vmax.f32 %v5215_v58, 0.0  ;;  %v5196_v1 = vmul.f32 %v10260_v46, %v5064_v15 }
 0x655   : > { %v5218_v32 = vadd.f32 %v10262_v57, %v5197_v63  ;;  %s10376_s1 = scalar_lea.hbm %s10525_s27, %s5785_s18 }
 0x656   : > { %v5217_v11 = vadd.f32 %v10262_v57, %v5196_v1  ;;  %v7662_v6 = vpop.f32.mrb[26].mxu1  ;;  %7710 = vmatprep.mubr.f32.mxu1 %v5231_v0 }
 0x657   : > { %v5199_v43 = vmul.f32 %v7662_v6, %v10260_v46  ;;  %v5074_v30 = vpop.f32.mrb[27].mxu1  ;;  %7711 = vmatmul.mubr.f32.gmra.mrb[6].mxu1 %v5232_v7  ;;  %v5234_v59 = vmax.f32 %v5218_v32, 0.0 }
 0x658   : > { %v5233_v60 = vmax.f32 %v5217_v11, 0.0  ;;  %v5198_v52 = vmul.f32 %v10260_v46, %v5074_v30 }
 0x659   : > { %v5220_v27 = vadd.f32 %v10262_v57, %v5199_v43 }
 0x65a   : > { %v5219_v16 = vadd.f32 %v10262_v57, %v5198_v52  ;;  %v7665_v61 = vpop.f32.mrb[28].mxu1  ;;  %7713 = vmatprep.mubr.f32.mxu1 %v5233_v60 }
 0x65b   : > { %v5201_v56 = vmul.f32 %v7665_v61, %v10260_v46  ;;  %v5084_v9 = vpop.f32.mrb[29].mxu1  ;;  %7714 = vmatmul.mubr.f32.gmra.mrb[8].mxu1 %v5234_v59  ;;  %v5236_v29 = vmax.f32 %v5220_v27, 0.0 }
 0x65c   : > { %v5235_v17 = vmax.f32 %v5219_v16, 0.0  ;;  %v5200_v49 = vmul.f32 %v10260_v46, %v5084_v9 }
 0x65d   : > { %v5222_v40 = vadd.f32 %v10262_v57, %v5201_v56 }
 0x65e   : > { %v5221_v20 = vadd.f32 %v10262_v57, %v5200_v49  ;;  %v7668_v50 = vpop.f32.mrb[30].mxu1  ;;  %7716 = vmatprep.mubr.f32.mxu1 %v5235_v17 }
 0x65f   : > { %v5203_v34 = vmul.f32 %v7668_v50, %v10260_v46  ;;  %v5094_v37 = vpop.f32.mrb[31].mxu1  ;;  %7717 = vmatmul.mubr.f32.gmra.mrb[10].mxu1 %v5236_v29  ;;  %v5238_v3 = vmax.f32 %v5222_v40, 0.0 }
 0x660   : > { %v5237_v22 = vmax.f32 %v5221_v20, 0.0  ;;  %v5202_v48 = vmul.f32 %v10260_v46, %v5094_v37  ;;  %v10301_v46 = vld [vmem:[#allocation17] ss:$0 sm:$0xff] }
 0x661   : > { %v5224_v51 = vadd.f32 %v10262_v57, %v5203_v34 }
 0x662   : > { %v5223_v35 = vadd.f32 %v10262_v57, %v5202_v48  ;;  %7719 = vmatprep.mubr.f32.mxu1 %v5237_v22 }
 0x663   : > { %7720 = vmatmul.mubr.f32.gmra.mrb[12].mxu1 %v5238_v3  ;;  %v5240_v8 = vmax.f32 %v5224_v51, 0.0 }
 0x664   : > { %v5239_v45 = vmax.f32 %v5223_v35, 0.0 }
 0x666   : > { %7722 = vmatprep.mubr.f32.mxu1 %v5239_v45 }
 0x667   : > { %7723 = vmatmul.mubr.f32.gmra.mrb[14].mxu1 %v5240_v8 }
 0x71e   : > { %v7703_v47 = vpop.f32.mrb[0].mxu1 }
 0x71f   : > { %v8429_v2 = vadd.f32 %v7703_v47, %v9946_v38  ;;  %v5324_v41 = vpop.f32.mrb[1].mxu1 }
 0x720   : > { %v8430_v33 = vadd.f32 %v5324_v41, %v9948_v53 }
 0x721   : > { %v5459_v21 = vadd.f32 %v8429_v2, %v10297_v24 }
 0x722   : > { %v5458_v57 = vadd.f32 %v8430_v33, %v10297_v24  ;;  %v7706_v36 = vpop.f32.mrb[2].mxu1 }
 0x723   : > { %v8431_v54 = vadd.f32 %v7706_v36, %v9956_v12  ;;  %v5334_v62 = vpop.f32.mrb[3].mxu1  ;;  %v5482_v39 = vmul.f32 %v10301_v46, %v5459_v21 }
 0x724   : > { %v8432_v58 = vadd.f32 %v5334_v62, %v9958_v55  ;;  %v5481_v38 = vmul.f32 %v10301_v46, %v5458_v57 }
 0x725   : > { %v5505_v1 = vadd.f32 %v10306_v4, %v5482_v39  ;;  %v5461_v12 = vadd.f32 %v8431_v54, %v10297_v24 }
 0x726   : > { %v5460_v53 = vadd.f32 %v8432_v58, %v10297_v24  ;;  %v7709_v44 = vpop.f32.mrb[4].mxu1  ;;  %v5504_v63 = vadd.f32 %v10306_v4, %v5481_v38 }
 0x727   : > { %v8433_v15 = vadd.f32 %v7709_v44, %v9964_v5  ;;  %v5344_v0 = vpop.f32.mrb[5].mxu1  ;;  %v5521_v30 = vmax.f32 %v5505_v1, 0.0  ;;  %v5484_v59 = vmul.f32 %v10301_v46, %v5461_v12 }
 0x728   : > { %v8434_v7 = vadd.f32 %v5344_v0, %v9966_v10  ;;  %v5520_v32 = vmax.f32 %v5504_v63, 0.0  ;;  %v5483_v11 = vmul.f32 %v10301_v46, %v5460_v53 }
 0x729   : > { %v5463_v10 = vadd.f32 %v8433_v15, %v10297_v24  ;;  %v5507_v9 = vadd.f32 %v10306_v4, %v5484_v59 }
 0x72a   : > { %v7712_v55 = vpop.f32.mrb[6].mxu1  ;;  %5536 = vxpose.xlu0.b32.start [1/16] (narrow) %v5520_v32, 32  ;;  %v5462_v60 = vadd.f32 %v8434_v7, %v10297_v24  ;;  %v5506_v52 = vadd.f32 %v10306_v4, %v5483_v11 }
 0x72b   : > { %v8435_v6 = vadd.f32 %v7712_v55, %v9970_v14  ;;  %v5354_v43 = vpop.f32.mrb[7].mxu1  ;;  %v5486_v40 = vmul.f32 %v10301_v46, %v5463_v10 }
 0x72c   : > { %v8436_v5 = vadd.f32 %v5354_v43, %v9972_v19  ;;  %v5522_v14 = vmax.f32 %v5506_v52, 0.0  ;;  %v5485_v17 = vmul.f32 %v10301_v46, %v5462_v60 }
 0x72d   : > { %v5509_v48 = vadd.f32 %v10306_v4, %v5486_v40  ;;  %v5465_v3 = vadd.f32 %v8435_v6, %v10297_v24 }
 0x72e   : > { %v7715_v27 = vpop.f32.mrb[8].mxu1  ;;  %5537 = vxpose.xlu0.b32.cont [2/16] (narrow) %v5521_v30, 32  ;;  %v5464_v20 = vadd.f32 %v8436_v5, %v10297_v24  ;;  %v5508_v34 = vadd.f32 %v10306_v4, %v5485_v17 }
 0x72f   : > { %v8437_v16 = vadd.f32 %v7715_v27, %v9976_v42  ;;  %v5364_v61 = vpop.f32.mrb[9].mxu1  ;;  %v5523_v42 = vmax.f32 %v5507_v9, 0.0  ;;  %v5525_v47 = vmax.f32 %v5509_v48, 0.0  ;;  %v5488_v33 = vmul.f32 %v10301_v46, %v5465_v3 }
 0x730   : > { %v8438_v56 = vadd.f32 %v5364_v61, %v9978_v13  ;;  %v5524_v51 = vmax.f32 %v5508_v34, 0.0  ;;  %v5487_v35 = vmul.f32 %v10301_v46, %v5464_v20 }
 0x731   : > { %v5511_v57 = vadd.f32 %v10306_v4, %v5488_v33 }
 0x732   : > { %v7718_v49 = vpop.f32.mrb[10].mxu1  ;;  %5538 = vxpose.xlu0.b32.cont [3/16] (narrow) %v5522_v14, 32  ;;  %v5466_v2 = vadd.f32 %v8438_v56, %v10297_v24  ;;  %v5510_v41 = vadd.f32 %v10306_v4, %v5487_v35 }
 0x733   : > { %v8439_v19 = vadd.f32 %v7718_v49, %v9982_v25  ;;  %v5374_v29 = vpop.f32.mrb[11].mxu1  ;;  %v5527_v54 = vmax.f32 %v5511_v57, 0.0 }
 0x734   : > { %v8440_v50 = vadd.f32 %v5374_v29, %v9984_v18  ;;  %v5526_v21 = vmax.f32 %v5510_v41, 0.0  ;;  %v5489_v36 = vmul.f32 %v10301_v46, %v5466_v2 }
 0x735   : > { %v5469_v39 = vadd.f32 %v8439_v19, %v10297_v24 }
 0x736   : > { %v7721_v13 = vpop.f32.mrb[12].mxu1  ;;  %5539 = vxpose.xlu0.b32.cont [4/16] (narrow) %v5523_v42, 32  ;;  %v5512_v62 = vadd.f32 %v10306_v4, %v5489_v36 }
 0x737   : > { %v8441_v37 = vadd.f32 %v7721_v13, %v9988_v26  ;;  %v5384_v22 = vpop.f32.mrb[13].mxu1  ;;  %v5492_v0 = vmul.f32 %v10301_v46, %v5469_v39 }
 0x738   : > { %v8442_v25 = vadd.f32 %v5384_v22, %v9990_v23  ;;  %v5467_v23 = vadd.f32 %v8437_v16, %v10297_v24  ;;  %v5528_v58 = vmax.f32 %v5512_v62, 0.0 }
 0x739   : > { %v5471_v1 = vadd.f32 %v8441_v37, %v10297_v24  ;;  %v5515_v7 = vadd.f32 %v10306_v4, %v5492_v0 }
 0x73a   : > { %v7724_v45 = vpop.f32.mrb[14].mxu1  ;;  %5540 = vxpose.xlu0.b32.cont [5/16] (narrow) %v5524_v51, 32  ;;  %v5470_v44 = vadd.f32 %v8442_v25, %v10297_v24 }
 0x73b   : > { %v8443_v18 = vadd.f32 %v7724_v45, %v9994_v31  ;;  %v5394_v8 = vpop.f32.mrb[15].mxu1  ;;  %v5468_v31 = vadd.f32 %v8440_v50, %v10297_v24  ;;  %v5531_v55 = vmax.f32 %v5515_v7, 0.0  ;;  %v5494_v43 = vmul.f32 %v10301_v46, %v5471_v1 }
 0x73c   : > { %v8444_v26 = vadd.f32 %v5394_v8, %v9996_v28  ;;  %v5490_v28 = vmul.f32 %v10301_v46, %v5467_v23  ;;  %v5493_v32 = vmul.f32 %v10301_v46, %v5470_v44 }
 0x73d   : > { %v5491_v53 = vmul.f32 %v10301_v46, %v5468_v31  ;;  %v5473_v30 = vadd.f32 %v8443_v18, %v10297_v24  ;;  %v5517_v5 = vadd.f32 %v10306_v4, %v5494_v43 }
 0x73e   : > { %5541 = vxpose.xlu0.b32.cont [6/16] (narrow) %v5525_v47, 32  ;;  %v5513_v38 = vadd.f32 %v10306_v4, %v5490_v28  ;;  %v5472_v11 = vadd.f32 %v8444_v26, %v10297_v24  ;;  %v5516_v6 = vadd.f32 %v10306_v4, %v5493_v32 }
 0x73f   : > { %v5514_v15 = vadd.f32 %v10306_v4, %v5491_v53  ;;  %v5533_v59 = vmax.f32 %v5517_v5, 0.0  ;;  %v5496_v10 = vmul.f32 %v10301_v46, %v5473_v30 }
 0x740   : > { %v5529_v63 = vmax.f32 %v5513_v38, 0.0  ;;  %v5532_v60 = vmax.f32 %v5516_v6, 0.0  ;;  %v5495_v52 = vmul.f32 %v10301_v46, %v5472_v11 }
 0x741   : > { %v5530_v12 = vmax.f32 %v5514_v15, 0.0  ;;  %v5519_v24 = vadd.f32 %v10306_v4, %v5496_v10 }
 0x742   : > { %5542 = vxpose.xlu0.b32.cont [7/16] (narrow) %v5526_v21, 32  ;;  %v5518_v27 = vadd.f32 %v10306_v4, %v5495_v52 }
 0x743   : > { %v5535_v61 = vmax.f32 %v5519_v24, 0.0 }
 0x744   : > { %v5534_v16 = vmax.f32 %v5518_v27, 0.0 }
 0x746   : > { %5543 = vxpose.xlu0.b32.cont [8/16] (narrow) %v5527_v54, 32 }
 0x74a   : > { %5544 = vxpose.xlu0.b32.cont [9/16] (narrow) %v5528_v58, 32 }
 0x74e   : > { %5545 = vxpose.xlu0.b32.cont [10/16] (narrow) %v5529_v63, 32 }
 0x752   : > { %5546 = vxpose.xlu0.b32.cont [11/16] (narrow) %v5530_v12, 32 }
 0x756   : > { %5547 = vxpose.xlu0.b32.cont [12/16] (narrow) %v5531_v55, 32 }
 0x75a   : > { %5548 = vxpose.xlu0.b32.cont [13/16] (narrow) %v5532_v60, 32 }
 0x75e   : > { %5549 = vxpose.xlu0.b32.cont [14/16] (narrow) %v5533_v59, 32 }
 0x762   : > { %5550 = vxpose.xlu0.b32.cont [15/16] (narrow) %v5534_v16, 32 }
 0x766   : > { %5551 = vxpose.xlu0.b32.end [16/16] (narrow) %v5535_v61, 32 }
 0x7aa   : > { %v5552_v56 = vpop.trf.xlu0 }
 0x7ab   : > { %5568 = vst [vmem:[%s9726_s7] sm:$0xff] %v5552_v56 }
 0x7ae   : > { %v5553_v14 = vpop.trf.xlu0 }
 0x7af   : > { %5569 = vst [vmem:[%s9726_s7 + $0x8] sm:$0xff] %v5553_v14 }
 0x7b2   : > { %v5554_v46 = vpop.trf.xlu0 }
 0x7b3   : > { %5570 = vst [vmem:[%s9726_s7 + $0x10] sm:$0xff] %v5554_v46 }
 0x7b6   : > { %v5555_v4 = vpop.trf.xlu0 }
 0x7b7   : > { %5571 = vst [vmem:[%s9726_s7 + $0x18] sm:$0xff] %v5555_v4 }
 0x7b8   : > { %9159 = shalt.err (!%p9156_p11)
}
 0x7b9   : > { %s9160_s29 = scalar_lea.hbm %s10376_s1, 512  ;;  %s9164_s2 = scalar_lea.hbm %s10525_s27, 2048 }
 0x7ba   : > { %p9161_p7 = scmp.ne.s32.totalorder %s10376_s1, %s9160_s29  ;;  %p9165_p5 = scmp.lt.u32.totalorder %s10376_s1, %s10525_s27 }
 0x7bb   : > { %p9166_p1 = scmp.lt.u32.totalorder %s9164_s2, %s9160_s29  ;;  %p9168_p6 = scmp.lt.u32.totalorder %s9160_s29, %s10376_s1 }
 0x7bc   : > { %p9162_p12 = pnand %p9161_p7, %p10526_p13 }
 0x7bd   : > { %p9167_p0 = por %p9166_p1, %p9165_p5 }
 0x7be   : > { %p9163_p3 = pneg %p9162_p12 }
 0x7bf   : > { %p9169_p4 = por %p9168_p6, %p9167_p0 }
 0x7c1   : > { %p9170_p9 = pnand %p9169_p4, %p9163_p3 }
 0x7c3   : > { %9173 = shalt.err (!%p9170_p9)
}
 0x7c4   : > { %s9304_s21 = smov 128   ;;  %s9305_s7 = smov 256  }
 0x7c5   : > { %s9306_s6 = smov 8  }
 0x7c6   : > { %8747 = dma.vmem_to_hbm [thread:$0]  (%p10526_p13), %s10378_s26, 512, %s10376_s1, %s10383_s16, %s9304_s21, %s9305_s7, %s9306_s6  }
 0x7c7 PF: > { %s10527_s8 = sld [smem:[#allocation33_spill]]  ;;  %p8794_p10 = scmp.ge.s32.totalorder %s9290_s19, 2 }
 0x7c8   : > { %p10528_p8 = scmp.ne.s32.totalorder %s10506_s9, 0 }
 0x7ca   : > { %p8776_p2 = pnand %p8794_p10, %p10528_p8 }
 0x7cd   : > { %s5602_s18 = sand.u32 1, %s10527_s8  }
 0x7ce   : > { %s5603_s4 = scalar_lea.sflag [#allocation8], %s5602_s18 }
 0x7cf   : > { %9245 = dma.done.wait (!%p8776_p2), %s5603_s4, 512  }
 0x7d0   : > { %9247 = vsyncadd (!%p8776_p2), %s5603_s4, 4294966784  ;;  %s29_s19 = sadd.s32 1, %s9290_s19   ;;  %s10529_s30 = sld [smem:[#allocation34_spill]] }
 0x7d1   : > { %p26_p11 = scmp.ge.s32.totalorder %s29_s19, 6   ;;  %s10530_s16 = sld [smem:[#allocation37_spill]] }
 0x7d2   : > { %s10531_s25 = sld [smem:[#allocation39_spill]]  ;;  %s10532_s18 = sld [smem:[#allocation40_spill]] }
 0x7d3   : > { %s10533_s10 = smov %s9258_s11  ;;  %s10534_s11 = smov %s9634_s28 }
 0x7d4   : > { %s10535_s12 = smov %s9266_s13  ;;  %s10536_s13 = smov %s9270_s14 }
 0x7d5   : > { %s10537_s14 = smov %s9631_s23  ;;  %s10538_s15 = smov %s9282_s17 }
 0x7d6   :  { %28 = sbr.rel (!%p26_p11) target bundleno = 24 (0x18), region = 154 }
 0x7d8   : > { %s10539_s17 = smov %s10531_s25 }
 0x7dd   :  { %5608 = vsyncpa [#allocation7], 1 }
 0x7de   :  { %5610 = vsyncpa [#allocation7 + $0x1], 1 }
 0x7df   :  { %5611 = vsyncpa [#allocation10], 1 }
 0x7e0   :  { %5612 = vsyncpa [#allocation13], 1 }
 0x7e1   :  { %5614 = vsyncpa [#allocation13 + $0x1], 1 }
 0x7e2   :  { %5615 = vsyncpa [#allocation16], 1 }
 0x7e3   :  { %5616 = vsyncpa [#allocation19], 1 }
 0x7e4   :  { %5617 = vsyncpa [#allocation8], 1 }
 0x7e5   :  { %5619 = vsyncpa [#allocation8 + $0x1], 1 }
 0x7e6   :  { %5620 = vsyncmov [#allocation5] }
 0x7e9   :  { %s5621_s23 = vpop.sfrf %5620 }
 0x7ea   :  { %p5788_p13 = scmp.ne.s32.totalorder %s5621_s23, 0 }
 0x7ec   :  { %5625 = shalt.err (%p5788_p13)  }

</bundles_post_ra>
